<compile_context>
chip_gen: v5e
topology: v5e:2x2
jax: 0.10.0
libtpu: 0.0.40
codegen_flags: <defaults>
</compile_context>

<pallas_src>
import math
import functools

import jax
import jax.numpy as jnp
import numpy as np
from jax.experimental import pallas as pl
from jax.experimental.pallas import tpu as pltpu


OUT_PAD = 128  # lane-dense padded width of the fc output (real logits are the first 10)


# ----------------------------------------------------------------------------- kernel
def _esn_recurrence_kernel(
    xin_ref,       # (SEQ, TB, M)  precomputed input projection (+ bias1), lane-dense
    w_a_ref,       # (2M, M)       [w_res1*binde1 ; w_res21*binde2]   (acts on [x1|x2])
    w_b1_ref,      # (M, M)        w_res12*binde3                     (acts on pre-tanh x1)
    w_b2_ref,      # (M, M)        w_res2*binde4                      (acts on old x2)
    b2_ref,        # (1, M)        b_res12 + b_x2
    fc_w_ref,      # (M, OUT_PAD)  fc weight^T, zero-padded to 128 cols
    fc_b_ref,      # (1, OUT_PAD)  fc bias, zero-padded
    out_ref,       # (TB, OUT_PAD)
    x1_out_ref,    # (TB, M)
    x2_out_ref,    # (TB, M)
    h_ref,         # scratch (TB, 2M): persistent reservoir state [x1 | x2]
):
    seq, tb, m = xin_ref.shape

    # Hoisted constant reads / broadcasts (JAX does not CSE broadcast_in_dim in loops).
    w_a = w_a_ref[...]                                     # (2M, M)
    w_b1 = w_b1_ref[...]                                   # (M, M)
    w_b2 = w_b2_ref[...]                                   # (M, M)
    bias2 = jnp.broadcast_to(b2_ref[...], (tb, m))         # (TB, M)

    # Fresh zero state per batch tile.
    h_ref[...] = jnp.zeros((tb, 2 * m), jnp.float32)

    # Fully-unrolled 28-step recurrence.  Per step:
    #   v       = x2_old @ B2 + bias2        (independent of x1_pre -> overlaps matmul 1)
    #   x1_pre  = xin[s] + [x1|x2] @ W_A     (K = 2M fused matmul)
    #   x2_pre  = x1_pre @ B1 + v            (K = M on the dependent chain)
    for s in range(seq):
        h = h_ref[...]                                     # (TB, 2M)
        x2_old = h[:, m:]                                  # static lane-half view
        v = jnp.dot(x2_old, w_b2, preferred_element_type=jnp.float32) + bias2
        x1_pre = xin_ref[s] + jnp.dot(h, w_a, preferred_element_type=jnp.float32)
        # x2 update uses the *pre-tanh* x1 (matches the PyTorch module exactly).
        x2_pre = jnp.dot(x1_pre, w_b1, preferred_element_type=jnp.float32) + v
        h_ref[:, :m] = jnp.tanh(x1_pre)
        h_ref[:, m:] = jnp.tanh(x2_pre)

    x1 = h_ref[:, :m]
    x2 = h_ref[:, m:]
    x1_out_ref[...] = x1
    x2_out_ref[...] = x2
    out_ref[...] = (
        jnp.dot(x2, fc_w_ref[...], preferred_element_type=jnp.float32) + fc_b_ref[...]
    )


# ----------------------------------------------------------------------------- tiling
def _round_up(x, m):
    return ((x + m - 1) // m) * m


def _chip_kind():
    try:
        return jax.devices()[0].device_kind.lower()
    except Exception:
        return ""


def _select_batch_tiling(batch):
    """Per-generation batch tile: big tiles on v5e/v6e, 2-way split + 64 MiB cap on v7x."""
    b8 = _round_up(max(batch, 1), 8)
    kind = _chip_kind()
    is_v7 = "v7" in kind                  # 2 TensorCores / chip, 64 MiB VMEM per TC
    max_tb = 256 if is_v7 else 512        # 128 MiB VMEM on v5e/v6e allows larger tiles
    if is_v7 and b8 >= 16:
        # Keep grid >= 2 so both TensorCores get work.
        tb = min(max_tb, _round_up((b8 + 1) // 2, 8))
    else:
        tb = min(max_tb, b8)
    b_pad = _round_up(b8, tb)
    return tb, b_pad, is_v7


def _vmem_limit_bytes(seq_len, tb, m, is_v7):
    f32 = 4
    io = 2 * (seq_len * tb * m + tb * (OUT_PAD + 2 * m)) * f32          # double-buffered I/O blocks
    weights = 2 * (2 * m * m + 2 * m * m + m + m * OUT_PAD + OUT_PAD) * f32
    scratch = tb * 2 * m * f32
    need = io + weights + scratch + (8 << 20)                           # compiler headroom
    cap = (40 << 20) if is_v7 else (96 << 20)
    return int(min(cap, max(16 << 20, need)))


# ----------------------------------------------------------------------------- wrapper
@functools.partial(jax.jit, static_argnames=("seq_len", "feature_size"))
def binde_esn_mnist_forward(x, params, binde1, binde2, binde3, binde4,
                            seq_len=28, feature_size=28):
    """Pallas implementation of Binde_ESN_mnist_Model.forward.

    x: (batch, 28, 28) float32.
    Returns (output (B,10), x_1 (B,M), x_2 (B,M)).
    """
    batch = x.shape[0]
    M = params["w_in"].shape[1]
    assert M % 128 == 0, "size_middle must be lane-dense (multiple of 128)"

    # --- plain-JAX glue: view(batch, seq, feature) + permute(1, 0, 2), as in PyTorch ---
    x_seq = jnp.transpose(
        x.reshape(batch, seq_len, feature_size), (1, 0, 2)
    ).astype(jnp.float32)                                   # (SEQ, B, F)

    # --- hoisted preprocessing (off the latency-critical serial chain) ---
    # Pre-mask recurrent weights.  W_A fuses the two x1-update matmuls (K=2M);
    # W_B is kept split so the dependent second matmul stays at K=M.
    w_a = jnp.concatenate(
        [params["w_res1"] * binde1, params["w_res21"] * binde2], axis=0)   # (2M, M)
    w_b1 = params["w_res12"] * binde3                                       # (M, M)
    w_b2 = params["w_res2"] * binde4                                        # (M, M)
    bias1 = params["b_in"] + params["b_x1"] + params["b_res21"]             # (1, M)
    bias2 = params["b_res12"] + params["b_x2"]                              # (1, M)

    # Input projection as ONE big matmul, bias1 folded in; lane-dense (SEQ, B, M).
    xin = jnp.einsum("sbf,fm->sbm", x_seq, params["w_in"]) + bias1

    # Lane-dense fc: pad (M, 10) -> (M, 128) and (1, 10) -> (1, 128) with zeros.
    fc_w_pad = jnp.pad(params["fc_w"], ((0, 0), (0, OUT_PAD - 10)))
    fc_b_pad = jnp.pad(params["fc_b"], ((0, 0), (0, OUT_PAD - 10)))

    # --- batch padding / per-generation tiling ---
    tb, b_pad, is_v7 = _select_batch_tiling(batch)
    if b_pad != batch:
        xin = jnp.pad(xin, ((0, 0), (0, b_pad - batch), (0, 0)))

    grid = (b_pad // tb,)

    out_shapes = (
        jax.ShapeDtypeStruct((b_pad, OUT_PAD), jnp.float32),   # fc output (padded cols)
        jax.ShapeDtypeStruct((b_pad, M), jnp.float32),         # x_1
        jax.ShapeDtypeStruct((b_pad, M), jnp.float32),         # x_2
    )

    grid_spec = pltpu.PrefetchScalarGridSpec(
        num_scalar_prefetch=0,
        grid=grid,
        in_specs=[
            pl.BlockSpec((seq_len, tb, M), lambda b: (0, b, 0)),   # xin (batch-tiled)
            pl.BlockSpec((2 * M, M), lambda b: (0, 0)),            # W_A (resident)
            pl.BlockSpec((M, M), lambda b: (0, 0)),                # B1 (resident)
            pl.BlockSpec((M, M), lambda b: (0, 0)),                # B2 (resident)
            pl.BlockSpec((1, M), lambda b: (0, 0)),                # bias2
            pl.BlockSpec((M, OUT_PAD), lambda b: (0, 0)),          # fc_w (padded)
            pl.BlockSpec((1, OUT_PAD), lambda b: (0, 0)),          # fc_b (padded)
        ],
        out_specs=[
            pl.BlockSpec((tb, OUT_PAD), lambda b: (b, 0)),
            pl.BlockSpec((tb, M), lambda b: (b, 0)),
            pl.BlockSpec((tb, M), lambda b: (b, 0)),
        ],
        scratch_shapes=[pltpu.VMEM((tb, 2 * M), jnp.float32)],     # persistent [x1|x2] state
    )

    out, x1, x2 = pl.pallas_call(
        _esn_recurrence_kernel,
        out_shape=out_shapes,
        grid_spec=grid_spec,
        compiler_params=pltpu.CompilerParams(
            dimension_semantics=("parallel",),
            vmem_limit_bytes=_vmem_limit_bytes(seq_len, tb, M, is_v7),
        ),
    )(xin, w_a, w_b1, w_b2, bias2, fc_w_pad, fc_b_pad)

    # Drop batch padding and the padded fc columns.
    return out[:batch, :10], x1[:batch], x2[:batch]


# ----------------------------------------------------------------------------- params
def init_params(key, size_in, size_middle):
    """Deterministic synthetic init mimicking kaiming_uniform_(a=sqrt(5)) + uniform bias."""
    keys = jax.random.split(key, 12)

    def kaiming_uniform(k, shape):
        fan_in = shape[1]  # PyTorch convention: dim 1 is fan_in for 2-D tensors
        bound = 1.0 / math.sqrt(fan_in)
        return jax.random.uniform(k, shape, jnp.float32, -bound, bound)

    def bias(k, fan_in, size):
        bound = 1.0 / math.sqrt(fan_in)
        return jax.random.uniform(k, (1, size), jnp.float32, -bound, bound)

    M = size_middle
    params = {
        "w_in":    kaiming_uniform(keys[0], (size_in, M)),
        "w_res1":  kaiming_uniform(keys[1], (M, M)),
        "w_res12": kaiming_uniform(keys[2], (M, M)),
        "w_res2":  kaiming_uniform(keys[3], (M, M)),
        "w_res21": kaiming_uniform(keys[4], (M, M)),
        "b_in":    bias(keys[5], M, M),
        "b_x1":    bias(keys[6], M, M),
        "b_res12": bias(keys[7], M, M),
        "b_x2":    bias(keys[8], M, M),
        "b_res21": bias(keys[9], M, M),
        # nn.Linear(M, 10): weight (10, M), bias (10); store W^T so y = x @ W^T + b
        "fc_w":    kaiming_uniform(keys[10], (10, M)).T,
        "fc_b":    bias(keys[11], M, 10),
    }
    return params


# ----------------------------------------------------------------------------- reference
def reference_forward(x, params, binde1, binde2, binde3, binde4,
                      seq_len=28, feature_size=28):
    batch = x.shape[0]
    M = params["w_in"].shape[1]
    x_seq = jnp.transpose(x.reshape(batch, seq_len, feature_size), (1, 0, 2))
    x1 = jnp.zeros((batch, M), jnp.float32)
    x2 = jnp.zeros((batch, M), jnp.float32)
    for i in range(seq_len):
        xi = x_seq[i]
        x1_pre = (xi @ params["w_in"] + params["b_in"]
                  + x1 @ (params["w_res1"] * binde1) + params["b_x1"]
                  + x2 @ (params["w_res21"] * binde2) + params["b_res21"])
        x2_pre = (x1_pre @ (params["w_res12"] * binde3) + params["b_res12"]
                  + x2 @ (params["w_res2"] * binde4) + params["b_x2"])
        x1 = jnp.tanh(x1_pre)
        x2 = jnp.tanh(x2_pre)
    out = x2 @ params["fc_w"] + params["fc_b"]
    return out, x1, x2


# ----------------------------------------------------------------------------- main
if __name__ == "__main__":
    SEQ_LEN = 28        # hardcoded in the PyTorch module (MNIST rows)
    FEATURE = 28        # hardcoded in the PyTorch module (MNIST cols) == size_in
    SIZE_MIDDLE = 128   # reservoir hidden size (lane-dense)
    BATCH = 2

    root = jax.random.PRNGKey(0)
    k_x, k_p, k_b1, k_b2, k_b3, k_b4 = jax.random.split(root, 6)

    x = jax.random.normal(k_x, (BATCH, SEQ_LEN, FEATURE), jnp.float32)
    params = init_params(k_p, FEATURE, SIZE_MIDDLE)

    # binde masks: binary {0,1} matrices of shape (M, M)
    binde1 = jax.random.bernoulli(k_b1, 0.5, (SIZE_MIDDLE, SIZE_MIDDLE)).astype(jnp.float32)
    binde2 = jax.random.bernoulli(k_b2, 0.5, (SIZE_MIDDLE, SIZE_MIDDLE)).astype(jnp.float32)
    binde3 = jax.random.bernoulli(k_b3, 0.5, (SIZE_MIDDLE, SIZE_MIDDLE)).astype(jnp.float32)
    binde4 = jax.random.bernoulli(k_b4, 0.5, (SIZE_MIDDLE, SIZE_MIDDLE)).astype(jnp.float32)

    out, x1, x2 = binde_esn_mnist_forward(x, params, binde1, binde2, binde3, binde4)
    jax.block_until_ready((out, x1, x2))

    # Sanity check vs pure-JAX reference (unfused math).
    ref_out, ref_x1, ref_x2 = reference_forward(x, params, binde1, binde2, binde3, binde4)
    np.testing.assert_allclose(np.asarray(out), np.asarray(ref_out), rtol=1e-4, atol=1e-4)
    np.testing.assert_allclose(np.asarray(x1), np.asarray(ref_x1), rtol=1e-4, atol=1e-4)
    np.testing.assert_allclose(np.asarray(x2), np.asarray(ref_x2), rtol=1e-4, atol=1e-4)

    assert out.shape == (BATCH, 10)
    assert x1.shape == (BATCH, SIZE_MIDDLE)
    assert x2.shape == (BATCH, SIZE_MIDDLE)
    print("KERNEL_OK")
</pallas_src>

<mosaic_0001>
module attributes {stable_mosaic.version = 11 : i64} {
  func.func @_esn_recurrence_kernel(%arg0: i32, %arg1: memref<28x8x128xf32, #tpu.memory_space<vmem>>, %arg2: memref<256x128xf32, #tpu.memory_space<vmem>>, %arg3: memref<128x128xf32, #tpu.memory_space<vmem>>, %arg4: memref<128x128xf32, #tpu.memory_space<vmem>>, %arg5: memref<1x128xf32, #tpu.memory_space<vmem>>, %arg6: memref<128x128xf32, #tpu.memory_space<vmem>>, %arg7: memref<1x128xf32, #tpu.memory_space<vmem>>, %arg8: memref<8x128xf32, #tpu.memory_space<vmem>>, %arg9: memref<8x128xf32, #tpu.memory_space<vmem>>, %arg10: memref<8x128xf32, #tpu.memory_space<vmem>>, %arg11: memref<8x256xf32, #tpu.memory_space<vmem>>) attributes {dimension_semantics = [#tpu.dimension_semantics<parallel>], iteration_bounds = array<i64: 1>, scalar_prefetch = 0 : i64, scratch_operands = 1 : i64, tpu.core_type = #tpu.core_type<tc>, window_params = [{transform_indices = @transform_0, window_bounds = array<i64: 28, 8, 128>}, {pipeline_mode = #tpu.pipeline_mode<synchronous>, transform_indices = @transform_1, window_bounds = array<i64: 256, 128>}, {pipeline_mode = #tpu.pipeline_mode<synchronous>, transform_indices = @transform_2, window_bounds = array<i64: 128, 128>}, {pipeline_mode = #tpu.pipeline_mode<synchronous>, transform_indices = @transform_3, window_bounds = array<i64: 128, 128>}, {pipeline_mode = #tpu.pipeline_mode<synchronous>, transform_indices = @transform_4, window_bounds = array<i64: 1, 128>}, {pipeline_mode = #tpu.pipeline_mode<synchronous>, transform_indices = @transform_5, window_bounds = array<i64: 128, 128>}, {pipeline_mode = #tpu.pipeline_mode<synchronous>, transform_indices = @transform_6, window_bounds = array<i64: 1, 128>}, {transform_indices = @transform_7, window_bounds = array<i64: 8, 128>}, {transform_indices = @transform_8, window_bounds = array<i64: 8, 128>}, {transform_indices = @transform_9, window_bounds = array<i64: 8, 128>}]} {
    %c0 = arith.constant 0 : index
    %c0_0 = arith.constant 0 : index
    %0 = vector.load %arg2[%c0, %c0_0] : memref<256x128xf32, #tpu.memory_space<vmem>>, vector<256x128xf32>
    %c0_1 = arith.constant 0 : index
    %c0_2 = arith.constant 0 : index
    %1 = vector.load %arg3[%c0_1, %c0_2] : memref<128x128xf32, #tpu.memory_space<vmem>>, vector<128x128xf32>
    %c0_3 = arith.constant 0 : index
    %c0_4 = arith.constant 0 : index
    %2 = vector.load %arg4[%c0_3, %c0_4] : memref<128x128xf32, #tpu.memory_space<vmem>>, vector<128x128xf32>
    %c0_5 = arith.constant 0 : index
    %c0_6 = arith.constant 0 : index
    %3 = vector.load %arg5[%c0_5, %c0_6] : memref<1x128xf32, #tpu.memory_space<vmem>>, vector<1x128xf32>
    %4 = vector.shape_cast %3 : vector<1x128xf32> to vector<1x128xf32>
    %5 = vector.broadcast %4 : vector<1x128xf32> to vector<8x128xf32>
    %cst = arith.constant 0.000000e+00 : f32
    %6 = vector.broadcast %cst : f32 to vector<8x256xf32>
    %c0_7 = arith.constant 0 : index
    %c0_8 = arith.constant 0 : index
    %7 = vector.load %arg11[%c0_7, %c0_8] : memref<8x256xf32, #tpu.memory_space<vmem>>, vector<8x256xf32>
    tpu.vector_store %arg11[%c0_7, %c0_8], %6 {strides = array<i32>} : memref<8x256xf32, #tpu.memory_space<vmem>>, vector<8x256xf32>,
    %c0_9 = arith.constant 0 : index
    %c0_10 = arith.constant 0 : index
    %8 = vector.load %arg11[%c0_9, %c0_10] : memref<8x256xf32, #tpu.memory_space<vmem>>, vector<8x256xf32>
    %9 = vector.extract_strided_slice %8 {offsets = [0, 128], sizes = [8, 128], strides = [1, 1]} : vector<8x256xf32> to vector<8x128xf32>
    %cst_11 = arith.constant dense<0.000000e+00> : vector<8x128xf32>
    %10 = tpu.matmul %9, %2, %cst_11 {dimension_numbers = #tpu.dot_dimension_numbers<[1], [0], [0], [1], [0, 0, 1, 1], [], []>} : vector<8x128xf32>, vector<128x128xf32>, vector<8x128xf32> -> vector<8x128xf32>
    %11 = arith.addf %10, %5 : vector<8x128xf32>
    %c0_12 = arith.constant 0 : index
    %c0_13 = arith.constant 0 : index
    %c0_14 = arith.constant 0 : index
    %12 = vector.load %arg1[%c0_12, %c0_13, %c0_14] : memref<28x8x128xf32, #tpu.memory_space<vmem>>, vector<1x8x128xf32>
    %13 = vector.shape_cast %12 : vector<1x8x128xf32> to vector<8x128xf32>
    %cst_15 = arith.constant dense<0.000000e+00> : vector<8x128xf32>
    %14 = tpu.matmul %8, %0, %cst_15 {dimension_numbers = #tpu.dot_dimension_numbers<[1], [0], [0], [1], [0, 0, 1, 1], [], []>} : vector<8x256xf32>, vector<256x128xf32>, vector<8x128xf32> -> vector<8x128xf32>
    %15 = arith.addf %13, %14 : vector<8x128xf32>
    %cst_16 = arith.constant dense<0.000000e+00> : vector<8x128xf32>
    %16 = tpu.matmul %15, %1, %cst_16 {dimension_numbers = #tpu.dot_dimension_numbers<[1], [0], [0], [1], [0, 0, 1, 1], [], []>} : vector<8x128xf32>, vector<128x128xf32>, vector<8x128xf32> -> vector<8x128xf32>
    %17 = arith.addf %16, %11 : vector<8x128xf32>
    %18 = math.tanh %15 : vector<8x128xf32>
    %c0_17 = arith.constant 0 : index
    %c0_18 = arith.constant 0 : index
    %19 = vector.load %arg11[%c0_17, %c0_18] : memref<8x256xf32, #tpu.memory_space<vmem>>, vector<8x128xf32>
    tpu.vector_store %arg11[%c0_17, %c0_18], %18 {strides = array<i32>} : memref<8x256xf32, #tpu.memory_space<vmem>>, vector<8x128xf32>,
    %20 = math.tanh %17 : vector<8x128xf32>
    %c0_19 = arith.constant 0 : index
    %c128 = arith.constant 128 : index
    %21 = vector.load %arg11[%c0_19, %c128] : memref<8x256xf32, #tpu.memory_space<vmem>>, vector<8x128xf32>
    tpu.vector_store %arg11[%c0_19, %c128], %20 {strides = array<i32>} : memref<8x256xf32, #tpu.memory_space<vmem>>, vector<8x128xf32>,
    %c0_20 = arith.constant 0 : index
    %c0_21 = arith.constant 0 : index
    %22 = vector.load %arg11[%c0_20, %c0_21] : memref<8x256xf32, #tpu.memory_space<vmem>>, vector<8x256xf32>
    %23 = vector.extract_strided_slice %22 {offsets = [0, 128], sizes = [8, 128], strides = [1, 1]} : vector<8x256xf32> to vector<8x128xf32>
    %cst_22 = arith.constant dense<0.000000e+00> : vector<8x128xf32>
    %24 = tpu.matmul %23, %2, %cst_22 {dimension_numbers = #tpu.dot_dimension_numbers<[1], [0], [0], [1], [0, 0, 1, 1], [], []>} : vector<8x128xf32>, vector<128x128xf32>, vector<8x128xf32> -> vector<8x128xf32>
    %25 = arith.addf %24, %5 : vector<8x128xf32>
    %c1 = arith.constant 1 : index
    %c0_23 = arith.constant 0 : index
    %c0_24 = arith.constant 0 : index
    %26 = vector.load %arg1[%c1, %c0_23, %c0_24] : memref<28x8x128xf32, #tpu.memory_space<vmem>>, vector<1x8x128xf32>
    %27 = vector.shape_cast %26 : vector<1x8x128xf32> to vector<8x128xf32>
    %cst_25 = arith.constant dense<0.000000e+00> : vector<8x128xf32>
    %28 = tpu.matmul %22, %0, %cst_25 {dimension_numbers = #tpu.dot_dimension_numbers<[1], [0], [0], [1], [0, 0, 1, 1], [], []>} : vector<8x256xf32>, vector<256x128xf32>, vector<8x128xf32> -> vector<8x128xf32>
    %29 = arith.addf %27, %28 : vector<8x128xf32>
    %cst_26 = arith.constant dense<0.000000e+00> : vector<8x128xf32>
    %30 = tpu.matmul %29, %1, %cst_26 {dimension_numbers = #tpu.dot_dimension_numbers<[1], [0], [0], [1], [0, 0, 1, 1], [], []>} : vector<8x128xf32>, vector<128x128xf32>, vector<8x128xf32> -> vector<8x128xf32>
    %31 = arith.addf %30, %25 : vector<8x128xf32>
    %32 = math.tanh %29 : vector<8x128xf32>
    %c0_27 = arith.constant 0 : index
    %c0_28 = arith.constant 0 : index
    %33 = vector.load %arg11[%c0_27, %c0_28] : memref<8x256xf32, #tpu.memory_space<vmem>>, vector<8x128xf32>
    tpu.vector_store %arg11[%c0_27, %c0_28], %32 {strides = array<i32>} : memref<8x256xf32, #tpu.memory_space<vmem>>, vector<8x128xf32>,
    %34 = math.tanh %31 : vector<8x128xf32>
    %c0_29 = arith.constant 0 : index
    %c128_30 = arith.constant 128 : index
    %35 = vector.load %arg11[%c0_29, %c128_30] : memref<8x256xf32, #tpu.memory_space<vmem>>, vector<8x128xf32>
    tpu.vector_store %arg11[%c0_29, %c128_30], %34 {strides = array<i32>} : memref<8x256xf32, #tpu.memory_space<vmem>>, vector<8x128xf32>,
    %c0_31 = arith.constant 0 : index
    %c0_32 = arith.constant 0 : index
    %36 = vector.load %arg11[%c0_31, %c0_32] : memref<8x256xf32, #tpu.memory_space<vmem>>, vector<8x256xf32>
    %37 = vector.extract_strided_slice %36 {offsets = [0, 128], sizes = [8, 128], strides = [1, 1]} : vector<8x256xf32> to vector<8x128xf32>
    %cst_33 = arith.constant dense<0.000000e+00> : vector<8x128xf32>
    %38 = tpu.matmul %37, %2, %cst_33 {dimension_numbers = #tpu.dot_dimension_numbers<[1], [0], [0], [1], [0, 0, 1, 1], [], []>} : vector<8x128xf32>, vector<128x128xf32>, vector<8x128xf32> -> vector<8x128xf32>
    %39 = arith.addf %38, %5 : vector<8x128xf32>
    %c2 = arith.constant 2 : index
    %c0_34 = arith.constant 0 : index
    %c0_35 = arith.constant 0 : index
    %40 = vector.load %arg1[%c2, %c0_34, %c0_35] : memref<28x8x128xf32, #tpu.memory_space<vmem>>, vector<1x8x128xf32>
    %41 = vector.shape_cast %40 : vector<1x8x128xf32> to vector<8x128xf32>
    %cst_36 = arith.constant dense<0.000000e+00> : vector<8x128xf32>
    %42 = tpu.matmul %36, %0, %cst_36 {dimension_numbers = #tpu.dot_dimension_numbers<[1], [0], [0], [1], [0, 0, 1, 1], [], []>} : vector<8x256xf32>, vector<256x128xf32>, vector<8x128xf32> -> vector<8x128xf32>
    %43 = arith.addf %41, %42 : vector<8x128xf32>
    %cst_37 = arith.constant dense<0.000000e+00> : vector<8x128xf32>
    %44 = tpu.matmul %43, %1, %cst_37 {dimension_numbers = #tpu.dot_dimension_numbers<[1], [0], [0], [1], [0, 0, 1, 1], [], []>} : vector<8x128xf32>, vector<128x128xf32>, vector<8x128xf32> -> vector<8x128xf32>
    %45 = arith.addf %44, %39 : vector<8x128xf32>
    %46 = math.tanh %43 : vector<8x128xf32>
    %c0_38 = arith.constant 0 : index
    %c0_39 = arith.constant 0 : index
    %47 = vector.load %arg11[%c0_38, %c0_39] : memref<8x256xf32, #tpu.memory_space<vmem>>, vector<8x128xf32>
    tpu.vector_store %arg11[%c0_38, %c0_39], %46 {strides = array<i32>} : memref<8x256xf32, #tpu.memory_space<vmem>>, vector<8x128xf32>,
    %48 = math.tanh %45 : vector<8x128xf32>
    %c0_40 = arith.constant 0 : index
    %c128_41 = arith.constant 128 : index
    %49 = vector.load %arg11[%c0_40, %c128_41] : memref<8x256xf32, #tpu.memory_space<vmem>>, vector<8x128xf32>
    tpu.vector_store %arg11[%c0_40, %c128_41], %48 {strides = array<i32>} : memref<8x256xf32, #tpu.memory_space<vmem>>, vector<8x128xf32>,
    %c0_42 = arith.constant 0 : index
    %c0_43 = arith.constant 0 : index
    %50 = vector.load %arg11[%c0_42, %c0_43] : memref<8x256xf32, #tpu.memory_space<vmem>>, vector<8x256xf32>
    %51 = vector.extract_strided_slice %50 {offsets = [0, 128], sizes = [8, 128], strides = [1, 1]} : vector<8x256xf32> to vector<8x128xf32>
    %cst_44 = arith.constant dense<0.000000e+00> : vector<8x128xf32>
    %52 = tpu.matmul %51, %2, %cst_44 {dimension_numbers = #tpu.dot_dimension_numbers<[1], [0], [0], [1], [0, 0, 1, 1], [], []>} : vector<8x128xf32>, vector<128x128xf32>, vector<8x128xf32> -> vector<8x128xf32>
    %53 = arith.addf %52, %5 : vector<8x128xf32>
    %c3 = arith.constant 3 : index
    %c0_45 = arith.constant 0 : index
    %c0_46 = arith.constant 0 : index
    %54 = vector.load %arg1[%c3, %c0_45, %c0_46] : memref<28x8x128xf32, #tpu.memory_space<vmem>>, vector<1x8x128xf32>
    %55 = vector.shape_cast %54 : vector<1x8x128xf32> to vector<8x128xf32>
    %cst_47 = arith.constant dense<0.000000e+00> : vector<8x128xf32>
    %56 = tpu.matmul %50, %0, %cst_47 {dimension_numbers = #tpu.dot_dimension_numbers<[1], [0], [0], [1], [0, 0, 1, 1], [], []>} : vector<8x256xf32>, vector<256x128xf32>, vector<8x128xf32> -> vector<8x128xf32>
    %57 = arith.addf %55, %56 : vector<8x128xf32>
    %cst_48 = arith.constant dense<0.000000e+00> : vector<8x128xf32>
    %58 = tpu.matmul %57, %1, %cst_48 {dimension_numbers = #tpu.dot_dimension_numbers<[1], [0], [0], [1], [0, 0, 1, 1], [], []>} : vector<8x128xf32>, vector<128x128xf32>, vector<8x128xf32> -> vector<8x128xf32>
    %59 = arith.addf %58, %53 : vector<8x128xf32>
    %60 = math.tanh %57 : vector<8x128xf32>
    %c0_49 = arith.constant 0 : index
    %c0_50 = arith.constant 0 : index
    %61 = vector.load %arg11[%c0_49, %c0_50] : memref<8x256xf32, #tpu.memory_space<vmem>>, vector<8x128xf32>
    tpu.vector_store %arg11[%c0_49, %c0_50], %60 {strides = array<i32>} : memref<8x256xf32, #tpu.memory_space<vmem>>, vector<8x128xf32>,
    %62 = math.tanh %59 : vector<8x128xf32>
    %c0_51 = arith.constant 0 : index
    %c128_52 = arith.constant 128 : index
    %63 = vector.load %arg11[%c0_51, %c128_52] : memref<8x256xf32, #tpu.memory_space<vmem>>, vector<8x128xf32>
    tpu.vector_store %arg11[%c0_51, %c128_52], %62 {strides = array<i32>} : memref<8x256xf32, #tpu.memory_space<vmem>>, vector<8x128xf32>,
    %c0_53 = arith.constant 0 : index
    %c0_54 = arith.constant 0 : index
    %64 = vector.load %arg11[%c0_53, %c0_54] : memref<8x256xf32, #tpu.memory_space<vmem>>, vector<8x256xf32>
    %65 = vector.extract_strided_slice %64 {offsets = [0, 128], sizes = [8, 128], strides = [1, 1]} : vector<8x256xf32> to vector<8x128xf32>
    %cst_55 = arith.constant dense<0.000000e+00> : vector<8x128xf32>
    %66 = tpu.matmul %65, %2, %cst_55 {dimension_numbers = #tpu.dot_dimension_numbers<[1], [0], [0], [1], [0, 0, 1, 1], [], []>} : vector<8x128xf32>, vector<128x128xf32>, vector<8x128xf32> -> vector<8x128xf32>
    %67 = arith.addf %66, %5 : vector<8x128xf32>
    %c4 = arith.constant 4 : index
    %c0_56 = arith.constant 0 : index
    %c0_57 = arith.constant 0 : index
    %68 = vector.load %arg1[%c4, %c0_56, %c0_57] : memref<28x8x128xf32, #tpu.memory_space<vmem>>, vector<1x8x128xf32>
    %69 = vector.shape_cast %68 : vector<1x8x128xf32> to vector<8x128xf32>
    %cst_58 = arith.constant dense<0.000000e+00> : vector<8x128xf32>
    %70 = tpu.matmul %64, %0, %cst_58 {dimension_numbers = #tpu.dot_dimension_numbers<[1], [0], [0], [1], [0, 0, 1, 1], [], []>} : vector<8x256xf32>, vector<256x128xf32>, vector<8x128xf32> -> vector<8x128xf32>
    %71 = arith.addf %69, %70 : vector<8x128xf32>
    %cst_59 = arith.constant dense<0.000000e+00> : vector<8x128xf32>
    %72 = tpu.matmul %71, %1, %cst_59 {dimension_numbers = #tpu.dot_dimension_numbers<[1], [0], [0], [1], [0, 0, 1, 1], [], []>} : vector<8x128xf32>, vector<128x128xf32>, vector<8x128xf32> -> vector<8x128xf32>
    %73 = arith.addf %72, %67 : vector<8x128xf32>
    %74 = math.tanh %71 : vector<8x128xf32>
    %c0_60 = arith.constant 0 : index
    %c0_61 = arith.constant 0 : index
    %75 = vector.load %arg11[%c0_60, %c0_61] : memref<8x256xf32, #tpu.memory_space<vmem>>, vector<8x128xf32>
    tpu.vector_store %arg11[%c0_60, %c0_61], %74 {strides = array<i32>} : memref<8x256xf32, #tpu.memory_space<vmem>>, vector<8x128xf32>,
    %76 = math.tanh %73 : vector<8x128xf32>
    %c0_62 = arith.constant 0 : index
    %c128_63 = arith.constant 128 : index
    %77 = vector.load %arg11[%c0_62, %c128_63] : memref<8x256xf32, #tpu.memory_space<vmem>>, vector<8x128xf32>
    tpu.vector_store %arg11[%c0_62, %c128_63], %76 {strides = array<i32>} : memref<8x256xf32, #tpu.memory_space<vmem>>, vector<8x128xf32>,
    %c0_64 = arith.constant 0 : index
    %c0_65 = arith.constant 0 : index
    %78 = vector.load %arg11[%c0_64, %c0_65] : memref<8x256xf32, #tpu.memory_space<vmem>>, vector<8x256xf32>
    %79 = vector.extract_strided_slice %78 {offsets = [0, 128], sizes = [8, 128], strides = [1, 1]} : vector<8x256xf32> to vector<8x128xf32>
    %cst_66 = arith.constant dense<0.000000e+00> : vector<8x128xf32>
    %80 = tpu.matmul %79, %2, %cst_66 {dimension_numbers = #tpu.dot_dimension_numbers<[1], [0], [0], [1], [0, 0, 1, 1], [], []>} : vector<8x128xf32>, vector<128x128xf32>, vector<8x128xf32> -> vector<8x128xf32>
    %81 = arith.addf %80, %5 : vector<8x128xf32>
    %c5 = arith.constant 5 : index
    %c0_67 = arith.constant 0 : index
    %c0_68 = arith.constant 0 : index
    %82 = vector.load %arg1[%c5, %c0_67, %c0_68] : memref<28x8x128xf32, #tpu.memory_space<vmem>>, vector<1x8x128xf32>
    %83 = vector.shape_cast %82 : vector<1x8x128xf32> to vector<8x128xf32>
    %cst_69 = arith.constant dense<0.000000e+00> : vector<8x128xf32>
    %84 = tpu.matmul %78, %0, %cst_69 {dimension_numbers = #tpu.dot_dimension_numbers<[1], [0], [0], [1], [0, 0, 1, 1], [], []>} : vector<8x256xf32>, vector<256x128xf32>, vector<8x128xf32> -> vector<8x128xf32>
    %85 = arith.addf %83, %84 : vector<8x128xf32>
    %cst_70 = arith.constant dense<0.000000e+00> : vector<8x128xf32>
    %86 = tpu.matmul %85, %1, %cst_70 {dimension_numbers = #tpu.dot_dimension_numbers<[1], [0], [0], [1], [0, 0, 1, 1], [], []>} : vector<8x128xf32>, vector<128x128xf32>, vector<8x128xf32> -> vector<8x128xf32>
    %87 = arith.addf %86, %81 : vector<8x128xf32>
    %88 = math.tanh %85 : vector<8x128xf32>
    %c0_71 = arith.constant 0 : index
    %c0_72 = arith.constant 0 : index
    %89 = vector.load %arg11[%c0_71, %c0_72] : memref<8x256xf32, #tpu.memory_space<vmem>>, vector<8x128xf32>
    tpu.vector_store %arg11[%c0_71, %c0_72], %88 {strides = array<i32>} : memref<8x256xf32, #tpu.memory_space<vmem>>, vector<8x128xf32>,
    %90 = math.tanh %87 : vector<8x128xf32>
    %c0_73 = arith.constant 0 : index
    %c128_74 = arith.constant 128 : index
    %91 = vector.load %arg11[%c0_73, %c128_74] : memref<8x256xf32, #tpu.memory_space<vmem>>, vector<8x128xf32>
    tpu.vector_store %arg11[%c0_73, %c128_74], %90 {strides = array<i32>} : memref<8x256xf32, #tpu.memory_space<vmem>>, vector<8x128xf32>,
    %c0_75 = arith.constant 0 : index
    %c0_76 = arith.constant 0 : index
    %92 = vector.load %arg11[%c0_75, %c0_76] : memref<8x256xf32, #tpu.memory_space<vmem>>, vector<8x256xf32>
    %93 = vector.extract_strided_slice %92 {offsets = [0, 128], sizes = [8, 128], strides = [1, 1]} : vector<8x256xf32> to vector<8x128xf32>
    %cst_77 = arith.constant dense<0.000000e+00> : vector<8x128xf32>
    %94 = tpu.matmul %93, %2, %cst_77 {dimension_numbers = #tpu.dot_dimension_numbers<[1], [0], [0], [1], [0, 0, 1, 1], [], []>} : vector<8x128xf32>, vector<128x128xf32>, vector<8x128xf32> -> vector<8x128xf32>
    %95 = arith.addf %94, %5 : vector<8x128xf32>
    %c6 = arith.constant 6 : index
    %c0_78 = arith.constant 0 : index
    %c0_79 = arith.constant 0 : index
    %96 = vector.load %arg1[%c6, %c0_78, %c0_79] : memref<28x8x128xf32, #tpu.memory_space<vmem>>, vector<1x8x128xf32>
    %97 = vector.shape_cast %96 : vector<1x8x128xf32> to vector<8x128xf32>
    %cst_80 = arith.constant dense<0.000000e+00> : vector<8x128xf32>
    %98 = tpu.matmul %92, %0, %cst_80 {dimension_numbers = #tpu.dot_dimension_numbers<[1], [0], [0], [1], [0, 0, 1, 1], [], []>} : vector<8x256xf32>, vector<256x128xf32>, vector<8x128xf32> -> vector<8x128xf32>
    %99 = arith.addf %97, %98 : vector<8x128xf32>
    %cst_81 = arith.constant dense<0.000000e+00> : vector<8x128xf32>
    %100 = tpu.matmul %99, %1, %cst_81 {dimension_numbers = #tpu.dot_dimension_numbers<[1], [0], [0], [1], [0, 0, 1, 1], [], []>} : vector<8x128xf32>, vector<128x128xf32>, vector<8x128xf32> -> vector<8x128xf32>
    %101 = arith.addf %100, %95 : vector<8x128xf32>
    %102 = math.tanh %99 : vector<8x128xf32>
    %c0_82 = arith.constant 0 : index
    %c0_83 = arith.constant 0 : index
    %103 = vector.load %arg11[%c0_82, %c0_83] : memref<8x256xf32, #tpu.memory_space<vmem>>, vector<8x128xf32>
    tpu.vector_store %arg11[%c0_82, %c0_83], %102 {strides = array<i32>} : memref<8x256xf32, #tpu.memory_space<vmem>>, vector<8x128xf32>,
    %104 = math.tanh %101 : vector<8x128xf32>
    %c0_84 = arith.constant 0 : index
    %c128_85 = arith.constant 128 : index
    %105 = vector.load %arg11[%c0_84, %c128_85] : memref<8x256xf32, #tpu.memory_space<vmem>>, vector<8x128xf32>
    tpu.vector_store %arg11[%c0_84, %c128_85], %104 {strides = array<i32>} : memref<8x256xf32, #tpu.memory_space<vmem>>, vector<8x128xf32>,
    %c0_86 = arith.constant 0 : index
    %c0_87 = arith.constant 0 : index
    %106 = vector.load %arg11[%c0_86, %c0_87] : memref<8x256xf32, #tpu.memory_space<vmem>>, vector<8x256xf32>
    %107 = vector.extract_strided_slice %106 {offsets = [0, 128], sizes = [8, 128], strides = [1, 1]} : vector<8x256xf32> to vector<8x128xf32>
    %cst_88 = arith.constant dense<0.000000e+00> : vector<8x128xf32>
    %108 = tpu.matmul %107, %2, %cst_88 {dimension_numbers = #tpu.dot_dimension_numbers<[1], [0], [0], [1], [0, 0, 1, 1], [], []>} : vector<8x128xf32>, vector<128x128xf32>, vector<8x128xf32> -> vector<8x128xf32>
    %109 = arith.addf %108, %5 : vector<8x128xf32>
    %c7 = arith.constant 7 : index
    %c0_89 = arith.constant 0 : index
    %c0_90 = arith.constant 0 : index
    %110 = vector.load %arg1[%c7, %c0_89, %c0_90] : memref<28x8x128xf32, #tpu.memory_space<vmem>>, vector<1x8x128xf32>
    %111 = vector.shape_cast %110 : vector<1x8x128xf32> to vector<8x128xf32>
    %cst_91 = arith.constant dense<0.000000e+00> : vector<8x128xf32>
    %112 = tpu.matmul %106, %0, %cst_91 {dimension_numbers = #tpu.dot_dimension_numbers<[1], [0], [0], [1], [0, 0, 1, 1], [], []>} : vector<8x256xf32>, vector<256x128xf32>, vector<8x128xf32> -> vector<8x128xf32>
    %113 = arith.addf %111, %112 : vector<8x128xf32>
    %cst_92 = arith.constant dense<0.000000e+00> : vector<8x128xf32>
    %114 = tpu.matmul %113, %1, %cst_92 {dimension_numbers = #tpu.dot_dimension_numbers<[1], [0], [0], [1], [0, 0, 1, 1], [], []>} : vector<8x128xf32>, vector<128x128xf32>, vector<8x128xf32> -> vector<8x128xf32>
    %115 = arith.addf %114, %109 : vector<8x128xf32>
    %116 = math.tanh %113 : vector<8x128xf32>
    %c0_93 = arith.constant 0 : index
    %c0_94 = arith.constant 0 : index
    %117 = vector.load %arg11[%c0_93, %c0_94] : memref<8x256xf32, #tpu.memory_space<vmem>>, vector<8x128xf32>
    tpu.vector_store %arg11[%c0_93, %c0_94], %116 {strides = array<i32>} : memref<8x256xf32, #tpu.memory_space<vmem>>, vector<8x128xf32>,
    %118 = math.tanh %115 : vector<8x128xf32>
    %c0_95 = arith.constant 0 : index
    %c128_96 = arith.constant 128 : index
    %119 = vector.load %arg11[%c0_95, %c128_96] : memref<8x256xf32, #tpu.memory_space<vmem>>, vector<8x128xf32>
    tpu.vector_store %arg11[%c0_95, %c128_96], %118 {strides = array<i32>} : memref<8x256xf32, #tpu.memory_space<vmem>>, vector<8x128xf32>,
    %c0_97 = arith.constant 0 : index
    %c0_98 = arith.constant 0 : index
    %120 = vector.load %arg11[%c0_97, %c0_98] : memref<8x256xf32, #tpu.memory_space<vmem>>, vector<8x256xf32>
    %121 = vector.extract_strided_slice %120 {offsets = [0, 128], sizes = [8, 128], strides = [1, 1]} : vector<8x256xf32> to vector<8x128xf32>
    %cst_99 = arith.constant dense<0.000000e+00> : vector<8x128xf32>
    %122 = tpu.matmul %121, %2, %cst_99 {dimension_numbers = #tpu.dot_dimension_numbers<[1], [0], [0], [1], [0, 0, 1, 1], [], []>} : vector<8x128xf32>, vector<128x128xf32>, vector<8x128xf32> -> vector<8x128xf32>
    %123 = arith.addf %122, %5 : vector<8x128xf32>
    %c8 = arith.constant 8 : index
    %c0_100 = arith.constant 0 : index
    %c0_101 = arith.constant 0 : index
    %124 = vector.load %arg1[%c8, %c0_100, %c0_101] : memref<28x8x128xf32, #tpu.memory_space<vmem>>, vector<1x8x128xf32>
    %125 = vector.shape_cast %124 : vector<1x8x128xf32> to vector<8x128xf32>
    %cst_102 = arith.constant dense<0.000000e+00> : vector<8x128xf32>
    %126 = tpu.matmul %120, %0, %cst_102 {dimension_numbers = #tpu.dot_dimension_numbers<[1], [0], [0], [1], [0, 0, 1, 1], [], []>} : vector<8x256xf32>, vector<256x128xf32>, vector<8x128xf32> -> vector<8x128xf32>
    %127 = arith.addf %125, %126 : vector<8x128xf32>
    %cst_103 = arith.constant dense<0.000000e+00> : vector<8x128xf32>
    %128 = tpu.matmul %127, %1, %cst_103 {dimension_numbers = #tpu.dot_dimension_numbers<[1], [0], [0], [1], [0, 0, 1, 1], [], []>} : vector<8x128xf32>, vector<128x128xf32>, vector<8x128xf32> -> vector<8x128xf32>
    %129 = arith.addf %128, %123 : vector<8x128xf32>
    %130 = math.tanh %127 : vector<8x128xf32>
    %c0_104 = arith.constant 0 : index
    %c0_105 = arith.constant 0 : index
    %131 = vector.load %arg11[%c0_104, %c0_105] : memref<8x256xf32, #tpu.memory_space<vmem>>, vector<8x128xf32>
    tpu.vector_store %arg11[%c0_104, %c0_105], %130 {strides = array<i32>} : memref<8x256xf32, #tpu.memory_space<vmem>>, vector<8x128xf32>,
    %132 = math.tanh %129 : vector<8x128xf32>
    %c0_106 = arith.constant 0 : index
    %c128_107 = arith.constant 128 : index
    %133 = vector.load %arg11[%c0_106, %c128_107] : memref<8x256xf32, #tpu.memory_space<vmem>>, vector<8x128xf32>
    tpu.vector_store %arg11[%c0_106, %c128_107], %132 {strides = array<i32>} : memref<8x256xf32, #tpu.memory_space<vmem>>, vector<8x128xf32>,
    %c0_108 = arith.constant 0 : index
    %c0_109 = arith.constant 0 : index
    %134 = vector.load %arg11[%c0_108, %c0_109] : memref<8x256xf32, #tpu.memory_space<vmem>>, vector<8x256xf32>
    %135 = vector.extract_strided_slice %134 {offsets = [0, 128], sizes = [8, 128], strides = [1, 1]} : vector<8x256xf32> to vector<8x128xf32>
    %cst_110 = arith.constant dense<0.000000e+00> : vector<8x128xf32>
    %136 = tpu.matmul %135, %2, %cst_110 {dimension_numbers = #tpu.dot_dimension_numbers<[1], [0], [0], [1], [0, 0, 1, 1], [], []>} : vector<8x128xf32>, vector<128x128xf32>, vector<8x128xf32> -> vector<8x128xf32>
    %137 = arith.addf %136, %5 : vector<8x128xf32>
    %c9 = arith.constant 9 : index
    %c0_111 = arith.constant 0 : index
    %c0_112 = arith.constant 0 : index
    %138 = vector.load %arg1[%c9, %c0_111, %c0_112] : memref<28x8x128xf32, #tpu.memory_space<vmem>>, vector<1x8x128xf32>
    %139 = vector.shape_cast %138 : vector<1x8x128xf32> to vector<8x128xf32>
    %cst_113 = arith.constant dense<0.000000e+00> : vector<8x128xf32>
    %140 = tpu.matmul %134, %0, %cst_113 {dimension_numbers = #tpu.dot_dimension_numbers<[1], [0], [0], [1], [0, 0, 1, 1], [], []>} : vector<8x256xf32>, vector<256x128xf32>, vector<8x128xf32> -> vector<8x128xf32>
    %141 = arith.addf %139, %140 : vector<8x128xf32>
    %cst_114 = arith.constant dense<0.000000e+00> : vector<8x128xf32>
    %142 = tpu.matmul %141, %1, %cst_114 {dimension_numbers = #tpu.dot_dimension_numbers<[1], [0], [0], [1], [0, 0, 1, 1], [], []>} : vector<8x128xf32>, vector<128x128xf32>, vector<8x128xf32> -> vector<8x128xf32>
    %143 = arith.addf %142, %137 : vector<8x128xf32>
    %144 = math.tanh %141 : vector<8x128xf32>
    %c0_115 = arith.constant 0 : index
    %c0_116 = arith.constant 0 : index
    %145 = vector.load %arg11[%c0_115, %c0_116] : memref<8x256xf32, #tpu.memory_space<vmem>>, vector<8x128xf32>
    tpu.vector_store %arg11[%c0_115, %c0_116], %144 {strides = array<i32>} : memref<8x256xf32, #tpu.memory_space<vmem>>, vector<8x128xf32>,
    %146 = math.tanh %143 : vector<8x128xf32>
    %c0_117 = arith.constant 0 : index
    %c128_118 = arith.constant 128 : index
    %147 = vector.load %arg11[%c0_117, %c128_118] : memref<8x256xf32, #tpu.memory_space<vmem>>, vector<8x128xf32>
    tpu.vector_store %arg11[%c0_117, %c128_118], %146 {strides = array<i32>} : memref<8x256xf32, #tpu.memory_space<vmem>>, vector<8x128xf32>,
    %c0_119 = arith.constant 0 : index
    %c0_120 = arith.constant 0 : index
    %148 = vector.load %arg11[%c0_119, %c0_120] : memref<8x256xf32, #tpu.memory_space<vmem>>, vector<8x256xf32>
    %149 = vector.extract_strided_slice %148 {offsets = [0, 128], sizes = [8, 128], strides = [1, 1]} : vector<8x256xf32> to vector<8x128xf32>
    %cst_121 = arith.constant dense<0.000000e+00> : vector<8x128xf32>
    %150 = tpu.matmul %149, %2, %cst_121 {dimension_numbers = #tpu.dot_dimension_numbers<[1], [0], [0], [1], [0, 0, 1, 1], [], []>} : vector<8x128xf32>, vector<128x128xf32>, vector<8x128xf32> -> vector<8x128xf32>
    %151 = arith.addf %150, %5 : vector<8x128xf32>
    %c10 = arith.constant 10 : index
    %c0_122 = arith.constant 0 : index
    %c0_123 = arith.constant 0 : index
    %152 = vector.load %arg1[%c10, %c0_122, %c0_123] : memref<28x8x128xf32, #tpu.memory_space<vmem>>, vector<1x8x128xf32>
    %153 = vector.shape_cast %152 : vector<1x8x128xf32> to vector<8x128xf32>
    %cst_124 = arith.constant dense<0.000000e+00> : vector<8x128xf32>
    %154 = tpu.matmul %148, %0, %cst_124 {dimension_numbers = #tpu.dot_dimension_numbers<[1], [0], [0], [1], [0, 0, 1, 1], [], []>} : vector<8x256xf32>, vector<256x128xf32>, vector<8x128xf32> -> vector<8x128xf32>
    %155 = arith.addf %153, %154 : vector<8x128xf32>
    %cst_125 = arith.constant dense<0.000000e+00> : vector<8x128xf32>
    %156 = tpu.matmul %155, %1, %cst_125 {dimension_numbers = #tpu.dot_dimension_numbers<[1], [0], [0], [1], [0, 0, 1, 1], [], []>} : vector<8x128xf32>, vector<128x128xf32>, vector<8x128xf32> -> vector<8x128xf32>
    %157 = arith.addf %156, %151 : vector<8x128xf32>
    %158 = math.tanh %155 : vector<8x128xf32>
    %c0_126 = arith.constant 0 : index
    %c0_127 = arith.constant 0 : index
    %159 = vector.load %arg11[%c0_126, %c0_127] : memref<8x256xf32, #tpu.memory_space<vmem>>, vector<8x128xf32>
    tpu.vector_store %arg11[%c0_126, %c0_127], %158 {strides = array<i32>} : memref<8x256xf32, #tpu.memory_space<vmem>>, vector<8x128xf32>,
    %160 = math.tanh %157 : vector<8x128xf32>
    %c0_128 = arith.constant 0 : index
    %c128_129 = arith.constant 128 : index
    %161 = vector.load %arg11[%c0_128, %c128_129] : memref<8x256xf32, #tpu.memory_space<vmem>>, vector<8x128xf32>
    tpu.vector_store %arg11[%c0_128, %c128_129], %160 {strides = array<i32>} : memref<8x256xf32, #tpu.memory_space<vmem>>, vector<8x128xf32>,
    %c0_130 = arith.constant 0 : index
    %c0_131 = arith.constant 0 : index
    %162 = vector.load %arg11[%c0_130, %c0_131] : memref<8x256xf32, #tpu.memory_space<vmem>>, vector<8x256xf32>
    %163 = vector.extract_strided_slice %162 {offsets = [0, 128], sizes = [8, 128], strides = [1, 1]} : vector<8x256xf32> to vector<8x128xf32>
    %cst_132 = arith.constant dense<0.000000e+00> : vector<8x128xf32>
    %164 = tpu.matmul %163, %2, %cst_132 {dimension_numbers = #tpu.dot_dimension_numbers<[1], [0], [0], [1], [0, 0, 1, 1], [], []>} : vector<8x128xf32>, vector<128x128xf32>, vector<8x128xf32> -> vector<8x128xf32>
    %165 = arith.addf %164, %5 : vector<8x128xf32>
    %c11 = arith.constant 11 : index
    %c0_133 = arith.constant 0 : index
    %c0_134 = arith.constant 0 : index
    %166 = vector.load %arg1[%c11, %c0_133, %c0_134] : memref<28x8x128xf32, #tpu.memory_space<vmem>>, vector<1x8x128xf32>
    %167 = vector.shape_cast %166 : vector<1x8x128xf32> to vector<8x128xf32>
    %cst_135 = arith.constant dense<0.000000e+00> : vector<8x128xf32>
    %168 = tpu.matmul %162, %0, %cst_135 {dimension_numbers = #tpu.dot_dimension_numbers<[1], [0], [0], [1], [0, 0, 1, 1], [], []>} : vector<8x256xf32>, vector<256x128xf32>, vector<8x128xf32> -> vector<8x128xf32>
    %169 = arith.addf %167, %168 : vector<8x128xf32>
    %cst_136 = arith.constant dense<0.000000e+00> : vector<8x128xf32>
    %170 = tpu.matmul %169, %1, %cst_136 {dimension_numbers = #tpu.dot_dimension_numbers<[1], [0], [0], [1], [0, 0, 1, 1], [], []>} : vector<8x128xf32>, vector<128x128xf32>, vector<8x128xf32> -> vector<8x128xf32>
    %171 = arith.addf %170, %165 : vector<8x128xf32>
    %172 = math.tanh %169 : vector<8x128xf32>
    %c0_137 = arith.constant 0 : index
    %c0_138 = arith.constant 0 : index
    %173 = vector.load %arg11[%c0_137, %c0_138] : memref<8x256xf32, #tpu.memory_space<vmem>>, vector<8x128xf32>
    tpu.vector_store %arg11[%c0_137, %c0_138], %172 {strides = array<i32>} : memref<8x256xf32, #tpu.memory_space<vmem>>, vector<8x128xf32>,
    %174 = math.tanh %171 : vector<8x128xf32>
    %c0_139 = arith.constant 0 : index
    %c128_140 = arith.constant 128 : index
    %175 = vector.load %arg11[%c0_139, %c128_140] : memref<8x256xf32, #tpu.memory_space<vmem>>, vector<8x128xf32>
    tpu.vector_store %arg11[%c0_139, %c128_140], %174 {strides = array<i32>} : memref<8x256xf32, #tpu.memory_space<vmem>>, vector<8x128xf32>,
    %c0_141 = arith.constant 0 : index
    %c0_142 = arith.constant 0 : index
    %176 = vector.load %arg11[%c0_141, %c0_142] : memref<8x256xf32, #tpu.memory_space<vmem>>, vector<8x256xf32>
    %177 = vector.extract_strided_slice %176 {offsets = [0, 128], sizes = [8, 128], strides = [1, 1]} : vector<8x256xf32> to vector<8x128xf32>
    %cst_143 = arith.constant dense<0.000000e+00> : vector<8x128xf32>
    %178 = tpu.matmul %177, %2, %cst_143 {dimension_numbers = #tpu.dot_dimension_numbers<[1], [0], [0], [1], [0, 0, 1, 1], [], []>} : vector<8x128xf32>, vector<128x128xf32>, vector<8x128xf32> -> vector<8x128xf32>
    %179 = arith.addf %178, %5 : vector<8x128xf32>
    %c12 = arith.constant 12 : index
    %c0_144 = arith.constant 0 : index
    %c0_145 = arith.constant 0 : index
    %180 = vector.load %arg1[%c12, %c0_144, %c0_145] : memref<28x8x128xf32, #tpu.memory_space<vmem>>, vector<1x8x128xf32>
    %181 = vector.shape_cast %180 : vector<1x8x128xf32> to vector<8x128xf32>
    %cst_146 = arith.constant dense<0.000000e+00> : vector<8x128xf32>
    %182 = tpu.matmul %176, %0, %cst_146 {dimension_numbers = #tpu.dot_dimension_numbers<[1], [0], [0], [1], [0, 0, 1, 1], [], []>} : vector<8x256xf32>, vector<256x128xf32>, vector<8x128xf32> -> vector<8x128xf32>
    %183 = arith.addf %181, %182 : vector<8x128xf32>
    %cst_147 = arith.constant dense<0.000000e+00> : vector<8x128xf32>
    %184 = tpu.matmul %183, %1, %cst_147 {dimension_numbers = #tpu.dot_dimension_numbers<[1], [0], [0], [1], [0, 0, 1, 1], [], []>} : vector<8x128xf32>, vector<128x128xf32>, vector<8x128xf32> -> vector<8x128xf32>
    %185 = arith.addf %184, %179 : vector<8x128xf32>
    %186 = math.tanh %183 : vector<8x128xf32>
    %c0_148 = arith.constant 0 : index
    %c0_149 = arith.constant 0 : index
    %187 = vector.load %arg11[%c0_148, %c0_149] : memref<8x256xf32, #tpu.memory_space<vmem>>, vector<8x128xf32>
    tpu.vector_store %arg11[%c0_148, %c0_149], %186 {strides = array<i32>} : memref<8x256xf32, #tpu.memory_space<vmem>>, vector<8x128xf32>,
    %188 = math.tanh %185 : vector<8x128xf32>
    %c0_150 = arith.constant 0 : index
    %c128_151 = arith.constant 128 : index
    %189 = vector.load %arg11[%c0_150, %c128_151] : memref<8x256xf32, #tpu.memory_space<vmem>>, vector<8x128xf32>
    tpu.vector_store %arg11[%c0_150, %c128_151], %188 {strides = array<i32>} : memref<8x256xf32, #tpu.memory_space<vmem>>, vector<8x128xf32>,
    %c0_152 = arith.constant 0 : index
    %c0_153 = arith.constant 0 : index
    %190 = vector.load %arg11[%c0_152, %c0_153] : memref<8x256xf32, #tpu.memory_space<vmem>>, vector<8x256xf32>
    %191 = vector.extract_strided_slice %190 {offsets = [0, 128], sizes = [8, 128], strides = [1, 1]} : vector<8x256xf32> to vector<8x128xf32>
    %cst_154 = arith.constant dense<0.000000e+00> : vector<8x128xf32>
    %192 = tpu.matmul %191, %2, %cst_154 {dimension_numbers = #tpu.dot_dimension_numbers<[1], [0], [0], [1], [0, 0, 1, 1], [], []>} : vector<8x128xf32>, vector<128x128xf32>, vector<8x128xf32> -> vector<8x128xf32>
    %193 = arith.addf %192, %5 : vector<8x128xf32>
    %c13 = arith.constant 13 : index
    %c0_155 = arith.constant 0 : index
    %c0_156 = arith.constant 0 : index
    %194 = vector.load %arg1[%c13, %c0_155, %c0_156] : memref<28x8x128xf32, #tpu.memory_space<vmem>>, vector<1x8x128xf32>
    %195 = vector.shape_cast %194 : vector<1x8x128xf32> to vector<8x128xf32>
    %cst_157 = arith.constant dense<0.000000e+00> : vector<8x128xf32>
    %196 = tpu.matmul %190, %0, %cst_157 {dimension_numbers = #tpu.dot_dimension_numbers<[1], [0], [0], [1], [0, 0, 1, 1], [], []>} : vector<8x256xf32>, vector<256x128xf32>, vector<8x128xf32> -> vector<8x128xf32>
    %197 = arith.addf %195, %196 : vector<8x128xf32>
    %cst_158 = arith.constant dense<0.000000e+00> : vector<8x128xf32>
    %198 = tpu.matmul %197, %1, %cst_158 {dimension_numbers = #tpu.dot_dimension_numbers<[1], [0], [0], [1], [0, 0, 1, 1], [], []>} : vector<8x128xf32>, vector<128x128xf32>, vector<8x128xf32> -> vector<8x128xf32>
    %199 = arith.addf %198, %193 : vector<8x128xf32>
    %200 = math.tanh %197 : vector<8x128xf32>
    %c0_159 = arith.constant 0 : index
    %c0_160 = arith.constant 0 : index
    %201 = vector.load %arg11[%c0_159, %c0_160] : memref<8x256xf32, #tpu.memory_space<vmem>>, vector<8x128xf32>
    tpu.vector_store %arg11[%c0_159, %c0_160], %200 {strides = array<i32>} : memref<8x256xf32, #tpu.memory_space<vmem>>, vector<8x128xf32>,
    %202 = math.tanh %199 : vector<8x128xf32>
    %c0_161 = arith.constant 0 : index
    %c128_162 = arith.constant 128 : index
    %203 = vector.load %arg11[%c0_161, %c128_162] : memref<8x256xf32, #tpu.memory_space<vmem>>, vector<8x128xf32>
    tpu.vector_store %arg11[%c0_161, %c128_162], %202 {strides = array<i32>} : memref<8x256xf32, #tpu.memory_space<vmem>>, vector<8x128xf32>,
    %c0_163 = arith.constant 0 : index
    %c0_164 = arith.constant 0 : index
    %204 = vector.load %arg11[%c0_163, %c0_164] : memref<8x256xf32, #tpu.memory_space<vmem>>, vector<8x256xf32>
    %205 = vector.extract_strided_slice %204 {offsets = [0, 128], sizes = [8, 128], strides = [1, 1]} : vector<8x256xf32> to vector<8x128xf32>
    %cst_165 = arith.constant dense<0.000000e+00> : vector<8x128xf32>
    %206 = tpu.matmul %205, %2, %cst_165 {dimension_numbers = #tpu.dot_dimension_numbers<[1], [0], [0], [1], [0, 0, 1, 1], [], []>} : vector<8x128xf32>, vector<128x128xf32>, vector<8x128xf32> -> vector<8x128xf32>
    %207 = arith.addf %206, %5 : vector<8x128xf32>
    %c14 = arith.constant 14 : index
    %c0_166 = arith.constant 0 : index
    %c0_167 = arith.constant 0 : index
    %208 = vector.load %arg1[%c14, %c0_166, %c0_167] : memref<28x8x128xf32, #tpu.memory_space<vmem>>, vector<1x8x128xf32>
    %209 = vector.shape_cast %208 : vector<1x8x128xf32> to vector<8x128xf32>
    %cst_168 = arith.constant dense<0.000000e+00> : vector<8x128xf32>
    %210 = tpu.matmul %204, %0, %cst_168 {dimension_numbers = #tpu.dot_dimension_numbers<[1], [0], [0], [1], [0, 0, 1, 1], [], []>} : vector<8x256xf32>, vector<256x128xf32>, vector<8x128xf32> -> vector<8x128xf32>
    %211 = arith.addf %209, %210 : vector<8x128xf32>
    %cst_169 = arith.constant dense<0.000000e+00> : vector<8x128xf32>
    %212 = tpu.matmul %211, %1, %cst_169 {dimension_numbers = #tpu.dot_dimension_numbers<[1], [0], [0], [1], [0, 0, 1, 1], [], []>} : vector<8x128xf32>, vector<128x128xf32>, vector<8x128xf32> -> vector<8x128xf32>
    %213 = arith.addf %212, %207 : vector<8x128xf32>
    %214 = math.tanh %211 : vector<8x128xf32>
    %c0_170 = arith.constant 0 : index
    %c0_171 = arith.constant 0 : index
    %215 = vector.load %arg11[%c0_170, %c0_171] : memref<8x256xf32, #tpu.memory_space<vmem>>, vector<8x128xf32>
    tpu.vector_store %arg11[%c0_170, %c0_171], %214 {strides = array<i32>} : memref<8x256xf32, #tpu.memory_space<vmem>>, vector<8x128xf32>,
    %216 = math.tanh %213 : vector<8x128xf32>
    %c0_172 = arith.constant 0 : index
    %c128_173 = arith.constant 128 : index
    %217 = vector.load %arg11[%c0_172, %c128_173] : memref<8x256xf32, #tpu.memory_space<vmem>>, vector<8x128xf32>
    tpu.vector_store %arg11[%c0_172, %c128_173], %216 {strides = array<i32>} : memref<8x256xf32, #tpu.memory_space<vmem>>, vector<8x128xf32>,
    %c0_174 = arith.constant 0 : index
    %c0_175 = arith.constant 0 : index
    %218 = vector.load %arg11[%c0_174, %c0_175] : memref<8x256xf32, #tpu.memory_space<vmem>>, vector<8x256xf32>
    %219 = vector.extract_strided_slice %218 {offsets = [0, 128], sizes = [8, 128], strides = [1, 1]} : vector<8x256xf32> to vector<8x128xf32>
    %cst_176 = arith.constant dense<0.000000e+00> : vector<8x128xf32>
    %220 = tpu.matmul %219, %2, %cst_176 {dimension_numbers = #tpu.dot_dimension_numbers<[1], [0], [0], [1], [0, 0, 1, 1], [], []>} : vector<8x128xf32>, vector<128x128xf32>, vector<8x128xf32> -> vector<8x128xf32>
    %221 = arith.addf %220, %5 : vector<8x128xf32>
    %c15 = arith.constant 15 : index
    %c0_177 = arith.constant 0 : index
    %c0_178 = arith.constant 0 : index
    %222 = vector.load %arg1[%c15, %c0_177, %c0_178] : memref<28x8x128xf32, #tpu.memory_space<vmem>>, vector<1x8x128xf32>
    %223 = vector.shape_cast %222 : vector<1x8x128xf32> to vector<8x128xf32>
    %cst_179 = arith.constant dense<0.000000e+00> : vector<8x128xf32>
    %224 = tpu.matmul %218, %0, %cst_179 {dimension_numbers = #tpu.dot_dimension_numbers<[1], [0], [0], [1], [0, 0, 1, 1], [], []>} : vector<8x256xf32>, vector<256x128xf32>, vector<8x128xf32> -> vector<8x128xf32>
    %225 = arith.addf %223, %224 : vector<8x128xf32>
    %cst_180 = arith.constant dense<0.000000e+00> : vector<8x128xf32>
    %226 = tpu.matmul %225, %1, %cst_180 {dimension_numbers = #tpu.dot_dimension_numbers<[1], [0], [0], [1], [0, 0, 1, 1], [], []>} : vector<8x128xf32>, vector<128x128xf32>, vector<8x128xf32> -> vector<8x128xf32>
    %227 = arith.addf %226, %221 : vector<8x128xf32>
    %228 = math.tanh %225 : vector<8x128xf32>
    %c0_181 = arith.constant 0 : index
    %c0_182 = arith.constant 0 : index
    %229 = vector.load %arg11[%c0_181, %c0_182] : memref<8x256xf32, #tpu.memory_space<vmem>>, vector<8x128xf32>
    tpu.vector_store %arg11[%c0_181, %c0_182], %228 {strides = array<i32>} : memref<8x256xf32, #tpu.memory_space<vmem>>, vector<8x128xf32>,
    %230 = math.tanh %227 : vector<8x128xf32>
    %c0_183 = arith.constant 0 : index
    %c128_184 = arith.constant 128 : index
    %231 = vector.load %arg11[%c0_183, %c128_184] : memref<8x256xf32, #tpu.memory_space<vmem>>, vector<8x128xf32>
    tpu.vector_store %arg11[%c0_183, %c128_184], %230 {strides = array<i32>} : memref<8x256xf32, #tpu.memory_space<vmem>>, vector<8x128xf32>,
    %c0_185 = arith.constant 0 : index
    %c0_186 = arith.constant 0 : index
    %232 = vector.load %arg11[%c0_185, %c0_186] : memref<8x256xf32, #tpu.memory_space<vmem>>, vector<8x256xf32>
    %233 = vector.extract_strided_slice %232 {offsets = [0, 128], sizes = [8, 128], strides = [1, 1]} : vector<8x256xf32> to vector<8x128xf32>
    %cst_187 = arith.constant dense<0.000000e+00> : vector<8x128xf32>
    %234 = tpu.matmul %233, %2, %cst_187 {dimension_numbers = #tpu.dot_dimension_numbers<[1], [0], [0], [1], [0, 0, 1, 1], [], []>} : vector<8x128xf32>, vector<128x128xf32>, vector<8x128xf32> -> vector<8x128xf32>
    %235 = arith.addf %234, %5 : vector<8x128xf32>
    %c16 = arith.constant 16 : index
    %c0_188 = arith.constant 0 : index
    %c0_189 = arith.constant 0 : index
    %236 = vector.load %arg1[%c16, %c0_188, %c0_189] : memref<28x8x128xf32, #tpu.memory_space<vmem>>, vector<1x8x128xf32>
    %237 = vector.shape_cast %236 : vector<1x8x128xf32> to vector<8x128xf32>
    %cst_190 = arith.constant dense<0.000000e+00> : vector<8x128xf32>
    %238 = tpu.matmul %232, %0, %cst_190 {dimension_numbers = #tpu.dot_dimension_numbers<[1], [0], [0], [1], [0, 0, 1, 1], [], []>} : vector<8x256xf32>, vector<256x128xf32>, vector<8x128xf32> -> vector<8x128xf32>
    %239 = arith.addf %237, %238 : vector<8x128xf32>
    %cst_191 = arith.constant dense<0.000000e+00> : vector<8x128xf32>
    %240 = tpu.matmul %239, %1, %cst_191 {dimension_numbers = #tpu.dot_dimension_numbers<[1], [0], [0], [1], [0, 0, 1, 1], [], []>} : vector<8x128xf32>, vector<128x128xf32>, vector<8x128xf32> -> vector<8x128xf32>
    %241 = arith.addf %240, %235 : vector<8x128xf32>
    %242 = math.tanh %239 : vector<8x128xf32>
    %c0_192 = arith.constant 0 : index
    %c0_193 = arith.constant 0 : index
    %243 = vector.load %arg11[%c0_192, %c0_193] : memref<8x256xf32, #tpu.memory_space<vmem>>, vector<8x128xf32>
    tpu.vector_store %arg11[%c0_192, %c0_193], %242 {strides = array<i32>} : memref<8x256xf32, #tpu.memory_space<vmem>>, vector<8x128xf32>,
    %244 = math.tanh %241 : vector<8x128xf32>
    %c0_194 = arith.constant 0 : index
    %c128_195 = arith.constant 128 : index
    %245 = vector.load %arg11[%c0_194, %c128_195] : memref<8x256xf32, #tpu.memory_space<vmem>>, vector<8x128xf32>
    tpu.vector_store %arg11[%c0_194, %c128_195], %244 {strides = array<i32>} : memref<8x256xf32, #tpu.memory_space<vmem>>, vector<8x128xf32>,
    %c0_196 = arith.constant 0 : index
    %c0_197 = arith.constant 0 : index
    %246 = vector.load %arg11[%c0_196, %c0_197] : memref<8x256xf32, #tpu.memory_space<vmem>>, vector<8x256xf32>
    %247 = vector.extract_strided_slice %246 {offsets = [0, 128], sizes = [8, 128], strides = [1, 1]} : vector<8x256xf32> to vector<8x128xf32>
    %cst_198 = arith.constant dense<0.000000e+00> : vector<8x128xf32>
    %248 = tpu.matmul %247, %2, %cst_198 {dimension_numbers = #tpu.dot_dimension_numbers<[1], [0], [0], [1], [0, 0, 1, 1], [], []>} : vector<8x128xf32>, vector<128x128xf32>, vector<8x128xf32> -> vector<8x128xf32>
    %249 = arith.addf %248, %5 : vector<8x128xf32>
    %c17 = arith.constant 17 : index
    %c0_199 = arith.constant 0 : index
    %c0_200 = arith.constant 0 : index
    %250 = vector.load %arg1[%c17, %c0_199, %c0_200] : memref<28x8x128xf32, #tpu.memory_space<vmem>>, vector<1x8x128xf32>
    %251 = vector.shape_cast %250 : vector<1x8x128xf32> to vector<8x128xf32>
    %cst_201 = arith.constant dense<0.000000e+00> : vector<8x128xf32>
    %252 = tpu.matmul %246, %0, %cst_201 {dimension_numbers = #tpu.dot_dimension_numbers<[1], [0], [0], [1], [0, 0, 1, 1], [], []>} : vector<8x256xf32>, vector<256x128xf32>, vector<8x128xf32> -> vector<8x128xf32>
    %253 = arith.addf %251, %252 : vector<8x128xf32>
    %cst_202 = arith.constant dense<0.000000e+00> : vector<8x128xf32>
    %254 = tpu.matmul %253, %1, %cst_202 {dimension_numbers = #tpu.dot_dimension_numbers<[1], [0], [0], [1], [0, 0, 1, 1], [], []>} : vector<8x128xf32>, vector<128x128xf32>, vector<8x128xf32> -> vector<8x128xf32>
    %255 = arith.addf %254, %249 : vector<8x128xf32>
    %256 = math.tanh %253 : vector<8x128xf32>
    %c0_203 = arith.constant 0 : index
    %c0_204 = arith.constant 0 : index
    %257 = vector.load %arg11[%c0_203, %c0_204] : memref<8x256xf32, #tpu.memory_space<vmem>>, vector<8x128xf32>
    tpu.vector_store %arg11[%c0_203, %c0_204], %256 {strides = array<i32>} : memref<8x256xf32, #tpu.memory_space<vmem>>, vector<8x128xf32>,
    %258 = math.tanh %255 : vector<8x128xf32>
    %c0_205 = arith.constant 0 : index
    %c128_206 = arith.constant 128 : index
    %259 = vector.load %arg11[%c0_205, %c128_206] : memref<8x256xf32, #tpu.memory_space<vmem>>, vector<8x128xf32>
    tpu.vector_store %arg11[%c0_205, %c128_206], %258 {strides = array<i32>} : memref<8x256xf32, #tpu.memory_space<vmem>>, vector<8x128xf32>,
    %c0_207 = arith.constant 0 : index
    %c0_208 = arith.constant 0 : index
    %260 = vector.load %arg11[%c0_207, %c0_208] : memref<8x256xf32, #tpu.memory_space<vmem>>, vector<8x256xf32>
    %261 = vector.extract_strided_slice %260 {offsets = [0, 128], sizes = [8, 128], strides = [1, 1]} : vector<8x256xf32> to vector<8x128xf32>
    %cst_209 = arith.constant dense<0.000000e+00> : vector<8x128xf32>
    %262 = tpu.matmul %261, %2, %cst_209 {dimension_numbers = #tpu.dot_dimension_numbers<[1], [0], [0], [1], [0, 0, 1, 1], [], []>} : vector<8x128xf32>, vector<128x128xf32>, vector<8x128xf32> -> vector<8x128xf32>
    %263 = arith.addf %262, %5 : vector<8x128xf32>
    %c18 = arith.constant 18 : index
    %c0_210 = arith.constant 0 : index
    %c0_211 = arith.constant 0 : index
    %264 = vector.load %arg1[%c18, %c0_210, %c0_211] : memref<28x8x128xf32, #tpu.memory_space<vmem>>, vector<1x8x128xf32>
    %265 = vector.shape_cast %264 : vector<1x8x128xf32> to vector<8x128xf32>
    %cst_212 = arith.constant dense<0.000000e+00> : vector<8x128xf32>
    %266 = tpu.matmul %260, %0, %cst_212 {dimension_numbers = #tpu.dot_dimension_numbers<[1], [0], [0], [1], [0, 0, 1, 1], [], []>} : vector<8x256xf32>, vector<256x128xf32>, vector<8x128xf32> -> vector<8x128xf32>
    %267 = arith.addf %265, %266 : vector<8x128xf32>
    %cst_213 = arith.constant dense<0.000000e+00> : vector<8x128xf32>
    %268 = tpu.matmul %267, %1, %cst_213 {dimension_numbers = #tpu.dot_dimension_numbers<[1], [0], [0], [1], [0, 0, 1, 1], [], []>} : vector<8x128xf32>, vector<128x128xf32>, vector<8x128xf32> -> vector<8x128xf32>
    %269 = arith.addf %268, %263 : vector<8x128xf32>
    %270 = math.tanh %267 : vector<8x128xf32>
    %c0_214 = arith.constant 0 : index
    %c0_215 = arith.constant 0 : index
    %271 = vector.load %arg11[%c0_214, %c0_215] : memref<8x256xf32, #tpu.memory_space<vmem>>, vector<8x128xf32>
    tpu.vector_store %arg11[%c0_214, %c0_215], %270 {strides = array<i32>} : memref<8x256xf32, #tpu.memory_space<vmem>>, vector<8x128xf32>,
    %272 = math.tanh %269 : vector<8x128xf32>
    %c0_216 = arith.constant 0 : index
    %c128_217 = arith.constant 128 : index
    %273 = vector.load %arg11[%c0_216, %c128_217] : memref<8x256xf32, #tpu.memory_space<vmem>>, vector<8x128xf32>
    tpu.vector_store %arg11[%c0_216, %c128_217], %272 {strides = array<i32>} : memref<8x256xf32, #tpu.memory_space<vmem>>, vector<8x128xf32>,
    %c0_218 = arith.constant 0 : index
    %c0_219 = arith.constant 0 : index
    %274 = vector.load %arg11[%c0_218, %c0_219] : memref<8x256xf32, #tpu.memory_space<vmem>>, vector<8x256xf32>
    %275 = vector.extract_strided_slice %274 {offsets = [0, 128], sizes = [8, 128], strides = [1, 1]} : vector<8x256xf32> to vector<8x128xf32>
    %cst_220 = arith.constant dense<0.000000e+00> : vector<8x128xf32>
    %276 = tpu.matmul %275, %2, %cst_220 {dimension_numbers = #tpu.dot_dimension_numbers<[1], [0], [0], [1], [0, 0, 1, 1], [], []>} : vector<8x128xf32>, vector<128x128xf32>, vector<8x128xf32> -> vector<8x128xf32>
    %277 = arith.addf %276, %5 : vector<8x128xf32>
    %c19 = arith.constant 19 : index
    %c0_221 = arith.constant 0 : index
    %c0_222 = arith.constant 0 : index
    %278 = vector.load %arg1[%c19, %c0_221, %c0_222] : memref<28x8x128xf32, #tpu.memory_space<vmem>>, vector<1x8x128xf32>
    %279 = vector.shape_cast %278 : vector<1x8x128xf32> to vector<8x128xf32>
    %cst_223 = arith.constant dense<0.000000e+00> : vector<8x128xf32>
    %280 = tpu.matmul %274, %0, %cst_223 {dimension_numbers = #tpu.dot_dimension_numbers<[1], [0], [0], [1], [0, 0, 1, 1], [], []>} : vector<8x256xf32>, vector<256x128xf32>, vector<8x128xf32> -> vector<8x128xf32>
    %281 = arith.addf %279, %280 : vector<8x128xf32>
    %cst_224 = arith.constant dense<0.000000e+00> : vector<8x128xf32>
    %282 = tpu.matmul %281, %1, %cst_224 {dimension_numbers = #tpu.dot_dimension_numbers<[1], [0], [0], [1], [0, 0, 1, 1], [], []>} : vector<8x128xf32>, vector<128x128xf32>, vector<8x128xf32> -> vector<8x128xf32>
    %283 = arith.addf %282, %277 : vector<8x128xf32>
    %284 = math.tanh %281 : vector<8x128xf32>
    %c0_225 = arith.constant 0 : index
    %c0_226 = arith.constant 0 : index
    %285 = vector.load %arg11[%c0_225, %c0_226] : memref<8x256xf32, #tpu.memory_space<vmem>>, vector<8x128xf32>
    tpu.vector_store %arg11[%c0_225, %c0_226], %284 {strides = array<i32>} : memref<8x256xf32, #tpu.memory_space<vmem>>, vector<8x128xf32>,
    %286 = math.tanh %283 : vector<8x128xf32>
    %c0_227 = arith.constant 0 : index
    %c128_228 = arith.constant 128 : index
    %287 = vector.load %arg11[%c0_227, %c128_228] : memref<8x256xf32, #tpu.memory_space<vmem>>, vector<8x128xf32>
    tpu.vector_store %arg11[%c0_227, %c128_228], %286 {strides = array<i32>} : memref<8x256xf32, #tpu.memory_space<vmem>>, vector<8x128xf32>,
    %c0_229 = arith.constant 0 : index
    %c0_230 = arith.constant 0 : index
    %288 = vector.load %arg11[%c0_229, %c0_230] : memref<8x256xf32, #tpu.memory_space<vmem>>, vector<8x256xf32>
    %289 = vector.extract_strided_slice %288 {offsets = [0, 128], sizes = [8, 128], strides = [1, 1]} : vector<8x256xf32> to vector<8x128xf32>
    %cst_231 = arith.constant dense<0.000000e+00> : vector<8x128xf32>
    %290 = tpu.matmul %289, %2, %cst_231 {dimension_numbers = #tpu.dot_dimension_numbers<[1], [0], [0], [1], [0, 0, 1, 1], [], []>} : vector<8x128xf32>, vector<128x128xf32>, vector<8x128xf32> -> vector<8x128xf32>
    %291 = arith.addf %290, %5 : vector<8x128xf32>
    %c20 = arith.constant 20 : index
    %c0_232 = arith.constant 0 : index
    %c0_233 = arith.constant 0 : index
    %292 = vector.load %arg1[%c20, %c0_232, %c0_233] : memref<28x8x128xf32, #tpu.memory_space<vmem>>, vector<1x8x128xf32>
    %293 = vector.shape_cast %292 : vector<1x8x128xf32> to vector<8x128xf32>
    %cst_234 = arith.constant dense<0.000000e+00> : vector<8x128xf32>
    %294 = tpu.matmul %288, %0, %cst_234 {dimension_numbers = #tpu.dot_dimension_numbers<[1], [0], [0], [1], [0, 0, 1, 1], [], []>} : vector<8x256xf32>, vector<256x128xf32>, vector<8x128xf32> -> vector<8x128xf32>
    %295 = arith.addf %293, %294 : vector<8x128xf32>
    %cst_235 = arith.constant dense<0.000000e+00> : vector<8x128xf32>
    %296 = tpu.matmul %295, %1, %cst_235 {dimension_numbers = #tpu.dot_dimension_numbers<[1], [0], [0], [1], [0, 0, 1, 1], [], []>} : vector<8x128xf32>, vector<128x128xf32>, vector<8x128xf32> -> vector<8x128xf32>
    %297 = arith.addf %296, %291 : vector<8x128xf32>
    %298 = math.tanh %295 : vector<8x128xf32>
    %c0_236 = arith.constant 0 : index
    %c0_237 = arith.constant 0 : index
    %299 = vector.load %arg11[%c0_236, %c0_237] : memref<8x256xf32, #tpu.memory_space<vmem>>, vector<8x128xf32>
    tpu.vector_store %arg11[%c0_236, %c0_237], %298 {strides = array<i32>} : memref<8x256xf32, #tpu.memory_space<vmem>>, vector<8x128xf32>,
    %300 = math.tanh %297 : vector<8x128xf32>
    %c0_238 = arith.constant 0 : index
    %c128_239 = arith.constant 128 : index
    %301 = vector.load %arg11[%c0_238, %c128_239] : memref<8x256xf32, #tpu.memory_space<vmem>>, vector<8x128xf32>
    tpu.vector_store %arg11[%c0_238, %c128_239], %300 {strides = array<i32>} : memref<8x256xf32, #tpu.memory_space<vmem>>, vector<8x128xf32>,
    %c0_240 = arith.constant 0 : index
    %c0_241 = arith.constant 0 : index
    %302 = vector.load %arg11[%c0_240, %c0_241] : memref<8x256xf32, #tpu.memory_space<vmem>>, vector<8x256xf32>
    %303 = vector.extract_strided_slice %302 {offsets = [0, 128], sizes = [8, 128], strides = [1, 1]} : vector<8x256xf32> to vector<8x128xf32>
    %cst_242 = arith.constant dense<0.000000e+00> : vector<8x128xf32>
    %304 = tpu.matmul %303, %2, %cst_242 {dimension_numbers = #tpu.dot_dimension_numbers<[1], [0], [0], [1], [0, 0, 1, 1], [], []>} : vector<8x128xf32>, vector<128x128xf32>, vector<8x128xf32> -> vector<8x128xf32>
    %305 = arith.addf %304, %5 : vector<8x128xf32>
    %c21 = arith.constant 21 : index
    %c0_243 = arith.constant 0 : index
    %c0_244 = arith.constant 0 : index
    %306 = vector.load %arg1[%c21, %c0_243, %c0_244] : memref<28x8x128xf32, #tpu.memory_space<vmem>>, vector<1x8x128xf32>
    %307 = vector.shape_cast %306 : vector<1x8x128xf32> to vector<8x128xf32>
    %cst_245 = arith.constant dense<0.000000e+00> : vector<8x128xf32>
    %308 = tpu.matmul %302, %0, %cst_245 {dimension_numbers = #tpu.dot_dimension_numbers<[1], [0], [0], [1], [0, 0, 1, 1], [], []>} : vector<8x256xf32>, vector<256x128xf32>, vector<8x128xf32> -> vector<8x128xf32>
    %309 = arith.addf %307, %308 : vector<8x128xf32>
    %cst_246 = arith.constant dense<0.000000e+00> : vector<8x128xf32>
    %310 = tpu.matmul %309, %1, %cst_246 {dimension_numbers = #tpu.dot_dimension_numbers<[1], [0], [0], [1], [0, 0, 1, 1], [], []>} : vector<8x128xf32>, vector<128x128xf32>, vector<8x128xf32> -> vector<8x128xf32>
    %311 = arith.addf %310, %305 : vector<8x128xf32>
    %312 = math.tanh %309 : vector<8x128xf32>
    %c0_247 = arith.constant 0 : index
    %c0_248 = arith.constant 0 : index
    %313 = vector.load %arg11[%c0_247, %c0_248] : memref<8x256xf32, #tpu.memory_space<vmem>>, vector<8x128xf32>
    tpu.vector_store %arg11[%c0_247, %c0_248], %312 {strides = array<i32>} : memref<8x256xf32, #tpu.memory_space<vmem>>, vector<8x128xf32>,
    %314 = math.tanh %311 : vector<8x128xf32>
    %c0_249 = arith.constant 0 : index
    %c128_250 = arith.constant 128 : index
    %315 = vector.load %arg11[%c0_249, %c128_250] : memref<8x256xf32, #tpu.memory_space<vmem>>, vector<8x128xf32>
    tpu.vector_store %arg11[%c0_249, %c128_250], %314 {strides = array<i32>} : memref<8x256xf32, #tpu.memory_space<vmem>>, vector<8x128xf32>,
    %c0_251 = arith.constant 0 : index
    %c0_252 = arith.constant 0 : index
    %316 = vector.load %arg11[%c0_251, %c0_252] : memref<8x256xf32, #tpu.memory_space<vmem>>, vector<8x256xf32>
    %317 = vector.extract_strided_slice %316 {offsets = [0, 128], sizes = [8, 128], strides = [1, 1]} : vector<8x256xf32> to vector<8x128xf32>
    %cst_253 = arith.constant dense<0.000000e+00> : vector<8x128xf32>
    %318 = tpu.matmul %317, %2, %cst_253 {dimension_numbers = #tpu.dot_dimension_numbers<[1], [0], [0], [1], [0, 0, 1, 1], [], []>} : vector<8x128xf32>, vector<128x128xf32>, vector<8x128xf32> -> vector<8x128xf32>
    %319 = arith.addf %318, %5 : vector<8x128xf32>
    %c22 = arith.constant 22 : index
    %c0_254 = arith.constant 0 : index
    %c0_255 = arith.constant 0 : index
    %320 = vector.load %arg1[%c22, %c0_254, %c0_255] : memref<28x8x128xf32, #tpu.memory_space<vmem>>, vector<1x8x128xf32>
    %321 = vector.shape_cast %320 : vector<1x8x128xf32> to vector<8x128xf32>
    %cst_256 = arith.constant dense<0.000000e+00> : vector<8x128xf32>
    %322 = tpu.matmul %316, %0, %cst_256 {dimension_numbers = #tpu.dot_dimension_numbers<[1], [0], [0], [1], [0, 0, 1, 1], [], []>} : vector<8x256xf32>, vector<256x128xf32>, vector<8x128xf32> -> vector<8x128xf32>
    %323 = arith.addf %321, %322 : vector<8x128xf32>
    %cst_257 = arith.constant dense<0.000000e+00> : vector<8x128xf32>
    %324 = tpu.matmul %323, %1, %cst_257 {dimension_numbers = #tpu.dot_dimension_numbers<[1], [0], [0], [1], [0, 0, 1, 1], [], []>} : vector<8x128xf32>, vector<128x128xf32>, vector<8x128xf32> -> vector<8x128xf32>
    %325 = arith.addf %324, %319 : vector<8x128xf32>
    %326 = math.tanh %323 : vector<8x128xf32>
    %c0_258 = arith.constant 0 : index
    %c0_259 = arith.constant 0 : index
    %327 = vector.load %arg11[%c0_258, %c0_259] : memref<8x256xf32, #tpu.memory_space<vmem>>, vector<8x128xf32>
    tpu.vector_store %arg11[%c0_258, %c0_259], %326 {strides = array<i32>} : memref<8x256xf32, #tpu.memory_space<vmem>>, vector<8x128xf32>,
    %328 = math.tanh %325 : vector<8x128xf32>
    %c0_260 = arith.constant 0 : index
    %c128_261 = arith.constant 128 : index
    %329 = vector.load %arg11[%c0_260, %c128_261] : memref<8x256xf32, #tpu.memory_space<vmem>>, vector<8x128xf32>
    tpu.vector_store %arg11[%c0_260, %c128_261], %328 {strides = array<i32>} : memref<8x256xf32, #tpu.memory_space<vmem>>, vector<8x128xf32>,
    %c0_262 = arith.constant 0 : index
    %c0_263 = arith.constant 0 : index
    %330 = vector.load %arg11[%c0_262, %c0_263] : memref<8x256xf32, #tpu.memory_space<vmem>>, vector<8x256xf32>
    %331 = vector.extract_strided_slice %330 {offsets = [0, 128], sizes = [8, 128], strides = [1, 1]} : vector<8x256xf32> to vector<8x128xf32>
    %cst_264 = arith.constant dense<0.000000e+00> : vector<8x128xf32>
    %332 = tpu.matmul %331, %2, %cst_264 {dimension_numbers = #tpu.dot_dimension_numbers<[1], [0], [0], [1], [0, 0, 1, 1], [], []>} : vector<8x128xf32>, vector<128x128xf32>, vector<8x128xf32> -> vector<8x128xf32>
    %333 = arith.addf %332, %5 : vector<8x128xf32>
    %c23 = arith.constant 23 : index
    %c0_265 = arith.constant 0 : index
    %c0_266 = arith.constant 0 : index
    %334 = vector.load %arg1[%c23, %c0_265, %c0_266] : memref<28x8x128xf32, #tpu.memory_space<vmem>>, vector<1x8x128xf32>
    %335 = vector.shape_cast %334 : vector<1x8x128xf32> to vector<8x128xf32>
    %cst_267 = arith.constant dense<0.000000e+00> : vector<8x128xf32>
    %336 = tpu.matmul %330, %0, %cst_267 {dimension_numbers = #tpu.dot_dimension_numbers<[1], [0], [0], [1], [0, 0, 1, 1], [], []>} : vector<8x256xf32>, vector<256x128xf32>, vector<8x128xf32> -> vector<8x128xf32>
    %337 = arith.addf %335, %336 : vector<8x128xf32>
    %cst_268 = arith.constant dense<0.000000e+00> : vector<8x128xf32>
    %338 = tpu.matmul %337, %1, %cst_268 {dimension_numbers = #tpu.dot_dimension_numbers<[1], [0], [0], [1], [0, 0, 1, 1], [], []>} : vector<8x128xf32>, vector<128x128xf32>, vector<8x128xf32> -> vector<8x128xf32>
    %339 = arith.addf %338, %333 : vector<8x128xf32>
    %340 = math.tanh %337 : vector<8x128xf32>
    %c0_269 = arith.constant 0 : index
    %c0_270 = arith.constant 0 : index
    %341 = vector.load %arg11[%c0_269, %c0_270] : memref<8x256xf32, #tpu.memory_space<vmem>>, vector<8x128xf32>
    tpu.vector_store %arg11[%c0_269, %c0_270], %340 {strides = array<i32>} : memref<8x256xf32, #tpu.memory_space<vmem>>, vector<8x128xf32>,
    %342 = math.tanh %339 : vector<8x128xf32>
    %c0_271 = arith.constant 0 : index
    %c128_272 = arith.constant 128 : index
    %343 = vector.load %arg11[%c0_271, %c128_272] : memref<8x256xf32, #tpu.memory_space<vmem>>, vector<8x128xf32>
    tpu.vector_store %arg11[%c0_271, %c128_272], %342 {strides = array<i32>} : memref<8x256xf32, #tpu.memory_space<vmem>>, vector<8x128xf32>,
    %c0_273 = arith.constant 0 : index
    %c0_274 = arith.constant 0 : index
    %344 = vector.load %arg11[%c0_273, %c0_274] : memref<8x256xf32, #tpu.memory_space<vmem>>, vector<8x256xf32>
    %345 = vector.extract_strided_slice %344 {offsets = [0, 128], sizes = [8, 128], strides = [1, 1]} : vector<8x256xf32> to vector<8x128xf32>
    %cst_275 = arith.constant dense<0.000000e+00> : vector<8x128xf32>
    %346 = tpu.matmul %345, %2, %cst_275 {dimension_numbers = #tpu.dot_dimension_numbers<[1], [0], [0], [1], [0, 0, 1, 1], [], []>} : vector<8x128xf32>, vector<128x128xf32>, vector<8x128xf32> -> vector<8x128xf32>
    %347 = arith.addf %346, %5 : vector<8x128xf32>
    %c24 = arith.constant 24 : index
    %c0_276 = arith.constant 0 : index
    %c0_277 = arith.constant 0 : index
    %348 = vector.load %arg1[%c24, %c0_276, %c0_277] : memref<28x8x128xf32, #tpu.memory_space<vmem>>, vector<1x8x128xf32>
    %349 = vector.shape_cast %348 : vector<1x8x128xf32> to vector<8x128xf32>
    %cst_278 = arith.constant dense<0.000000e+00> : vector<8x128xf32>
    %350 = tpu.matmul %344, %0, %cst_278 {dimension_numbers = #tpu.dot_dimension_numbers<[1], [0], [0], [1], [0, 0, 1, 1], [], []>} : vector<8x256xf32>, vector<256x128xf32>, vector<8x128xf32> -> vector<8x128xf32>
    %351 = arith.addf %349, %350 : vector<8x128xf32>
    %cst_279 = arith.constant dense<0.000000e+00> : vector<8x128xf32>
    %352 = tpu.matmul %351, %1, %cst_279 {dimension_numbers = #tpu.dot_dimension_numbers<[1], [0], [0], [1], [0, 0, 1, 1], [], []>} : vector<8x128xf32>, vector<128x128xf32>, vector<8x128xf32> -> vector<8x128xf32>
    %353 = arith.addf %352, %347 : vector<8x128xf32>
    %354 = math.tanh %351 : vector<8x128xf32>
    %c0_280 = arith.constant 0 : index
    %c0_281 = arith.constant 0 : index
    %355 = vector.load %arg11[%c0_280, %c0_281] : memref<8x256xf32, #tpu.memory_space<vmem>>, vector<8x128xf32>
    tpu.vector_store %arg11[%c0_280, %c0_281], %354 {strides = array<i32>} : memref<8x256xf32, #tpu.memory_space<vmem>>, vector<8x128xf32>,
    %356 = math.tanh %353 : vector<8x128xf32>
    %c0_282 = arith.constant 0 : index
    %c128_283 = arith.constant 128 : index
    %357 = vector.load %arg11[%c0_282, %c128_283] : memref<8x256xf32, #tpu.memory_space<vmem>>, vector<8x128xf32>
    tpu.vector_store %arg11[%c0_282, %c128_283], %356 {strides = array<i32>} : memref<8x256xf32, #tpu.memory_space<vmem>>, vector<8x128xf32>,
    %c0_284 = arith.constant 0 : index
    %c0_285 = arith.constant 0 : index
    %358 = vector.load %arg11[%c0_284, %c0_285] : memref<8x256xf32, #tpu.memory_space<vmem>>, vector<8x256xf32>
    %359 = vector.extract_strided_slice %358 {offsets = [0, 128], sizes = [8, 128], strides = [1, 1]} : vector<8x256xf32> to vector<8x128xf32>
    %cst_286 = arith.constant dense<0.000000e+00> : vector<8x128xf32>
    %360 = tpu.matmul %359, %2, %cst_286 {dimension_numbers = #tpu.dot_dimension_numbers<[1], [0], [0], [1], [0, 0, 1, 1], [], []>} : vector<8x128xf32>, vector<128x128xf32>, vector<8x128xf32> -> vector<8x128xf32>
    %361 = arith.addf %360, %5 : vector<8x128xf32>
    %c25 = arith.constant 25 : index
    %c0_287 = arith.constant 0 : index
    %c0_288 = arith.constant 0 : index
    %362 = vector.load %arg1[%c25, %c0_287, %c0_288] : memref<28x8x128xf32, #tpu.memory_space<vmem>>, vector<1x8x128xf32>
    %363 = vector.shape_cast %362 : vector<1x8x128xf32> to vector<8x128xf32>
    %cst_289 = arith.constant dense<0.000000e+00> : vector<8x128xf32>
    %364 = tpu.matmul %358, %0, %cst_289 {dimension_numbers = #tpu.dot_dimension_numbers<[1], [0], [0], [1], [0, 0, 1, 1], [], []>} : vector<8x256xf32>, vector<256x128xf32>, vector<8x128xf32> -> vector<8x128xf32>
    %365 = arith.addf %363, %364 : vector<8x128xf32>
    %cst_290 = arith.constant dense<0.000000e+00> : vector<8x128xf32>
    %366 = tpu.matmul %365, %1, %cst_290 {dimension_numbers = #tpu.dot_dimension_numbers<[1], [0], [0], [1], [0, 0, 1, 1], [], []>} : vector<8x128xf32>, vector<128x128xf32>, vector<8x128xf32> -> vector<8x128xf32>
    %367 = arith.addf %366, %361 : vector<8x128xf32>
    %368 = math.tanh %365 : vector<8x128xf32>
    %c0_291 = arith.constant 0 : index
    %c0_292 = arith.constant 0 : index
    %369 = vector.load %arg11[%c0_291, %c0_292] : memref<8x256xf32, #tpu.memory_space<vmem>>, vector<8x128xf32>
    tpu.vector_store %arg11[%c0_291, %c0_292], %368 {strides = array<i32>} : memref<8x256xf32, #tpu.memory_space<vmem>>, vector<8x128xf32>,
    %370 = math.tanh %367 : vector<8x128xf32>
    %c0_293 = arith.constant 0 : index
    %c128_294 = arith.constant 128 : index
    %371 = vector.load %arg11[%c0_293, %c128_294] : memref<8x256xf32, #tpu.memory_space<vmem>>, vector<8x128xf32>
    tpu.vector_store %arg11[%c0_293, %c128_294], %370 {strides = array<i32>} : memref<8x256xf32, #tpu.memory_space<vmem>>, vector<8x128xf32>,
    %c0_295 = arith.constant 0 : index
    %c0_296 = arith.constant 0 : index
    %372 = vector.load %arg11[%c0_295, %c0_296] : memref<8x256xf32, #tpu.memory_space<vmem>>, vector<8x256xf32>
    %373 = vector.extract_strided_slice %372 {offsets = [0, 128], sizes = [8, 128], strides = [1, 1]} : vector<8x256xf32> to vector<8x128xf32>
    %cst_297 = arith.constant dense<0.000000e+00> : vector<8x128xf32>
    %374 = tpu.matmul %373, %2, %cst_297 {dimension_numbers = #tpu.dot_dimension_numbers<[1], [0], [0], [1], [0, 0, 1, 1], [], []>} : vector<8x128xf32>, vector<128x128xf32>, vector<8x128xf32> -> vector<8x128xf32>
    %375 = arith.addf %374, %5 : vector<8x128xf32>
    %c26 = arith.constant 26 : index
    %c0_298 = arith.constant 0 : index
    %c0_299 = arith.constant 0 : index
    %376 = vector.load %arg1[%c26, %c0_298, %c0_299] : memref<28x8x128xf32, #tpu.memory_space<vmem>>, vector<1x8x128xf32>
    %377 = vector.shape_cast %376 : vector<1x8x128xf32> to vector<8x128xf32>
    %cst_300 = arith.constant dense<0.000000e+00> : vector<8x128xf32>
    %378 = tpu.matmul %372, %0, %cst_300 {dimension_numbers = #tpu.dot_dimension_numbers<[1], [0], [0], [1], [0, 0, 1, 1], [], []>} : vector<8x256xf32>, vector<256x128xf32>, vector<8x128xf32> -> vector<8x128xf32>
    %379 = arith.addf %377, %378 : vector<8x128xf32>
    %cst_301 = arith.constant dense<0.000000e+00> : vector<8x128xf32>
    %380 = tpu.matmul %379, %1, %cst_301 {dimension_numbers = #tpu.dot_dimension_numbers<[1], [0], [0], [1], [0, 0, 1, 1], [], []>} : vector<8x128xf32>, vector<128x128xf32>, vector<8x128xf32> -> vector<8x128xf32>
    %381 = arith.addf %380, %375 : vector<8x128xf32>
    %382 = math.tanh %379 : vector<8x128xf32>
    %c0_302 = arith.constant 0 : index
    %c0_303 = arith.constant 0 : index
    %383 = vector.load %arg11[%c0_302, %c0_303] : memref<8x256xf32, #tpu.memory_space<vmem>>, vector<8x128xf32>
    tpu.vector_store %arg11[%c0_302, %c0_303], %382 {strides = array<i32>} : memref<8x256xf32, #tpu.memory_space<vmem>>, vector<8x128xf32>,
    %384 = math.tanh %381 : vector<8x128xf32>
    %c0_304 = arith.constant 0 : index
    %c128_305 = arith.constant 128 : index
    %385 = vector.load %arg11[%c0_304, %c128_305] : memref<8x256xf32, #tpu.memory_space<vmem>>, vector<8x128xf32>
    tpu.vector_store %arg11[%c0_304, %c128_305], %384 {strides = array<i32>} : memref<8x256xf32, #tpu.memory_space<vmem>>, vector<8x128xf32>,
    %c0_306 = arith.constant 0 : index
    %c0_307 = arith.constant 0 : index
    %386 = vector.load %arg11[%c0_306, %c0_307] : memref<8x256xf32, #tpu.memory_space<vmem>>, vector<8x256xf32>
    %387 = vector.extract_strided_slice %386 {offsets = [0, 128], sizes = [8, 128], strides = [1, 1]} : vector<8x256xf32> to vector<8x128xf32>
    %cst_308 = arith.constant dense<0.000000e+00> : vector<8x128xf32>
    %388 = tpu.matmul %387, %2, %cst_308 {dimension_numbers = #tpu.dot_dimension_numbers<[1], [0], [0], [1], [0, 0, 1, 1], [], []>} : vector<8x128xf32>, vector<128x128xf32>, vector<8x128xf32> -> vector<8x128xf32>
    %389 = arith.addf %388, %5 : vector<8x128xf32>
    %c27 = arith.constant 27 : index
    %c0_309 = arith.constant 0 : index
    %c0_310 = arith.constant 0 : index
    %390 = vector.load %arg1[%c27, %c0_309, %c0_310] : memref<28x8x128xf32, #tpu.memory_space<vmem>>, vector<1x8x128xf32>
    %391 = vector.shape_cast %390 : vector<1x8x128xf32> to vector<8x128xf32>
    %cst_311 = arith.constant dense<0.000000e+00> : vector<8x128xf32>
    %392 = tpu.matmul %386, %0, %cst_311 {dimension_numbers = #tpu.dot_dimension_numbers<[1], [0], [0], [1], [0, 0, 1, 1], [], []>} : vector<8x256xf32>, vector<256x128xf32>, vector<8x128xf32> -> vector<8x128xf32>
    %393 = arith.addf %391, %392 : vector<8x128xf32>
    %cst_312 = arith.constant dense<0.000000e+00> : vector<8x128xf32>
    %394 = tpu.matmul %393, %1, %cst_312 {dimension_numbers = #tpu.dot_dimension_numbers<[1], [0], [0], [1], [0, 0, 1, 1], [], []>} : vector<8x128xf32>, vector<128x128xf32>, vector<8x128xf32> -> vector<8x128xf32>
    %395 = arith.addf %394, %389 : vector<8x128xf32>
    %396 = math.tanh %393 : vector<8x128xf32>
    %c0_313 = arith.constant 0 : index
    %c0_314 = arith.constant 0 : index
    %397 = vector.load %arg11[%c0_313, %c0_314] : memref<8x256xf32, #tpu.memory_space<vmem>>, vector<8x128xf32>
    tpu.vector_store %arg11[%c0_313, %c0_314], %396 {strides = array<i32>} : memref<8x256xf32, #tpu.memory_space<vmem>>, vector<8x128xf32>,
    %398 = math.tanh %395 : vector<8x128xf32>
    %c0_315 = arith.constant 0 : index
    %c128_316 = arith.constant 128 : index
    %399 = vector.load %arg11[%c0_315, %c128_316] : memref<8x256xf32, #tpu.memory_space<vmem>>, vector<8x128xf32>
    tpu.vector_store %arg11[%c0_315, %c128_316], %398 {strides = array<i32>} : memref<8x256xf32, #tpu.memory_space<vmem>>, vector<8x128xf32>,
    %c0_317 = arith.constant 0 : index
    %c0_318 = arith.constant 0 : index
    %400 = vector.load %arg11[%c0_317, %c0_318] : memref<8x256xf32, #tpu.memory_space<vmem>>, vector<8x128xf32>
    %c0_319 = arith.constant 0 : index
    %c128_320 = arith.constant 128 : index
    %401 = vector.load %arg11[%c0_319, %c128_320] : memref<8x256xf32, #tpu.memory_space<vmem>>, vector<8x128xf32>
    %c0_321 = arith.constant 0 : index
    %c0_322 = arith.constant 0 : index
    %402 = vector.load %arg9[%c0_321, %c0_322] : memref<8x128xf32, #tpu.memory_space<vmem>>, vector<8x128xf32>
    tpu.vector_store %arg9[%c0_321, %c0_322], %400 {strides = array<i32>} : memref<8x128xf32, #tpu.memory_space<vmem>>, vector<8x128xf32>,
    %c0_323 = arith.constant 0 : index
    %c0_324 = arith.constant 0 : index
    %403 = vector.load %arg10[%c0_323, %c0_324] : memref<8x128xf32, #tpu.memory_space<vmem>>, vector<8x128xf32>
    tpu.vector_store %arg10[%c0_323, %c0_324], %401 {strides = array<i32>} : memref<8x128xf32, #tpu.memory_space<vmem>>, vector<8x128xf32>,
    %c0_325 = arith.constant 0 : index
    %c0_326 = arith.constant 0 : index
    %404 = vector.load %arg6[%c0_325, %c0_326] : memref<128x128xf32, #tpu.memory_space<vmem>>, vector<128x128xf32>
    %cst_327 = arith.constant dense<0.000000e+00> : vector<8x128xf32>
    %405 = tpu.matmul %401, %404, %cst_327 {dimension_numbers = #tpu.dot_dimension_numbers<[1], [0], [0], [1], [0, 0, 1, 1], [], []>} : vector<8x128xf32>, vector<128x128xf32>, vector<8x128xf32> -> vector<8x128xf32>
    %c0_328 = arith.constant 0 : index
    %c0_329 = arith.constant 0 : index
    %406 = vector.load %arg7[%c0_328, %c0_329] : memref<1x128xf32, #tpu.memory_space<vmem>>, vector<1x128xf32>
    %407 = vector.broadcast %406 : vector<1x128xf32> to vector<8x128xf32>
    %408 = arith.addf %405, %407 : vector<8x128xf32>
    %c0_330 = arith.constant 0 : index
    %c0_331 = arith.constant 0 : index
    %409 = vector.load %arg8[%c0_330, %c0_331] : memref<8x128xf32, #tpu.memory_space<vmem>>, vector<8x128xf32>
    tpu.vector_store %arg8[%c0_330, %c0_331], %408 {strides = array<i32>} : memref<8x128xf32, #tpu.memory_space<vmem>>, vector<8x128xf32>,
    return
  }
  func.func @transform_0(%arg0: i32) -> (i32, i32, i32) {
    %c0_i32 = arith.constant 0 : i32
    %c0_i32_0 = arith.constant 0 : i32
    %c0_i32_1 = arith.constant 0 : i32
    return %c0_i32, %arg0, %c0_i32_0 : i32, i32, i32
  }
  func.func @transform_1(%arg0: i32) -> (i32, i32) {
    %c0_i32 = arith.constant 0 : i32
    %c0_i32_0 = arith.constant 0 : i32
    %c0_i32_1 = arith.constant 0 : i32
    return %c0_i32, %c0_i32_0 : i32, i32
  }
  func.func @transform_2(%arg0: i32) -> (i32, i32) {
    %c0_i32 = arith.constant 0 : i32
    %c0_i32_0 = arith.constant 0 : i32
    %c0_i32_1 = arith.constant 0 : i32
    return %c0_i32, %c0_i32_0 : i32, i32
  }
  func.func @transform_3(%arg0: i32) -> (i32, i32) {
    %c0_i32 = arith.constant 0 : i32
    %c0_i32_0 = arith.constant 0 : i32
    %c0_i32_1 = arith.constant 0 : i32
    return %c0_i32, %c0_i32_0 : i32, i32
  }
  func.func @transform_4(%arg0: i32) -> (i32, i32) {
    %c0_i32 = arith.constant 0 : i32
    %c0_i32_0 = arith.constant 0 : i32
    %c0_i32_1 = arith.constant 0 : i32
    return %c0_i32, %c0_i32_0 : i32, i32
  }
  func.func @transform_5(%arg0: i32) -> (i32, i32) {
    %c0_i32 = arith.constant 0 : i32
    %c0_i32_0 = arith.constant 0 : i32
    %c0_i32_1 = arith.constant 0 : i32
    return %c0_i32, %c0_i32_0 : i32, i32
  }
  func.func @transform_6(%arg0: i32) -> (i32, i32) {
    %c0_i32 = arith.constant 0 : i32
    %c0_i32_0 = arith.constant 0 : i32
    %c0_i32_1 = arith.constant 0 : i32
    return %c0_i32, %c0_i32_0 : i32, i32
  }
  func.func @transform_7(%arg0: i32) -> (i32, i32) {
    %c0_i32 = arith.constant 0 : i32
    %c0_i32_0 = arith.constant 0 : i32
    return %arg0, %c0_i32 : i32, i32
  }
  func.func @transform_8(%arg0: i32) -> (i32, i32) {
    %c0_i32 = arith.constant 0 : i32
    %c0_i32_0 = arith.constant 0 : i32
    return %arg0, %c0_i32 : i32, i32
  }
  func.func @transform_9(%arg0: i32) -> (i32, i32) {
    %c0_i32 = arith.constant 0 : i32
    %c0_i32_0 = arith.constant 0 : i32
    return %arg0, %c0_i32 : i32, i32
  }
}

</mosaic_0001>

<bundles_post_ra>
// kernel: mul.5
= control target key start
LH: loop header
LB: loop body
LE: loop exit
PB: predicated region body
PF: predicated region fallthrough
CT: control target
= control target key end

     0   :  { %s364_s0 = inlined_call_operand.vmem [shape: f32[128,128], index: 0, kind: input, shape index: {}]   ;;  %s365_s1 = inlined_call_operand.vmem [shape: f32[128,128], index: 1, kind: input, shape index: {}]   ;;  %s366_s2 = inlined_call_operand.vmem [shape: f32[128,128], index: 2, kind: output, shape index: {}]  }
   0x1   :  { %v3_v0 = vld [vmem:[%s364_s0] sm:$0xff]  ;;  %v160_v2 = vld [vmem:[%s364_s0 + $0x8] sm:$0xff]  ;;  %v163_v5 = vld [vmem:[%s364_s0 + $0x10] sm:$0xff] }
   0x2   :  { %v4_v1 = vld [vmem:[%s365_s1] sm:$0xff]  ;;  %v161_v4 = vld [vmem:[%s365_s1 + $0x8] sm:$0xff]  ;;  %v164_v6 = vld [vmem:[%s365_s1 + $0x10] sm:$0xff] }
   0x3   :  { %v7_v3 = vmul.f32 %v4_v1, %v3_v0  ;;  %v16_v7 = vmul.f32 %v161_v4, %v160_v2  ;;  %v26_v8 = vmul.f32 %v164_v6, %v163_v5  ;;  %v166_v9 = vld [vmem:[%s364_s0 + $0x18] sm:$0xff]  ;;  %v169_v11 = vld [vmem:[%s364_s0 + $0x20] sm:$0xff]  ;;  %v172_v14 = vld [vmem:[%s364_s0 + $0x28] sm:$0xff] }
   0x4   :  { %v167_v10 = vld [vmem:[%s365_s1 + $0x18] sm:$0xff]  ;;  %v170_v13 = vld [vmem:[%s365_s1 + $0x20] sm:$0xff]  ;;  %v173_v15 = vld [vmem:[%s365_s1 + $0x28] sm:$0xff] }
   0x5   :  { %9 = vst [vmem:[%s366_s2] sm:$0xff] %v7_v3  ;;  %v36_v12 = vmul.f32 %v167_v10, %v166_v9  ;;  %v46_v16 = vmul.f32 %v170_v13, %v169_v11  ;;  %v56_v17 = vmul.f32 %v173_v15, %v172_v14  ;;  %v175_v18 = vld [vmem:[%s364_s0 + $0x30] sm:$0xff]  ;;  %v178_v20 = vld [vmem:[%s364_s0 + $0x38] sm:$0xff]  ;;  %v181_v23 = vld [vmem:[%s364_s0 + $0x40] sm:$0xff] }
   0x6   :  { %162 = vst [vmem:[%s366_s2 + $0x8] sm:$0xff] %v16_v7  ;;  %v176_v19 = vld [vmem:[%s365_s1 + $0x30] sm:$0xff]  ;;  %v179_v22 = vld [vmem:[%s365_s1 + $0x38] sm:$0xff]  ;;  %v182_v24 = vld [vmem:[%s365_s1 + $0x40] sm:$0xff] }
   0x7   :  { %165 = vst [vmem:[%s366_s2 + $0x10] sm:$0xff] %v26_v8  ;;  %v66_v21 = vmul.f32 %v176_v19, %v175_v18  ;;  %v76_v25 = vmul.f32 %v179_v22, %v178_v20  ;;  %v86_v26 = vmul.f32 %v182_v24, %v181_v23  ;;  %v184_v27 = vld [vmem:[%s364_s0 + $0x48] sm:$0xff]  ;;  %v187_v29 = vld [vmem:[%s364_s0 + $0x50] sm:$0xff]  ;;  %v190_v32 = vld [vmem:[%s364_s0 + $0x58] sm:$0xff] }
   0x8   :  { %168 = vst [vmem:[%s366_s2 + $0x18] sm:$0xff] %v36_v12  ;;  %v185_v28 = vld [vmem:[%s365_s1 + $0x48] sm:$0xff]  ;;  %v188_v31 = vld [vmem:[%s365_s1 + $0x50] sm:$0xff]  ;;  %v191_v33 = vld [vmem:[%s365_s1 + $0x58] sm:$0xff] }
   0x9   :  { %171 = vst [vmem:[%s366_s2 + $0x20] sm:$0xff] %v46_v16  ;;  %v96_v30 = vmul.f32 %v185_v28, %v184_v27  ;;  %v106_v34 = vmul.f32 %v188_v31, %v187_v29  ;;  %v116_v35 = vmul.f32 %v191_v33, %v190_v32  ;;  %v193_v36 = vld [vmem:[%s364_s0 + $0x60] sm:$0xff]  ;;  %v196_v38 = vld [vmem:[%s364_s0 + $0x68] sm:$0xff]  ;;  %v199_v41 = vld [vmem:[%s364_s0 + $0x70] sm:$0xff] }
   0xa   :  { %174 = vst [vmem:[%s366_s2 + $0x28] sm:$0xff] %v56_v17  ;;  %v194_v37 = vld [vmem:[%s365_s1 + $0x60] sm:$0xff]  ;;  %v197_v40 = vld [vmem:[%s365_s1 + $0x68] sm:$0xff]  ;;  %v200_v42 = vld [vmem:[%s365_s1 + $0x70] sm:$0xff] }
   0xb   :  { %177 = vst [vmem:[%s366_s2 + $0x30] sm:$0xff] %v66_v21  ;;  %v126_v39 = vmul.f32 %v194_v37, %v193_v36  ;;  %v136_v43 = vmul.f32 %v197_v40, %v196_v38  ;;  %v146_v44 = vmul.f32 %v200_v42, %v199_v41  ;;  %v202_v45 = vld [vmem:[%s364_s0 + $0x78] sm:$0xff] }
   0xc   :  { %180 = vst [vmem:[%s366_s2 + $0x38] sm:$0xff] %v76_v25  ;;  %v203_v46 = vld [vmem:[%s365_s1 + $0x78] sm:$0xff] }
   0xd   :  { %183 = vst [vmem:[%s366_s2 + $0x40] sm:$0xff] %v86_v26  ;;  %v156_v47 = vmul.f32 %v203_v46, %v202_v45 }
   0xe   :  { %186 = vst [vmem:[%s366_s2 + $0x48] sm:$0xff] %v96_v30 }
   0xf   :  { %189 = vst [vmem:[%s366_s2 + $0x50] sm:$0xff] %v106_v34 }
  0x10   :  { %192 = vst [vmem:[%s366_s2 + $0x58] sm:$0xff] %v116_v35 }
  0x11   :  { %195 = vst [vmem:[%s366_s2 + $0x60] sm:$0xff] %v126_v39 }
  0x12   :  { %198 = vst [vmem:[%s366_s2 + $0x68] sm:$0xff] %v136_v43 }
  0x13   :  { %201 = vst [vmem:[%s366_s2 + $0x70] sm:$0xff] %v146_v44 }
  0x14   :  { %204 = vst [vmem:[%s366_s2 + $0x78] sm:$0xff] %v156_v47 }

// kernel: mul.4
= control target key start
LH: loop header
LB: loop body
LE: loop exit
PB: predicated region body
PF: predicated region fallthrough
CT: control target
= control target key end

     0   :  { %3 = vsyncpa [#allocation1], 0  ;;  %s334_s0 = inlined_call_operand.hbm [shape: f32[128,128], index: 0, kind: input, shape index: {}]   ;;  %s335_s1 = inlined_call_operand.hbm [shape: f32[128,128], index: 1, kind: input, shape index: {}]   ;;  %s336_s2 = inlined_call_operand.vmem [shape: f32[128,128], index: 2, kind: output, shape index: {}]  }
   0x1   :  { %s7_s0 = sshll.u32 %s334_s0, 4  ;;  %s8_s0 = int_to_ptr.hbm [resolvable:$true] %s7_s0 }
   0x2   :  { %4 = vsyncpa [#allocation3], 0  ;;  %s261_s11 = smov [#allocation0]   ;;  %s18_s1 = sshll.u32 %s335_s1, 4  ;;  %s19_s1 = int_to_ptr.hbm [resolvable:$true] %s18_s1 }
   0x3   :  { %s9_s12 = sshll.u32 %s261_s11, 4  ;;  %s262_s15 = smov 128   ;;  %s10_s12 = int_to_ptr.vmem [resolvable:$true] %s9_s12 }
   0x4   :  { %s263_s16 = smov 8   ;;  %s264_s17 = smov [#allocation2]  }
   0x5   :  { %15 = dma.hbm_to_vmem [thread:$0]  %s8_s0, 2048, %s10_s12, [#allocation1], %s262_s15, %s262_s15, %s263_s16  }
   0x6   :  { %s20_s18 = sshll.u32 %s264_s17, 4  ;;  %s21_s18 = int_to_ptr.vmem [resolvable:$true] %s20_s18 }
   0x7   :  { %26 = dma.hbm_to_vmem [thread:$0]  %s19_s1, 2048, %s21_s18, [#allocation3], %s262_s15, %s262_s15, %s263_s16  }
   0x8   :  { %257 = dma.done.wait [#allocation1], 2048  }
   0x9   :  { %258 = vsyncadd [#allocation1], 4294965248 }
   0xa   :  { %259 = dma.done.wait [#allocation3], 2048  }
   0xb   :  { %260 = vsyncadd [#allocation3], 4294965248  ;;  %v31_v0 = vld [vmem:[#allocation0] sm:$0xff]  ;;  %v39_v2 = vld [vmem:[#allocation0 + $0x8] sm:$0xff] }
   0xc   :  { %v32_v1 = vld [vmem:[#allocation2] sm:$0xff]  ;;  %v41_v4 = vld [vmem:[#allocation2 + $0x8] sm:$0xff]  ;;  %v49_v5 = vld [vmem:[#allocation0 + $0x10] sm:$0xff] }
   0xd   :  { %v35_v3 = vmul.f32 %v32_v1, %v31_v0  ;;  %v51_v6 = vld [vmem:[#allocation2 + $0x10] sm:$0xff]  ;;  %v44_v7 = vmul.f32 %v41_v4, %v39_v2  ;;  %v59_v9 = vld [vmem:[#allocation0 + $0x18] sm:$0xff]  ;;  %v69_v11 = vld [vmem:[#allocation0 + $0x20] sm:$0xff] }
   0xe   :  { %v54_v8 = vmul.f32 %v51_v6, %v49_v5  ;;  %v61_v10 = vld [vmem:[#allocation2 + $0x18] sm:$0xff]  ;;  %v71_v13 = vld [vmem:[#allocation2 + $0x20] sm:$0xff]  ;;  %v79_v14 = vld [vmem:[#allocation0 + $0x28] sm:$0xff] }
   0xf   :  { %37 = vst [vmem:[%s336_s2] sm:$0xff] %v35_v3  ;;  %v64_v12 = vmul.f32 %v61_v10, %v59_v9  ;;  %v81_v15 = vld [vmem:[#allocation2 + $0x28] sm:$0xff]  ;;  %v74_v16 = vmul.f32 %v71_v13, %v69_v11  ;;  %v89_v18 = vld [vmem:[#allocation0 + $0x30] sm:$0xff]  ;;  %v99_v20 = vld [vmem:[#allocation0 + $0x38] sm:$0xff] }
  0x10   :  { %190 = vst [vmem:[%s336_s2 + $0x8] sm:$0xff] %v44_v7  ;;  %v84_v17 = vmul.f32 %v81_v15, %v79_v14  ;;  %v91_v19 = vld [vmem:[#allocation2 + $0x30] sm:$0xff]  ;;  %v101_v22 = vld [vmem:[#allocation2 + $0x38] sm:$0xff]  ;;  %v109_v23 = vld [vmem:[#allocation0 + $0x40] sm:$0xff] }
  0x11   :  { %191 = vst [vmem:[%s336_s2 + $0x10] sm:$0xff] %v54_v8  ;;  %v94_v21 = vmul.f32 %v91_v19, %v89_v18  ;;  %v111_v24 = vld [vmem:[#allocation2 + $0x40] sm:$0xff]  ;;  %v104_v25 = vmul.f32 %v101_v22, %v99_v20  ;;  %v119_v26 = vld [vmem:[#allocation0 + $0x48] sm:$0xff]  ;;  %v129_v28 = vld [vmem:[#allocation0 + $0x50] sm:$0xff] }
  0x12   :  { %192 = vst [vmem:[%s336_s2 + $0x18] sm:$0xff] %v64_v12  ;;  %v121_v27 = vld [vmem:[#allocation2 + $0x48] sm:$0xff]  ;;  %v114_v29 = vmul.f32 %v111_v24, %v109_v23  ;;  %v131_v30 = vld [vmem:[#allocation2 + $0x50] sm:$0xff]  ;;  %v139_v31 = vld [vmem:[#allocation0 + $0x58] sm:$0xff] }
  0x13   :  { %193 = vst [vmem:[%s336_s2 + $0x20] sm:$0xff] %v74_v16  ;;  %v141_v32 = vld [vmem:[#allocation2 + $0x58] sm:$0xff]  ;;  %v124_v33 = vmul.f32 %v121_v27, %v119_v26  ;;  %v149_v34 = vld [vmem:[#allocation0 + $0x60] sm:$0xff]  ;;  %v134_v36 = vmul.f32 %v131_v30, %v129_v28  ;;  %v159_v37 = vld [vmem:[#allocation0 + $0x68] sm:$0xff] }
  0x14   :  { %194 = vst [vmem:[%s336_s2 + $0x28] sm:$0xff] %v84_v17  ;;  %v151_v35 = vld [vmem:[#allocation2 + $0x60] sm:$0xff]  ;;  %v161_v38 = vld [vmem:[#allocation2 + $0x68] sm:$0xff]  ;;  %v144_v39 = vmul.f32 %v141_v32, %v139_v31  ;;  %v169_v40 = vld [vmem:[#allocation0 + $0x70] sm:$0xff] }
  0x15   :  { %195 = vst [vmem:[%s336_s2 + $0x30] sm:$0xff] %v94_v21  ;;  %v171_v41 = vld [vmem:[#allocation2 + $0x70] sm:$0xff]  ;;  %v154_v42 = vmul.f32 %v151_v35, %v149_v34  ;;  %v179_v43 = vld [vmem:[#allocation0 + $0x78] sm:$0xff]  ;;  %v164_v45 = vmul.f32 %v161_v38, %v159_v37 }
  0x16   :  { %196 = vst [vmem:[%s336_s2 + $0x38] sm:$0xff] %v104_v25  ;;  %v181_v44 = vld [vmem:[#allocation2 + $0x78] sm:$0xff]  ;;  %v174_v46 = vmul.f32 %v171_v41, %v169_v40 }
  0x17   :  { %197 = vst [vmem:[%s336_s2 + $0x40] sm:$0xff] %v114_v29  ;;  %v184_v47 = vmul.f32 %v181_v44, %v179_v43 }
  0x18   :  { %198 = vst [vmem:[%s336_s2 + $0x48] sm:$0xff] %v124_v33 }
  0x19   :  { %199 = vst [vmem:[%s336_s2 + $0x50] sm:$0xff] %v134_v36 }
  0x1a   :  { %200 = vst [vmem:[%s336_s2 + $0x58] sm:$0xff] %v144_v39 }
  0x1b   :  { %201 = vst [vmem:[%s336_s2 + $0x60] sm:$0xff] %v154_v42 }
  0x1c   :  { %202 = vst [vmem:[%s336_s2 + $0x68] sm:$0xff] %v164_v45 }
  0x1d   :  { %203 = vst [vmem:[%s336_s2 + $0x70] sm:$0xff] %v174_v46 }
  0x1e   :  { %204 = vst [vmem:[%s336_s2 + $0x78] sm:$0xff] %v184_v47 }
  0x1f   :  { %188 = vsyncpa [#allocation1], 1 }
  0x20   :  { %189 = vsyncpa [#allocation3], 1 }

// kernel: binde_esn_mnist_forward.1
= control target key start
LH: loop header
LB: loop body
LE: loop exit
PB: predicated region body
PF: predicated region fallthrough
CT: control target
= control target key end

     0   :  { %v6372_v55 = vmov 0.0   ;;  %s6362_s1 = inlined_call_operand.vmem [shape: f32[256,128], index: 1, kind: input, shape index: {}]   ;;  %s6363_s2 = inlined_call_operand.vmem [shape: f32[128,128], index: 2, kind: input, shape index: {}]   ;;  %s6364_s3 = inlined_call_operand.vmem [shape: f32[128,128], index: 3, kind: input, shape index: {}]   ;;  %s6365_s4 = inlined_call_operand.vmem [shape: f32[1,128], index: 4, kind: input, shape index: {}]   ;;  %s6366_s0 = inlined_call_operand.vmem [shape: f32[28,8,128], index: 0, kind: input, shape index: {}]   ;;  %s6367_s5 = inlined_call_operand.vmem [shape: f32[128,128], index: 5, kind: input, shape index: {}]   ;;  %s6368_s8 = inlined_call_operand.vmem [shape: f32[8,128], index: 8, kind: output, shape index: {1}]   ;;  %s6369_s6 = inlined_call_operand.vmem [shape: f32[1,128], index: 6, kind: input, shape index: {}]   ;;  %s6370_s9 = inlined_call_operand.vmem [shape: f32[8,128], index: 9, kind: output, shape index: {2}]   ;;  %s6371_s7 = inlined_call_operand.vmem [shape: f32[8,128], index: 7, kind: output, shape index: {0}]  }
   0x1   :  { %v3058_v0 = vld [vmem:[%s6362_s1 + $0xf8] sm:$0xff]  ;;  %v3063_v1 = vld [vmem:[%s6362_s1 + $0xf0] sm:$0xff]  ;;  %v3079_v4 = vld [vmem:[%s6362_s1 + $0xe8] sm:$0xff] }
   0x2   :  { %142 = vmatpush.msra.mxu2 %v3058_v0  ;;  %v3069_v2 = vld [vmem:[%s6362_s1 + $0x78] sm:$0xff]  ;;  %v3074_v3 = vld [vmem:[%s6362_s1 + $0x70] sm:$0xff]  ;;  %v3086_v5 = vld [vmem:[%s6362_s1 + $0x68] sm:$0xff] }
   0x3   :  { %122 = vmatpush.msra.mxu1 %v3069_v2  ;;  %v3091_v6 = vld [vmem:[%s6362_s1 + $0xe0] sm:$0xff]  ;;  %v3103_v8 = vld [vmem:[%s6362_s1 + $0xd8] sm:$0xff]  ;;  %v3115_v10 = vld [vmem:[%s6362_s1 + $0xd0] sm:$0xff] }
   0x4   :  { %143 = vmatpush.msra.mxu2 %v3063_v1  ;;  %v3098_v7 = vld [vmem:[%s6362_s1 + $0x60] sm:$0xff]  ;;  %v3110_v9 = vld [vmem:[%s6362_s1 + $0x58] sm:$0xff]  ;;  %v3122_v11 = vld [vmem:[%s6362_s1 + $0x50] sm:$0xff] }
   0x5   :  { %123 = vmatpush.msra.mxu1 %v3074_v3  ;;  %v3127_v12 = vld [vmem:[%s6362_s1 + $0xc8] sm:$0xff]  ;;  %v3133_v13 = vld [vmem:[%s6363_s2 + $0x78] sm:$0xff]  ;;  %v3145_v15 = vld [vmem:[%s6363_s2 + $0x70] sm:$0xff] }
   0x6   :  { %144 = vmatpush.msra.mxu2 %v3079_v4  ;;  %v3139_v14 = vld [vmem:[%s6362_s1 + $0x48] sm:$0xff]  ;;  %163 = vmatpush.msra.mxu3 %v3133_v13  ;;  %v3150_v16 = vld [vmem:[%s6364_s3 + $0x78] sm:$0xff]  ;;  %v3155_v17 = vld [vmem:[%s6362_s1 + $0xc0] sm:$0xff] }
   0x7   :  { %124 = vmatpush.msra.mxu1 %v3086_v5  ;;  %101 = vmatpush.msra.mxu0 %v3150_v16  ;;  %v3162_v18 = vld [vmem:[%s6363_s2 + $0x68] sm:$0xff]  ;;  %v3167_v19 = vld [vmem:[%s6364_s3 + $0x70] sm:$0xff]  ;;  %v3173_v20 = vld [vmem:[%s6362_s1 + $0x40] sm:$0xff] }
   0x8   :  { %145 = vmatpush.msra.mxu2 %v3091_v6  ;;  %164 = vmatpush.msra.mxu3 %v3145_v15  ;;  %v3179_v21 = vld [vmem:[%s6364_s3 + $0x68] sm:$0xff]  ;;  %v3184_v22 = vld [vmem:[%s6362_s1 + $0xb8] sm:$0xff]  ;;  %v3191_v23 = vld [vmem:[%s6363_s2 + $0x60] sm:$0xff] }
   0x9   :  { %125 = vmatpush.msra.mxu1 %v3098_v7  ;;  %102 = vmatpush.msra.mxu0 %v3167_v19  ;;  %v3197_v24 = vld [vmem:[%s6362_s1 + $0x38] sm:$0xff]  ;;  %v3203_v25 = vld [vmem:[%s6364_s3 + $0x60] sm:$0xff]  ;;  %v3208_v26 = vld [vmem:[%s6362_s1 + $0xb0] sm:$0xff] }
   0xa   :  { %146 = vmatpush.msra.mxu2 %v3103_v8  ;;  %165 = vmatpush.msra.mxu3 %v3162_v18  ;;  %v3215_v27 = vld [vmem:[%s6363_s2 + $0x58] sm:$0xff]  ;;  %v3221_v28 = vld [vmem:[%s6362_s1 + $0x30] sm:$0xff]  ;;  %v3232_v30 = vld [vmem:[%s6362_s1 + $0xa8] sm:$0xff] }
   0xb   :  { %126 = vmatpush.msra.mxu1 %v3110_v9  ;;  %103 = vmatpush.msra.mxu0 %v3179_v21  ;;  %v3227_v29 = vld [vmem:[%s6364_s3 + $0x58] sm:$0xff]  ;;  %6468 = vst [vmem:[#allocation3_spill] sm:$0xff] %v3232_v30  ;;  %v3239_v31 = vld [vmem:[%s6363_s2 + $0x50] sm:$0xff]  ;;  %v3245_v32 = vld [vmem:[%s6362_s1 + $0x28] sm:$0xff] }
   0xc   :  { %147 = vmatpush.msra.mxu2 %v3115_v10  ;;  %166 = vmatpush.msra.mxu3 %v3191_v23  ;;  %v3251_v33 = vld [vmem:[%s6364_s3 + $0x50] sm:$0xff]  ;;  %v3256_v34 = vld [vmem:[%s6362_s1 + $0xa0] sm:$0xff]  ;;  %v3263_v35 = vld [vmem:[%s6363_s2 + $0x48] sm:$0xff] }
   0xd   :  { %127 = vmatpush.msra.mxu1 %v3122_v11  ;;  %104 = vmatpush.msra.mxu0 %v3203_v25  ;;  %6469 = vst [vmem:[#allocation4_spill] sm:$0xff] %v3256_v34  ;;  %v3269_v36 = vld [vmem:[%s6362_s1 + $0x20] sm:$0xff]  ;;  %v3275_v37 = vld [vmem:[%s6364_s3 + $0x48] sm:$0xff]  ;;  %v3280_v38 = vld [vmem:[%s6362_s1 + $0x98] sm:$0xff] }
   0xe   :  { %148 = vmatpush.msra.mxu2 %v3127_v12  ;;  %167 = vmatpush.msra.mxu3 %v3215_v27  ;;  %6470 = vst [vmem:[#allocation5_spill] sm:$0xff] %v3280_v38  ;;  %v3287_v39 = vld [vmem:[%s6363_s2 + $0x40] sm:$0xff]  ;;  %v3293_v40 = vld [vmem:[%s6362_s1 + $0x18] sm:$0xff]  ;;  %v3304_v42 = vld [vmem:[%s6362_s1 + $0x90] sm:$0xff] }
   0xf   :  { %128 = vmatpush.msra.mxu1 %v3139_v14  ;;  %105 = vmatpush.msra.mxu0 %v3227_v29  ;;  %6471 = vst [vmem:[#allocation6_spill] sm:$0xff] %v3293_v40  ;;  %v3299_v41 = vld [vmem:[%s6364_s3 + $0x40] sm:$0xff]  ;;  %v3311_v43 = vld [vmem:[%s6363_s2 + $0x38] sm:$0xff]  ;;  %v3317_v44 = vld [vmem:[%s6362_s1 + $0x10] sm:$0xff] }
  0x10   :  { %149 = vmatpush.msra.mxu2 %v3155_v17  ;;  %168 = vmatpush.msra.mxu3 %v3239_v31  ;;  %6472 = vst [vmem:[#allocation7_spill] sm:$0xff] %v3304_v42  ;;  %v3323_v45 = vld [vmem:[%s6364_s3 + $0x38] sm:$0xff]  ;;  %v3328_v46 = vld [vmem:[%s6362_s1 + $0x88] sm:$0xff]  ;;  %v3335_v47 = vld [vmem:[%s6363_s2 + $0x30] sm:$0xff] }
  0x11   :  { %129 = vmatpush.msra.mxu1 %v3173_v20  ;;  %106 = vmatpush.msra.mxu0 %v3251_v33  ;;  %6473 = vst [vmem:[#allocation8_spill] sm:$0xff] %v3328_v46  ;;  %v3341_v48 = vld [vmem:[%s6362_s1 + $0x8] sm:$0xff]  ;;  %v3347_v49 = vld [vmem:[%s6364_s3 + $0x30] sm:$0xff]  ;;  %v3352_v50 = vld [vmem:[%s6362_s1 + $0x80] sm:$0xff] }
  0x12   :  { %150 = vmatpush.msra.mxu2 %v3184_v22  ;;  %169 = vmatpush.msra.mxu3 %v3263_v35  ;;  %6474 = vst [vmem:[#allocation9_spill] sm:$0xff] %v3347_v49  ;;  %v3359_v51 = vld [vmem:[%s6363_s2 + $0x28] sm:$0xff]  ;;  %v3365_v52 = vld [vmem:[%s6362_s1] sm:$0xff]  ;;  %v3387_v56 = vld [vmem:[%s6363_s2 + $0x18] sm:$0xff] }
  0x13   :  { %130 = vmatpush.msra.mxu1 %v3197_v24  ;;  %107 = vmatpush.msra.mxu0 %v3275_v37  ;;  %6475 = vst [vmem:[#allocation10_spill] sm:$0xff] %v3352_v50  ;;  %v3373_v53 = vld [vmem:[%s6363_s2 + $0x20] sm:$0xff]  ;;  %v3380_v54 = vld [vmem:[%s6364_s3 + $0x28] sm:$0xff]  ;;  %v3466_v58 = vld [vmem:[%s6363_s2 + $0x10] sm:$0xff] }
  0x14   :  { %151 = vmatpush.msra.mxu2 %v3208_v26  ;;  %170 = vmatpush.msra.mxu3 %v3287_v39  ;;  %v3394_v57 = vld [vmem:[%s6364_s3 + $0x20] sm:$0xff]  ;;  %v3472_v59 = vld [vmem:[%s6364_s3 + $0x18] sm:$0xff]  ;;  %v3477_v60 = vld [vmem:[%s6363_s2 + $0x8] sm:$0xff] }
  0x15   :  { %131 = vmatpush.msra.mxu1 %v3221_v28  ;;  %108 = vmatpush.msra.mxu0 %v3299_v41  ;;  %6476 = vst [vmem:[#allocation11_spill] sm:$0xff] %v3394_v57  ;;  %v3482_v61 = vld [vmem:[%s6364_s3 + $0x10] sm:$0xff]  ;;  %v3489_v62 = vld [vmem:[%s6363_s2] sm:$0xff]  ;;  %v3496_v63 = vld [vmem:[%s6364_s3 + $0x8] sm:$0xff] }
  0x16   :  { %152 = vmatpush.msra.mxu2 %v3232_v30  ;;  %171 = vmatpush.msra.mxu3 %v3311_v43  ;;  %6477 = vst [vmem:[#allocation12_spill] sm:$0xff] %v3472_v59 }
  0x17   :  { %132 = vmatpush.msra.mxu1 %v3245_v32  ;;  %109 = vmatpush.msra.mxu0 %v3323_v45 }
  0x18   :  { %153 = vmatpush.msra.mxu2 %v3256_v34  ;;  %172 = vmatpush.msra.mxu3 %v3335_v47 }
  0x19   :  { %133 = vmatpush.msra.mxu1 %v3269_v36  ;;  %110 = vmatpush.msra.mxu0 %v3347_v49 }
  0x1a   :  { %154 = vmatpush.msra.mxu2 %v3280_v38  ;;  %173 = vmatpush.msra.mxu3 %v3359_v51 }
  0x1b   :  { %134 = vmatpush.msra.mxu1 %v3293_v40  ;;  %111 = vmatpush.msra.mxu0 %v3380_v54 }
  0x1c   :  { %155 = vmatpush.msra.mxu2 %v3304_v42  ;;  %174 = vmatpush.msra.mxu3 %v3373_v53 }
  0x1d   :  { %135 = vmatpush.msra.mxu1 %v3317_v44  ;;  %112 = vmatpush.msra.mxu0 %v3394_v57 }
  0x1e   :  { %156 = vmatpush.msra.mxu2 %v3328_v46  ;;  %175 = vmatpush.msra.mxu3 %v3387_v56 }
  0x1f   :  { %136 = vmatpush.msra.mxu1 %v3341_v48  ;;  %113 = vmatpush.msra.mxu0 %v3472_v59 }
  0x20   :  { %157 = vmatpush.msra.mxu2 %v3352_v50  ;;  %176 = vmatpush.msra.mxu3 %v3466_v58 }
  0x21   :  { %158 = vmatmul.f32.vlgmr.msra.gmra.mxu2 %v6372_v55  ;;  %137 = vmatpush.msra.mxu1 %v3365_v52 }
  0x22   :  { %138 = vmatmul.f32.vlgmr.msra.gmra.mxu1 %v6372_v55  ;;  %231 = vmatpush.msrb.mxu2 %v3058_v0  ;;  %v3501_v55 = vld [vmem:[%s6364_s3] sm:$0xff] }
  0x23   :  { %211 = vmatpush.msrb.mxu1 %v3069_v2  ;;  %177 = vmatpush.msra.mxu3 %v3477_v60 }
  0x24   :  { %232 = vmatpush.msrb.mxu2 %v3063_v1  ;;  %114 = vmatpush.msra.mxu0 %v3482_v61 }
  0x25   :  { %212 = vmatpush.msrb.mxu1 %v3074_v3  ;;  %178 = vmatpush.msra.mxu3 %v3489_v62 }
  0x26   :  { %233 = vmatpush.msrb.mxu2 %v3079_v4  ;;  %115 = vmatpush.msra.mxu0 %v3496_v63 }
  0x27   :  { %213 = vmatpush.msrb.mxu1 %v3086_v5  ;;  %252 = vmatpush.msrb.mxu3 %v3133_v13 }
  0x28   :  { %234 = vmatpush.msrb.mxu2 %v3091_v6  ;;  %116 = vmatpush.msra.mxu0 %v3501_v55 }
  0x29   :  { %214 = vmatpush.msrb.mxu1 %v3098_v7  ;;  %253 = vmatpush.msrb.mxu3 %v3145_v15 }
  0x2a   :  { %235 = vmatpush.msrb.mxu2 %v3103_v8  ;;  %189 = vmatpush.msrb.mxu0 %v3150_v16 }
  0x2b   :  { %215 = vmatpush.msrb.mxu1 %v3110_v9  ;;  %254 = vmatpush.msrb.mxu3 %v3162_v18 }
  0x2c   :  { %236 = vmatpush.msrb.mxu2 %v3115_v10  ;;  %190 = vmatpush.msrb.mxu0 %v3167_v19 }
  0x2d   :  { %216 = vmatpush.msrb.mxu1 %v3122_v11  ;;  %255 = vmatpush.msrb.mxu3 %v3191_v23 }
  0x2e   :  { %237 = vmatpush.msrb.mxu2 %v3127_v12  ;;  %191 = vmatpush.msrb.mxu0 %v3179_v21 }
  0x2f   :  { %217 = vmatpush.msrb.mxu1 %v3139_v14  ;;  %256 = vmatpush.msrb.mxu3 %v3215_v27 }
  0x30   :  { %238 = vmatpush.msrb.mxu2 %v3155_v17  ;;  %192 = vmatpush.msrb.mxu0 %v3203_v25 }
  0x31   :  { %218 = vmatpush.msrb.mxu1 %v3173_v20  ;;  %257 = vmatpush.msrb.mxu3 %v3239_v31 }
  0x32   :  { %239 = vmatpush.msrb.mxu2 %v3184_v22  ;;  %193 = vmatpush.msrb.mxu0 %v3227_v29 }
  0x33   :  { %219 = vmatpush.msrb.mxu1 %v3197_v24  ;;  %258 = vmatpush.msrb.mxu3 %v3263_v35 }
  0x34   :  { %240 = vmatpush.msrb.mxu2 %v3208_v26  ;;  %194 = vmatpush.msrb.mxu0 %v3251_v33 }
  0x35   :  { %220 = vmatpush.msrb.mxu1 %v3221_v28  ;;  %259 = vmatpush.msrb.mxu3 %v3287_v39 }
  0x36   :  { %241 = vmatpush.msrb.mxu2 %v3232_v30  ;;  %195 = vmatpush.msrb.mxu0 %v3275_v37 }
  0x37   :  { %221 = vmatpush.msrb.mxu1 %v3245_v32  ;;  %260 = vmatpush.msrb.mxu3 %v3311_v43 }
  0x38   :  { %242 = vmatpush.msrb.mxu2 %v3256_v34  ;;  %196 = vmatpush.msrb.mxu0 %v3299_v41 }
  0x39   :  { %222 = vmatpush.msrb.mxu1 %v3269_v36  ;;  %261 = vmatpush.msrb.mxu3 %v3335_v47 }
  0x3a   :  { %243 = vmatpush.msrb.mxu2 %v3280_v38  ;;  %197 = vmatpush.msrb.mxu0 %v3323_v45 }
  0x3b   :  { %223 = vmatpush.msrb.mxu1 %v3293_v40  ;;  %262 = vmatpush.msrb.mxu3 %v3359_v51 }
  0x3c   :  { %244 = vmatpush.msrb.mxu2 %v3304_v42  ;;  %198 = vmatpush.msrb.mxu0 %v3347_v49 }
  0x3d   :  { %224 = vmatpush.msrb.mxu1 %v3317_v44  ;;  %263 = vmatpush.msrb.mxu3 %v3373_v53 }
  0x3e   :  { %245 = vmatpush.msrb.mxu2 %v3328_v46  ;;  %199 = vmatpush.msrb.mxu0 %v3380_v54 }
  0x3f   :  { %225 = vmatpush.msrb.mxu1 %v3341_v48  ;;  %264 = vmatpush.msrb.mxu3 %v3387_v56 }
  0x40   :  { %246 = vmatpush.msrb.mxu2 %v3352_v50  ;;  %200 = vmatpush.msrb.mxu0 %v3394_v57 }
  0x41   :  { %226 = vmatpush.msrb.mxu1 %v3365_v52  ;;  %265 = vmatpush.msrb.mxu3 %v3466_v58 }
  0x42   :  { %320 = vmatpush.msra.mxu2 %v3058_v0  ;;  %201 = vmatpush.msrb.mxu0 %v3472_v59 }
  0x43   :  { %300 = vmatpush.msra.mxu1 %v3069_v2  ;;  %266 = vmatpush.msrb.mxu3 %v3477_v60 }
  0x44   :  { %321 = vmatpush.msra.mxu2 %v3063_v1  ;;  %202 = vmatpush.msrb.mxu0 %v3482_v61 }
  0x45   :  { %301 = vmatpush.msra.mxu1 %v3074_v3  ;;  %267 = vmatpush.msrb.mxu3 %v3489_v62 }
  0x46   :  { %322 = vmatpush.msra.mxu2 %v3079_v4  ;;  %203 = vmatpush.msrb.mxu0 %v3496_v63 }
  0x47   :  { %302 = vmatpush.msra.mxu1 %v3086_v5 }
  0x48   :  { %323 = vmatpush.msra.mxu2 %v3091_v6  ;;  %204 = vmatpush.msrb.mxu0 %v3501_v55 }
  0x49   :  { %303 = vmatpush.msra.mxu1 %v3098_v7 }
  0x4a   :  { %324 = vmatpush.msra.mxu2 %v3103_v8 }
  0x4b   :  { %304 = vmatpush.msra.mxu1 %v3110_v9 }
  0x4c   :  { %325 = vmatpush.msra.mxu2 %v3115_v10 }
  0x4d   :  { %305 = vmatpush.msra.mxu1 %v3122_v11 }
  0x4e   :  { %326 = vmatpush.msra.mxu2 %v3127_v12 }
  0x4f   :  { %306 = vmatpush.msra.mxu1 %v3139_v14 }
  0x50   :  { %327 = vmatpush.msra.mxu2 %v3155_v17 }
  0x51   :  { %307 = vmatpush.msra.mxu1 %v3173_v20 }
  0x52   :  { %328 = vmatpush.msra.mxu2 %v3184_v22 }
  0x53   :  { %308 = vmatpush.msra.mxu1 %v3197_v24 }
  0x54   :  { %329 = vmatpush.msra.mxu2 %v3208_v26 }
  0x55   :  { %309 = vmatpush.msra.mxu1 %v3221_v28 }
  0x56   :  { %330 = vmatpush.msra.mxu2 %v3232_v30 }
  0x57   :  { %310 = vmatpush.msra.mxu1 %v3245_v32 }
  0x58   :  { %331 = vmatpush.msra.mxu2 %v3256_v34 }
  0x59   :  { %311 = vmatpush.msra.mxu1 %v3269_v36 }
  0x5a   :  { %332 = vmatpush.msra.mxu2 %v3280_v38 }
  0x5b   :  { %312 = vmatpush.msra.mxu1 %v3293_v40 }
  0x5c   :  { %333 = vmatpush.msra.mxu2 %v3304_v42  ;;  %v121_v42 = vld [vmem:[%s6366_s0] sm:$0xff] }
  0x5d   :  { %313 = vmatpush.msra.mxu1 %v3317_v44 }
  0x5e   :  { %334 = vmatpush.msra.mxu2 %v3328_v46 }
  0x5f   :  { %314 = vmatpush.msra.mxu1 %v3341_v48 }
  0x60   :  { %335 = vmatpush.msra.mxu2 %v3352_v50  ;;  %v6478_v50 = vmov 0.0  }
  0x61   :  { %315 = vmatpush.msra.mxu1 %v3365_v52  ;;  %117 = vmatmul.f32.vlgmr.msra.gmra.mxu0 %v6478_v50 }
  0x62   :  { %278 = vmatpush.msra.mxu0 %v3150_v16 }
  0x64   :  { %279 = vmatpush.msra.mxu0 %v3167_v19 }
  0x66   :  { %280 = vmatpush.msra.mxu0 %v3179_v21 }
  0x68   :  { %281 = vmatpush.msra.mxu0 %v3203_v25 }
  0x6a   :  { %282 = vmatpush.msra.mxu0 %v3227_v29 }
  0x6c   :  { %283 = vmatpush.msra.mxu0 %v3251_v33 }
  0x6e   :  { %284 = vmatpush.msra.mxu0 %v3275_v37 }
  0x70   :  { %285 = vmatpush.msra.mxu0 %v3299_v41 }
  0x72   :  { %286 = vmatpush.msra.mxu0 %v3323_v45 }
  0x74   :  { %287 = vmatpush.msra.mxu0 %v3347_v49 }
  0x76   :  { %288 = vmatpush.msra.mxu0 %v3380_v54 }
  0x78   :  { %289 = vmatpush.msra.mxu0 %v3394_v57 }
  0x7a   :  { %290 = vmatpush.msra.mxu0 %v3472_v59 }
  0x7c   :  { %291 = vmatpush.msra.mxu0 %v3482_v61 }
  0x7e   :  { %292 = vmatpush.msra.mxu0 %v3496_v63 }
  0x80   :  { %293 = vmatpush.msra.mxu0 %v3501_v55 }
  0x9f   :  { %v139_v50 = vpop.f32.mrf.mxu1 }
  0xa4   :  { %v159_v46 = vpop.f32.mrf.mxu2 }
  0xa5   :  { %v160_v38 = vadd.f32 %v159_v46, %v139_v50 }
  0xa7   :  { %v162_v34 = vadd.f32 %v160_v38, %v121_v42 }
  0xa9   :  { %179 = vmatmul.f32.vlgmr.msra.gmra.mxu3 %v162_v34  ;;  %2677 = vtanh.f32 %v162_v34  ;;  %v3592_v34 = vld [vmem:[%s6365_s4] ss:$0 sm:$0xff] }
  0xaa   :  { %341 = vmatpush.msra.mxu3 %v3133_v13 }
  0xac   :  { %342 = vmatpush.msra.mxu3 %v3145_v15 }
  0xae   :  { %343 = vmatpush.msra.mxu3 %v3162_v18 }
  0xaf   :  { %v2678_v46 = vpop.eup %2677 }
  0xb0   :  { %227 = vmatmul.f32.vlgmr.msrb.gmra.mxu1 %v2678_v46  ;;  %344 = vmatpush.msra.mxu3 %v3191_v23 }
  0xb1   :  { %389 = vmatpush.msrb.mxu1 %v3069_v2 }
  0xb2   :  { %345 = vmatpush.msra.mxu3 %v3215_v27 }
  0xb3   :  { %390 = vmatpush.msrb.mxu1 %v3074_v3 }
  0xb4   :  { %346 = vmatpush.msra.mxu3 %v3239_v31 }
  0xb5   :  { %391 = vmatpush.msrb.mxu1 %v3086_v5 }
  0xb6   :  { %347 = vmatpush.msra.mxu3 %v3263_v35 }
  0xb7   :  { %392 = vmatpush.msrb.mxu1 %v3098_v7 }
  0xb8   :  { %348 = vmatpush.msra.mxu3 %v3287_v39 }
  0xb9   :  { %393 = vmatpush.msrb.mxu1 %v3110_v9 }
  0xba   :  { %349 = vmatpush.msra.mxu3 %v3311_v43 }
  0xbb   :  { %394 = vmatpush.msrb.mxu1 %v3122_v11 }
  0xbc   :  { %350 = vmatpush.msra.mxu3 %v3335_v47 }
  0xbd   :  { %395 = vmatpush.msrb.mxu1 %v3139_v14 }
  0xbe   :  { %351 = vmatpush.msra.mxu3 %v3359_v51 }
  0xbf   :  { %396 = vmatpush.msrb.mxu1 %v3173_v20 }
  0xc0   :  { %352 = vmatpush.msra.mxu3 %v3373_v53 }
  0xc1   :  { %397 = vmatpush.msrb.mxu1 %v3197_v24 }
  0xc2   :  { %353 = vmatpush.msra.mxu3 %v3387_v56 }
  0xc3   :  { %398 = vmatpush.msrb.mxu1 %v3221_v28 }
  0xc4   :  { %354 = vmatpush.msra.mxu3 %v3466_v58 }
  0xc5   :  { %399 = vmatpush.msrb.mxu1 %v3245_v32 }
  0xc6   :  { %355 = vmatpush.msra.mxu3 %v3477_v60 }
  0xc7   :  { %400 = vmatpush.msrb.mxu1 %v3269_v36 }
  0xc8   :  { %356 = vmatpush.msra.mxu3 %v3489_v62 }
  0xc9   :  { %401 = vmatpush.msrb.mxu1 %v3293_v40 }
  0xcb   :  { %402 = vmatpush.msrb.mxu1 %v3317_v44 }
  0xcd   :  { %403 = vmatpush.msrb.mxu1 %v3341_v48 }
  0xcf   :  { %404 = vmatpush.msrb.mxu1 %v3365_v52 }
  0xde   :  { %v118_v38 = vpop.f32.mrf.mxu0 }
  0xdf   :  { %v119_v42 = vadd.f32 %v3592_v34, %v118_v38  ;;  %v6480_v38 = vld [vmem:[#allocation5_spill] sm:$0xff] }
 0x12c   :  { %v180_v50 = vpop.f32.mrf.mxu3 }
 0x12d   :  { %v181_v46 = vadd.f32 %v180_v50, %v119_v42  ;;  %v6481_v42 = vld [vmem:[#allocation7_spill] sm:$0xff]  ;;  %v6482_v50 = vld [vmem:[#allocation8_spill] sm:$0xff] }
 0x12f   :  { %2679 = vtanh.f32 %v181_v46  ;;  %v6483_v46 = vld [vmem:[#allocation10_spill] sm:$0xff] }
 0x135   :  { %v2680_v40 = vpop.eup %2679 }
 0x136   :  { %205 = vmatmul.f32.vlgmr.msrb.gmra.mxu0 %v2680_v40  ;;  %247 = vmatmul.f32.vlgmr.msrb.gmra.mxu2 %v2680_v40  ;;  %v6479_v40 = vld [vmem:[#allocation4_spill] sm:$0xff] }
 0x137   :  { %367 = vmatpush.msrb.mxu0 %v3150_v16  ;;  %409 = vmatpush.msrb.mxu2 %v3058_v0 }
 0x139   :  { %368 = vmatpush.msrb.mxu0 %v3167_v19  ;;  %410 = vmatpush.msrb.mxu2 %v3063_v1 }
 0x13b   :  { %369 = vmatpush.msrb.mxu0 %v3179_v21  ;;  %411 = vmatpush.msrb.mxu2 %v3079_v4 }
 0x13d   :  { %370 = vmatpush.msrb.mxu0 %v3203_v25  ;;  %412 = vmatpush.msrb.mxu2 %v3091_v6 }
 0x13f   :  { %371 = vmatpush.msrb.mxu0 %v3227_v29  ;;  %413 = vmatpush.msrb.mxu2 %v3103_v8 }
 0x141   :  { %372 = vmatpush.msrb.mxu0 %v3251_v33  ;;  %414 = vmatpush.msrb.mxu2 %v3115_v10 }
 0x143   :  { %373 = vmatpush.msrb.mxu0 %v3275_v37  ;;  %415 = vmatpush.msrb.mxu2 %v3127_v12 }
 0x145   :  { %374 = vmatpush.msrb.mxu0 %v3299_v41  ;;  %416 = vmatpush.msrb.mxu2 %v3155_v17 }
 0x147   :  { %375 = vmatpush.msrb.mxu0 %v3323_v45  ;;  %417 = vmatpush.msrb.mxu2 %v3184_v22 }
 0x149   :  { %376 = vmatpush.msrb.mxu0 %v3347_v49  ;;  %418 = vmatpush.msrb.mxu2 %v3208_v26 }
 0x14b   :  { %377 = vmatpush.msrb.mxu0 %v3380_v54  ;;  %419 = vmatpush.msrb.mxu2 %v3232_v30  ;;  %v228_v30 = vpop.f32.mrf.mxu1 }
 0x14d   :  { %378 = vmatpush.msrb.mxu0 %v3394_v57  ;;  %420 = vmatpush.msrb.mxu2 %v6479_v40  ;;  %v2647_v40 = vld [vmem:[%s6366_s0 + $0x8] sm:$0xff] }
 0x14f   :  { %379 = vmatpush.msrb.mxu0 %v3472_v59  ;;  %421 = vmatpush.msrb.mxu2 %v6480_v38 }
 0x151   :  { %380 = vmatpush.msrb.mxu0 %v3482_v61  ;;  %422 = vmatpush.msrb.mxu2 %v6481_v42 }
 0x153   :  { %381 = vmatpush.msrb.mxu0 %v3496_v63  ;;  %423 = vmatpush.msrb.mxu2 %v6482_v50 }
 0x155   :  { %382 = vmatpush.msrb.mxu0 %v3501_v55  ;;  %424 = vmatpush.msrb.mxu2 %v6483_v46 }
 0x1b9   :  { %v248_v59 = vpop.f32.mrf.mxu2 }
 0x1ba   :  { %v249_v57 = vadd.f32 %v248_v59, %v228_v30  ;;  %v6484_v30 = vld [vmem:[#allocation6_spill] sm:$0xff] }
 0x1bc   :  { %v251_v38 = vadd.f32 %v2647_v40, %v249_v57  ;;  %v206_v57 = vpop.f32.mrf.mxu0 }
 0x1bd   :  { %v207_v59 = vadd.f32 %v3592_v34, %v206_v57  ;;  %v6485_v57 = vld [vmem:[#allocation3_spill] sm:$0xff] }
 0x1be   :  { %2681 = vtanh.f32 %v251_v38  ;;  %268 = vmatmul.f32.vlgmr.msrb.gmra.mxu3 %v251_v38 }
 0x1bf   :  { %430 = vmatpush.msrb.mxu3 %v3133_v13 }
 0x1c1   :  { %431 = vmatpush.msrb.mxu3 %v3145_v15 }
 0x1c3   :  { %432 = vmatpush.msrb.mxu3 %v3162_v18 }
 0x1c4   :  { %v2682_v50 = vpop.eup %2681 }
 0x1c5   :  { %316 = vmatmul.f32.vlgmr.msra.gmra.mxu1 %v2682_v50  ;;  %433 = vmatpush.msrb.mxu3 %v3191_v23 }
 0x1c6   :  { %478 = vmatpush.msra.mxu1 %v3069_v2 }
 0x1c7   :  { %434 = vmatpush.msrb.mxu3 %v3215_v27 }
 0x1c8   :  { %479 = vmatpush.msra.mxu1 %v3074_v3 }
 0x1c9   :  { %435 = vmatpush.msrb.mxu3 %v3239_v31 }
 0x1ca   :  { %480 = vmatpush.msra.mxu1 %v3086_v5 }
 0x1cb   :  { %436 = vmatpush.msrb.mxu3 %v3263_v35 }
 0x1cc   :  { %481 = vmatpush.msra.mxu1 %v3098_v7 }
 0x1cd   :  { %437 = vmatpush.msrb.mxu3 %v3287_v39 }
 0x1ce   :  { %482 = vmatpush.msra.mxu1 %v3110_v9 }
 0x1cf   :  { %438 = vmatpush.msrb.mxu3 %v3311_v43 }
 0x1d0   :  { %483 = vmatpush.msra.mxu1 %v3122_v11 }
 0x1d1   :  { %439 = vmatpush.msrb.mxu3 %v3335_v47 }
 0x1d2   :  { %484 = vmatpush.msra.mxu1 %v3139_v14 }
 0x1d3   :  { %440 = vmatpush.msrb.mxu3 %v3359_v51 }
 0x1d4   :  { %485 = vmatpush.msra.mxu1 %v3173_v20 }
 0x1d5   :  { %441 = vmatpush.msrb.mxu3 %v3373_v53 }
 0x1d6   :  { %486 = vmatpush.msra.mxu1 %v3197_v24 }
 0x1d7   :  { %442 = vmatpush.msrb.mxu3 %v3387_v56 }
 0x1d8   :  { %487 = vmatpush.msra.mxu1 %v3221_v28 }
 0x1d9   :  { %443 = vmatpush.msrb.mxu3 %v3466_v58 }
 0x1da   :  { %488 = vmatpush.msra.mxu1 %v3245_v32 }
 0x1db   :  { %444 = vmatpush.msrb.mxu3 %v3477_v60 }
 0x1dc   :  { %489 = vmatpush.msra.mxu1 %v3269_v36 }
 0x1dd   :  { %445 = vmatpush.msrb.mxu3 %v3489_v62 }
 0x1de   :  { %490 = vmatpush.msra.mxu1 %v6484_v30 }
 0x1e0   :  { %491 = vmatpush.msra.mxu1 %v3317_v44 }
 0x1e2   :  { %492 = vmatpush.msra.mxu1 %v3341_v48 }
 0x1e4   :  { %493 = vmatpush.msra.mxu1 %v3365_v52 }
 0x241   :  { %v269_v40 = vpop.f32.mrf.mxu3 }
 0x242   :  { %v270_v38 = vadd.f32 %v269_v40, %v207_v59  ;;  %v6486_v59 = vld [vmem:[#allocation11_spill] sm:$0xff]  ;;  %v6487_v40 = vld [vmem:[#allocation4_spill] sm:$0xff] }
 0x244   :  { %2683 = vtanh.f32 %v270_v38  ;;  %v6488_v38 = vld [vmem:[#allocation12_spill] sm:$0xff] }
 0x24a   :  { %v2684_v50 = vpop.eup %2683 }
 0x24b   :  { %294 = vmatmul.f32.vlgmr.msra.gmra.mxu0 %v2684_v50  ;;  %336 = vmatmul.f32.vlgmr.msra.gmra.mxu2 %v2684_v50  ;;  %v6489_v50 = vld [vmem:[#allocation5_spill] sm:$0xff] }
 0x24c   :  { %456 = vmatpush.msra.mxu0 %v3150_v16  ;;  %498 = vmatpush.msra.mxu2 %v3058_v0 }
 0x24e   :  { %457 = vmatpush.msra.mxu0 %v3167_v19  ;;  %499 = vmatpush.msra.mxu2 %v3063_v1 }
 0x250   :  { %458 = vmatpush.msra.mxu0 %v3179_v21  ;;  %500 = vmatpush.msra.mxu2 %v3079_v4 }
 0x252   :  { %459 = vmatpush.msra.mxu0 %v3203_v25  ;;  %501 = vmatpush.msra.mxu2 %v3091_v6 }
 0x254   :  { %460 = vmatpush.msra.mxu0 %v3227_v29  ;;  %502 = vmatpush.msra.mxu2 %v3103_v8 }
 0x256   :  { %461 = vmatpush.msra.mxu0 %v3251_v33  ;;  %503 = vmatpush.msra.mxu2 %v3115_v10 }
 0x258   :  { %462 = vmatpush.msra.mxu0 %v3275_v37  ;;  %504 = vmatpush.msra.mxu2 %v3127_v12 }
 0x25a   :  { %463 = vmatpush.msra.mxu0 %v3299_v41  ;;  %505 = vmatpush.msra.mxu2 %v3155_v17 }
 0x25c   :  { %464 = vmatpush.msra.mxu0 %v3323_v45  ;;  %506 = vmatpush.msra.mxu2 %v3184_v22 }
 0x25e   :  { %465 = vmatpush.msra.mxu0 %v3347_v49  ;;  %507 = vmatpush.msra.mxu2 %v3208_v26  ;;  %v6490_v49 = vld [vmem:[#allocation8_spill] sm:$0xff] }
 0x260   :  { %466 = vmatpush.msra.mxu0 %v3380_v54  ;;  %508 = vmatpush.msra.mxu2 %v6485_v57  ;;  %v317_v57 = vpop.f32.mrf.mxu1 }
 0x262   :  { %467 = vmatpush.msra.mxu0 %v6486_v59  ;;  %509 = vmatpush.msra.mxu2 %v6487_v40  ;;  %v2648_v40 = vld [vmem:[%s6366_s0 + $0x10] sm:$0xff] }
 0x264   :  { %468 = vmatpush.msra.mxu0 %v6488_v38  ;;  %510 = vmatpush.msra.mxu2 %v6489_v50 }
 0x266   :  { %469 = vmatpush.msra.mxu0 %v3482_v61  ;;  %511 = vmatpush.msra.mxu2 %v6481_v42 }
 0x268   :  { %470 = vmatpush.msra.mxu0 %v3496_v63  ;;  %512 = vmatpush.msra.mxu2 %v6490_v49 }
 0x26a   :  { %471 = vmatpush.msra.mxu0 %v3501_v55  ;;  %513 = vmatpush.msra.mxu2 %v6483_v46 }
 0x2ce   :  { %v337_v38 = vpop.f32.mrf.mxu2 }
 0x2cf   :  { %v338_v59 = vadd.f32 %v337_v38, %v317_v57 }
 0x2d1   :  { %v340_v50 = vadd.f32 %v2648_v40, %v338_v59 }
 0x2d3   :  { %2685 = vtanh.f32 %v340_v50  ;;  %357 = vmatmul.f32.vlgmr.msra.gmra.mxu3 %v340_v50 }
 0x2d4   :  { %519 = vmatpush.msra.mxu3 %v3133_v13 }
 0x2d6   :  { %520 = vmatpush.msra.mxu3 %v3145_v15 }
 0x2d8   :  { %521 = vmatpush.msra.mxu3 %v3162_v18 }
 0x2d9   :  { %v2686_v49 = vpop.eup %2685 }
 0x2da   :  { %405 = vmatmul.f32.vlgmr.msrb.gmra.mxu1 %v2686_v49  ;;  %522 = vmatpush.msra.mxu3 %v3191_v23  ;;  %v295_v49 = vpop.f32.mrf.mxu0 }
 0x2db   :  { %567 = vmatpush.msrb.mxu1 %v3069_v2  ;;  %v296_v57 = vadd.f32 %v3592_v34, %v295_v49 }
 0x2dc   :  { %523 = vmatpush.msra.mxu3 %v3215_v27 }
 0x2dd   :  { %568 = vmatpush.msrb.mxu1 %v3074_v3 }
 0x2de   :  { %524 = vmatpush.msra.mxu3 %v3239_v31 }
 0x2df   :  { %569 = vmatpush.msrb.mxu1 %v3086_v5 }
 0x2e0   :  { %525 = vmatpush.msra.mxu3 %v3263_v35 }
 0x2e1   :  { %570 = vmatpush.msrb.mxu1 %v3098_v7 }
 0x2e2   :  { %526 = vmatpush.msra.mxu3 %v3287_v39 }
 0x2e3   :  { %571 = vmatpush.msrb.mxu1 %v3110_v9 }
 0x2e4   :  { %527 = vmatpush.msra.mxu3 %v3311_v43 }
 0x2e5   :  { %572 = vmatpush.msrb.mxu1 %v3122_v11 }
 0x2e6   :  { %528 = vmatpush.msra.mxu3 %v3335_v47 }
 0x2e7   :  { %573 = vmatpush.msrb.mxu1 %v3139_v14 }
 0x2e8   :  { %529 = vmatpush.msra.mxu3 %v3359_v51 }
 0x2e9   :  { %574 = vmatpush.msrb.mxu1 %v3173_v20 }
 0x2ea   :  { %530 = vmatpush.msra.mxu3 %v3373_v53 }
 0x2eb   :  { %575 = vmatpush.msrb.mxu1 %v3197_v24 }
 0x2ec   :  { %531 = vmatpush.msra.mxu3 %v3387_v56 }
 0x2ed   :  { %576 = vmatpush.msrb.mxu1 %v3221_v28 }
 0x2ee   :  { %532 = vmatpush.msra.mxu3 %v3466_v58 }
 0x2ef   :  { %577 = vmatpush.msrb.mxu1 %v3245_v32 }
 0x2f0   :  { %533 = vmatpush.msra.mxu3 %v3477_v60 }
 0x2f1   :  { %578 = vmatpush.msrb.mxu1 %v3269_v36 }
 0x2f2   :  { %534 = vmatpush.msra.mxu3 %v3489_v62 }
 0x2f3   :  { %579 = vmatpush.msrb.mxu1 %v6484_v30 }
 0x2f5   :  { %580 = vmatpush.msrb.mxu1 %v3317_v44 }
 0x2f7   :  { %581 = vmatpush.msrb.mxu1 %v3341_v48 }
 0x2f9   :  { %582 = vmatpush.msrb.mxu1 %v3365_v52 }
 0x356   :  { %v358_v59 = vpop.f32.mrf.mxu3 }
 0x357   :  { %v359_v40 = vadd.f32 %v358_v59, %v296_v57  ;;  %v3976_v57 = vld [vmem:[%s6362_s1 + $0x50] sm:$0xff]  ;;  %v3983_v59 = vld [vmem:[%s6362_s1 + $0x48] sm:$0xff] }
 0x359   :  { %2687 = vtanh.f32 %v359_v40  ;;  %v3990_v40 = vld [vmem:[%s6362_s1 + $0x40] sm:$0xff] }
 0x35f   :  { %v2688_v38 = vpop.eup %2687 }
 0x360   :  { %383 = vmatmul.f32.vlgmr.msrb.gmra.mxu0 %v2688_v38  ;;  %425 = vmatmul.f32.vlgmr.msrb.gmra.mxu2 %v2688_v38  ;;  %v4025_v38 = vld [vmem:[%s6362_s1 + $0x18] sm:$0xff] }
 0x361   :  { %545 = vmatpush.msrb.mxu0 %v3150_v16  ;;  %587 = vmatpush.msrb.mxu2 %v3058_v0  ;;  %v6491_v0 = vld [vmem:[#allocation9_spill] sm:$0xff]  ;;  %v406_v16 = vpop.f32.mrf.mxu1 }
 0x363   :  { %546 = vmatpush.msrb.mxu0 %v3167_v19  ;;  %588 = vmatpush.msrb.mxu2 %v3063_v1  ;;  %v6492_v1 = vld [vmem:[#allocation3_spill] sm:$0xff] }
 0x365   :  { %547 = vmatpush.msrb.mxu0 %v3179_v21  ;;  %589 = vmatpush.msrb.mxu2 %v3079_v4  ;;  %v6493_v4 = vld [vmem:[#allocation11_spill] sm:$0xff] }
 0x367   :  { %548 = vmatpush.msrb.mxu0 %v3203_v25  ;;  %590 = vmatpush.msrb.mxu2 %v3091_v6  ;;  %v6494_v6 = vld [vmem:[#allocation4_spill] sm:$0xff] }
 0x369   :  { %549 = vmatpush.msrb.mxu0 %v3227_v29  ;;  %591 = vmatpush.msrb.mxu2 %v3103_v8  ;;  %v6495_v8 = vld [vmem:[#allocation12_spill] sm:$0xff] }
 0x36b   :  { %550 = vmatpush.msrb.mxu0 %v3251_v33  ;;  %592 = vmatpush.msrb.mxu2 %v3115_v10  ;;  %v6496_v10 = vld [vmem:[#allocation5_spill] sm:$0xff] }
 0x36d   :  { %551 = vmatpush.msrb.mxu0 %v3275_v37  ;;  %593 = vmatpush.msrb.mxu2 %v3127_v12  ;;  %v6497_v12 = vld [vmem:[#allocation8_spill] sm:$0xff] }
 0x36f   :  { %552 = vmatpush.msrb.mxu0 %v3299_v41  ;;  %594 = vmatpush.msrb.mxu2 %v3155_v17  ;;  %v2649_v17 = vld [vmem:[%s6366_s0 + $0x18] sm:$0xff] }
 0x371   :  { %553 = vmatpush.msrb.mxu0 %v3323_v45  ;;  %595 = vmatpush.msrb.mxu2 %v3184_v22 }
 0x373   :  { %554 = vmatpush.msrb.mxu0 %v6491_v0  ;;  %596 = vmatpush.msrb.mxu2 %v3208_v26 }
 0x375   :  { %555 = vmatpush.msrb.mxu0 %v3380_v54  ;;  %597 = vmatpush.msrb.mxu2 %v6492_v1 }
 0x377   :  { %556 = vmatpush.msrb.mxu0 %v6493_v4  ;;  %598 = vmatpush.msrb.mxu2 %v6494_v6 }
 0x379   :  { %557 = vmatpush.msrb.mxu0 %v6495_v8  ;;  %599 = vmatpush.msrb.mxu2 %v6496_v10 }
 0x37b   :  { %558 = vmatpush.msrb.mxu0 %v3482_v61  ;;  %600 = vmatpush.msrb.mxu2 %v6481_v42 }
 0x37d   :  { %559 = vmatpush.msrb.mxu0 %v3496_v63  ;;  %601 = vmatpush.msrb.mxu2 %v6497_v12 }
 0x37f   :  { %560 = vmatpush.msrb.mxu0 %v3501_v55  ;;  %602 = vmatpush.msrb.mxu2 %v6483_v46 }
 0x3e3   :  { %v426_v22 = vpop.f32.mrf.mxu2 }
 0x3e4   :  { %v427_v26 = vadd.f32 %v426_v22, %v406_v16  ;;  %v4052_v22 = vld [vmem:[%s6364_s3 + $0x70] sm:$0xff] }
 0x3e6   :  { %v429_v50 = vadd.f32 %v2649_v17, %v427_v26  ;;  %v4059_v26 = vld [vmem:[%s6364_s3 + $0x68] sm:$0xff] }
 0x3e8   :  { %2689 = vtanh.f32 %v429_v50  ;;  %446 = vmatmul.f32.vlgmr.msrb.gmra.mxu3 %v429_v50  ;;  %v4066_v50 = vld [vmem:[%s6364_s3 + $0x60] sm:$0xff] }
 0x3e9   :  { %608 = vmatpush.msrb.mxu3 %v3133_v13  ;;  %v3808_v13 = vld [vmem:[%s6362_s1 + $0xf8] sm:$0xff] }
 0x3eb   :  { %609 = vmatpush.msrb.mxu3 %v3145_v15  ;;  %v3822_v15 = vld [vmem:[%s6362_s1 + $0xe8] sm:$0xff] }
 0x3ed   :  { %610 = vmatpush.msrb.mxu3 %v3162_v18  ;;  %v3829_v18 = vld [vmem:[%s6362_s1 + $0xe0] sm:$0xff] }
 0x3ee   :  { %v2690_v49 = vpop.eup %2689 }
 0x3ef   :  { %494 = vmatmul.f32.vlgmr.msra.gmra.mxu1 %v2690_v49  ;;  %611 = vmatpush.msrb.mxu3 %v3191_v23  ;;  %v3857_v23 = vld [vmem:[%s6362_s1 + $0xc0] sm:$0xff]  ;;  %v4073_v49 = vld [vmem:[%s6364_s3 + $0x58] sm:$0xff] }
 0x3f0   :  { %656 = vmatpush.msra.mxu1 %v3069_v2  ;;  %v384_v2 = vpop.f32.mrf.mxu0 }
 0x3f1   :  { %612 = vmatpush.msrb.mxu3 %v3215_v27 }
 0x3f2   :  { %657 = vmatpush.msra.mxu1 %v3074_v3  ;;  %v385_v3 = vadd.f32 %v3592_v34, %v384_v2  ;;  %v4080_v2 = vld [vmem:[%s6364_s3 + $0x50] sm:$0xff] }
 0x3f3   :  { %613 = vmatpush.msrb.mxu3 %v3239_v31 }
 0x3f4   :  { %658 = vmatpush.msra.mxu1 %v3086_v5 }
 0x3f5   :  { %614 = vmatpush.msrb.mxu3 %v3263_v35  ;;  %v3898_v35 = vld [vmem:[%s6363_s2 + $0x70] sm:$0xff] }
 0x3f6   :  { %659 = vmatpush.msra.mxu1 %v3098_v7 }
 0x3f7   :  { %615 = vmatpush.msrb.mxu3 %v3287_v39  ;;  %v3910_v39 = vld [vmem:[%s6363_s2 + $0x60] sm:$0xff] }
 0x3f8   :  { %660 = vmatpush.msra.mxu1 %v3110_v9 }
 0x3f9   :  { %616 = vmatpush.msrb.mxu3 %v3311_v43  ;;  %v3922_v43 = vld [vmem:[%s6363_s2 + $0x58] sm:$0xff] }
 0x3fa   :  { %661 = vmatpush.msra.mxu1 %v3122_v11  ;;  %v3802_v11 = vld [vmem:[%s6364_s3 + $0x78] sm:$0xff] }
 0x3fb   :  { %617 = vmatpush.msrb.mxu3 %v3335_v47 }
 0x3fc   :  { %662 = vmatpush.msra.mxu1 %v3139_v14  ;;  %v3815_v14 = vld [vmem:[%s6362_s1 + $0xf0] sm:$0xff] }
 0x3fd   :  { %618 = vmatpush.msrb.mxu3 %v3359_v51 }
 0x3fe   :  { %663 = vmatpush.msra.mxu1 %v3173_v20  ;;  %v3843_v20 = vld [vmem:[%s6362_s1 + $0xd0] sm:$0xff] }
 0x3ff   :  { %619 = vmatpush.msrb.mxu3 %v3373_v53 }
 0x400   :  { %664 = vmatpush.msra.mxu1 %v3197_v24  ;;  %v3864_v24 = vld [vmem:[%s6362_s1 + $0xb8] sm:$0xff] }
 0x401   :  { %620 = vmatpush.msrb.mxu3 %v3387_v56 }
 0x402   :  { %665 = vmatpush.msra.mxu1 %v3221_v28  ;;  %v2650_v28 = vld [vmem:[%s6366_s0 + $0x20] sm:$0xff] }
 0x403   :  { %621 = vmatpush.msrb.mxu3 %v3466_v58 }
 0x404   :  { %666 = vmatpush.msra.mxu1 %v3245_v32 }
 0x405   :  { %622 = vmatpush.msrb.mxu3 %v3477_v60 }
 0x406   :  { %667 = vmatpush.msra.mxu1 %v3269_v36  ;;  %v3904_v36 = vld [vmem:[%s6363_s2 + $0x68] sm:$0xff] }
 0x407   :  { %623 = vmatpush.msrb.mxu3 %v3489_v62 }
 0x408   :  { %668 = vmatpush.msra.mxu1 %v6484_v30  ;;  %v3970_v30 = vld [vmem:[%s6363_s2 + $0x38] sm:$0xff] }
 0x40a   :  { %669 = vmatpush.msra.mxu1 %v3317_v44  ;;  %v3928_v44 = vld [vmem:[%s6362_s1 + $0x70] sm:$0xff] }
 0x40c   :  { %670 = vmatpush.msra.mxu1 %v3341_v48  ;;  %v3940_v48 = vld [vmem:[%s6362_s1 + $0x68] sm:$0xff] }
 0x40e   :  { %671 = vmatpush.msra.mxu1 %v3365_v52  ;;  %v3946_v52 = vld [vmem:[%s6363_s2 + $0x48] sm:$0xff] }
 0x46b   :  { %v447_v5 = vpop.f32.mrf.mxu3 }
 0x46c   :  { %v448_v7 = vadd.f32 %v447_v5, %v385_v3  ;;  %v495_v27 = vpop.f32.mrf.mxu1  ;;  %v4087_v3 = vld [vmem:[%s6364_s3 + $0x48] sm:$0xff]  ;;  %v4094_v5 = vld [vmem:[%s6364_s3 + $0x40] sm:$0xff] }
 0x46e   :  { %2691 = vtanh.f32 %v448_v7  ;;  %v4101_v7 = vld [vmem:[%s6364_s3 + $0x38] sm:$0xff] }
 0x474   :  { %v2692_v9 = vpop.eup %2691 }
 0x475   :  { %472 = vmatmul.f32.vlgmr.msra.gmra.mxu0 %v2692_v9  ;;  %514 = vmatmul.f32.vlgmr.msra.gmra.mxu2 %v2692_v9  ;;  %v4108_v9 = vld [vmem:[%s6364_s3 + $0x30] sm:$0xff] }
 0x476   :  { %634 = vmatpush.msra.mxu0 %v3802_v11  ;;  %676 = vmatpush.msra.mxu2 %v3808_v13 }
 0x478   :  { %635 = vmatpush.msra.mxu0 %v3167_v19  ;;  %677 = vmatpush.msra.mxu2 %v3815_v14  ;;  %v3836_v19 = vld [vmem:[%s6362_s1 + $0xd8] sm:$0xff] }
 0x47a   :  { %636 = vmatpush.msra.mxu0 %v3179_v21  ;;  %678 = vmatpush.msra.mxu2 %v3822_v15  ;;  %v3850_v21 = vld [vmem:[%s6362_s1 + $0xc8] sm:$0xff] }
 0x47c   :  { %637 = vmatpush.msra.mxu0 %v3203_v25  ;;  %679 = vmatpush.msra.mxu2 %v3829_v18  ;;  %v3871_v25 = vld [vmem:[%s6362_s1 + $0xb0] sm:$0xff] }
 0x47e   :  { %638 = vmatpush.msra.mxu0 %v3227_v29  ;;  %680 = vmatpush.msra.mxu2 %v3836_v19 }
 0x480   :  { %639 = vmatpush.msra.mxu0 %v3251_v33  ;;  %681 = vmatpush.msra.mxu2 %v3843_v20  ;;  %v3892_v33 = vld [vmem:[%s6363_s2 + $0x78] sm:$0xff] }
 0x482   :  { %640 = vmatpush.msra.mxu0 %v3275_v37  ;;  %682 = vmatpush.msra.mxu2 %v3850_v21 }
 0x484   :  { %641 = vmatpush.msra.mxu0 %v3299_v41  ;;  %683 = vmatpush.msra.mxu2 %v3857_v23  ;;  %v3916_v41 = vld [vmem:[%s6362_s1 + $0x78] sm:$0xff] }
 0x486   :  { %642 = vmatpush.msra.mxu0 %v3323_v45  ;;  %684 = vmatpush.msra.mxu2 %v3864_v24  ;;  %v3934_v45 = vld [vmem:[%s6363_s2 + $0x50] sm:$0xff] }
 0x488   :  { %643 = vmatpush.msra.mxu0 %v6491_v0  ;;  %685 = vmatpush.msra.mxu2 %v3871_v25  ;;  %v4031_v0 = vld [vmem:[%s6362_s1 + $0x10] sm:$0xff] }
 0x48a   :  { %644 = vmatpush.msra.mxu0 %v3380_v54  ;;  %686 = vmatpush.msra.mxu2 %v6492_v1  ;;  %v3952_v54 = vld [vmem:[%s6362_s1 + $0x60] sm:$0xff]  ;;  %v4037_v1 = vld [vmem:[%s6362_s1 + $0x8] sm:$0xff] }
 0x48c   :  { %645 = vmatpush.msra.mxu0 %v6493_v4  ;;  %687 = vmatpush.msra.mxu2 %v6494_v6  ;;  %v4043_v4 = vld [vmem:[%s6362_s1] sm:$0xff] }
 0x48e   :  { %646 = vmatpush.msra.mxu0 %v6495_v8  ;;  %688 = vmatpush.msra.mxu2 %v6496_v10 }
 0x490   :  { %647 = vmatpush.msra.mxu0 %v3482_v61  ;;  %689 = vmatpush.msra.mxu2 %v6481_v42  ;;  %v3958_v42 = vld [vmem:[%s6363_s2 + $0x40] sm:$0xff] }
 0x492   :  { %648 = vmatpush.msra.mxu0 %v3496_v63  ;;  %690 = vmatpush.msra.mxu2 %v6497_v12 }
 0x494   :  { %649 = vmatpush.msra.mxu0 %v3501_v55  ;;  %691 = vmatpush.msra.mxu2 %v6483_v46  ;;  %v3964_v46 = vld [vmem:[%s6362_s1 + $0x58] sm:$0xff] }
 0x4f2   :  { %v473_v6 = vpop.f32.mrf.mxu0 }
 0x4f3   :  { %v474_v10 = vadd.f32 %v3592_v34, %v473_v6 }
 0x4f8   :  { %v515_v29 = vpop.f32.mrf.mxu2 }
 0x4f9   :  { %v516_v31 = vadd.f32 %v515_v29, %v495_v27  ;;  %v4115_v27 = vld [vmem:[%s6364_s3 + $0x28] sm:$0xff]  ;;  %v4127_v29 = vld [vmem:[%s6364_s3 + $0x20] sm:$0xff] }
 0x4fa   :  { %6500 = vst [vmem:[#allocation6_spill] sm:$0xff] %v4127_v29 }
 0x4fb   :  { %v518_v32 = vadd.f32 %v2650_v28, %v516_v31  ;;  %v4121_v28 = vld [vmem:[%s6362_s1 + $0xa8] sm:$0xff]  ;;  %v4133_v31 = vld [vmem:[%s6362_s1 + $0xa0] sm:$0xff] }
 0x4fc   :  { %6501 = vst [vmem:[#allocation9_spill] sm:$0xff] %v4133_v31 }
 0x4fd   :  { %2693 = vtanh.f32 %v518_v32  ;;  %535 = vmatmul.f32.vlgmr.msra.gmra.mxu3 %v518_v32  ;;  %v4140_v32 = vld [vmem:[%s6362_s1 + $0x98] sm:$0xff] }
 0x4fe   :  { %697 = vmatpush.msra.mxu3 %v3892_v33  ;;  %6502 = vst [vmem:[#allocation3_spill] sm:$0xff] %v4140_v32 }
 0x500   :  { %698 = vmatpush.msra.mxu3 %v3898_v35 }
 0x502   :  { %699 = vmatpush.msra.mxu3 %v3904_v36 }
 0x503   :  { %v2694_v37 = vpop.eup %2693 }
 0x504   :  { %583 = vmatmul.f32.vlgmr.msrb.gmra.mxu1 %v2694_v37  ;;  %700 = vmatpush.msra.mxu3 %v3910_v39  ;;  %v4147_v37 = vld [vmem:[%s6362_s1 + $0x90] sm:$0xff] }
 0x505   :  { %745 = vmatpush.msrb.mxu1 %v3916_v41  ;;  %6503 = vst [vmem:[#allocation11_spill] sm:$0xff] %v4147_v37 }
 0x506   :  { %701 = vmatpush.msra.mxu3 %v3922_v43 }
 0x507   :  { %746 = vmatpush.msrb.mxu1 %v3928_v44 }
 0x508   :  { %702 = vmatpush.msra.mxu3 %v3934_v45 }
 0x509   :  { %747 = vmatpush.msrb.mxu1 %v3940_v48 }
 0x50a   :  { %703 = vmatpush.msra.mxu3 %v3946_v52 }
 0x50b   :  { %748 = vmatpush.msrb.mxu1 %v3952_v54 }
 0x50c   :  { %704 = vmatpush.msra.mxu3 %v3958_v42 }
 0x50d   :  { %749 = vmatpush.msrb.mxu1 %v3964_v46 }
 0x50e   :  { %705 = vmatpush.msra.mxu3 %v3970_v30 }
 0x50f   :  { %750 = vmatpush.msrb.mxu1 %v3976_v57 }
 0x510   :  { %706 = vmatpush.msra.mxu3 %v3335_v47  ;;  %v3997_v47 = vld [vmem:[%s6362_s1 + $0x38] sm:$0xff] }
 0x511   :  { %751 = vmatpush.msrb.mxu1 %v3983_v59 }
 0x512   :  { %707 = vmatpush.msra.mxu3 %v3359_v51  ;;  %v4004_v51 = vld [vmem:[%s6362_s1 + $0x30] sm:$0xff] }
 0x513   :  { %752 = vmatpush.msrb.mxu1 %v3990_v40 }
 0x514   :  { %708 = vmatpush.msra.mxu3 %v3373_v53  ;;  %v4011_v53 = vld [vmem:[%s6362_s1 + $0x28] sm:$0xff] }
 0x515   :  { %753 = vmatpush.msrb.mxu1 %v3997_v47  ;;  %6498 = vst [vmem:[#allocation7_spill] sm:$0xff] %v4011_v53 }
 0x516   :  { %709 = vmatpush.msra.mxu3 %v3387_v56  ;;  %v4018_v56 = vld [vmem:[%s6362_s1 + $0x20] sm:$0xff] }
 0x517   :  { %754 = vmatpush.msrb.mxu1 %v4004_v51  ;;  %6499 = vst [vmem:[#allocation10_spill] sm:$0xff] %v4018_v56 }
 0x518   :  { %710 = vmatpush.msra.mxu3 %v3466_v58 }
 0x519   :  { %755 = vmatpush.msrb.mxu1 %v4011_v53 }
 0x51a   :  { %711 = vmatpush.msra.mxu3 %v3477_v60 }
 0x51b   :  { %756 = vmatpush.msrb.mxu1 %v4018_v56 }
 0x51c   :  { %712 = vmatpush.msra.mxu3 %v3489_v62 }
 0x51d   :  { %757 = vmatpush.msrb.mxu1 %v4025_v38 }
 0x51f   :  { %758 = vmatpush.msrb.mxu1 %v4031_v0 }
 0x521   :  { %759 = vmatpush.msrb.mxu1 %v4037_v1 }
 0x523   :  { %760 = vmatpush.msrb.mxu1 %v4043_v4 }
 0x580   :  { %v536_v12 = vpop.f32.mrf.mxu3 }
 0x581   :  { %v537_v16 = vadd.f32 %v536_v12, %v474_v10  ;;  %v584_v6 = vpop.f32.mrf.mxu1 }
 0x583   :  { %2695 = vtanh.f32 %v537_v16 }
 0x589   :  { %v2696_v17 = vpop.eup %2695 }
 0x58a   :  { %561 = vmatmul.f32.vlgmr.msrb.gmra.mxu0 %v2696_v17  ;;  %603 = vmatmul.f32.vlgmr.msrb.gmra.mxu2 %v2696_v17  ;;  %v4185_v17 = vld [vmem:[%s6363_s2 + $0x30] sm:$0xff] }
 0x58b   :  { %723 = vmatpush.msrb.mxu0 %v3802_v11  ;;  %765 = vmatpush.msrb.mxu2 %v3808_v13 }
 0x58d   :  { %724 = vmatpush.msrb.mxu0 %v4052_v22  ;;  %766 = vmatpush.msrb.mxu2 %v3815_v14 }
 0x58f   :  { %725 = vmatpush.msrb.mxu0 %v4059_v26  ;;  %767 = vmatpush.msrb.mxu2 %v3822_v15 }
 0x591   :  { %726 = vmatpush.msrb.mxu0 %v4066_v50  ;;  %768 = vmatpush.msrb.mxu2 %v3829_v18 }
 0x593   :  { %727 = vmatpush.msrb.mxu0 %v4073_v49  ;;  %769 = vmatpush.msrb.mxu2 %v3836_v19 }
 0x595   :  { %728 = vmatpush.msrb.mxu0 %v4080_v2  ;;  %770 = vmatpush.msrb.mxu2 %v3843_v20 }
 0x597   :  { %729 = vmatpush.msrb.mxu0 %v4087_v3  ;;  %771 = vmatpush.msrb.mxu2 %v3850_v21 }
 0x599   :  { %730 = vmatpush.msrb.mxu0 %v4094_v5  ;;  %772 = vmatpush.msrb.mxu2 %v3857_v23 }
 0x59b   :  { %731 = vmatpush.msrb.mxu0 %v4101_v7  ;;  %773 = vmatpush.msrb.mxu2 %v3864_v24 }
 0x59d   :  { %732 = vmatpush.msrb.mxu0 %v4108_v9  ;;  %774 = vmatpush.msrb.mxu2 %v3871_v25 }
 0x59f   :  { %733 = vmatpush.msrb.mxu0 %v4115_v27  ;;  %775 = vmatpush.msrb.mxu2 %v4121_v28 }
 0x5a1   :  { %734 = vmatpush.msrb.mxu0 %v4127_v29  ;;  %776 = vmatpush.msrb.mxu2 %v4133_v31 }
 0x5a3   :  { %735 = vmatpush.msrb.mxu0 %v6495_v8  ;;  %777 = vmatpush.msrb.mxu2 %v4140_v32  ;;  %v4154_v8 = vld [vmem:[%s6362_s1 + $0x88] sm:$0xff] }
 0x5a4   :  { %6504 = vst [vmem:[#allocation4_spill] sm:$0xff] %v4154_v8 }
 0x5a5   :  { %736 = vmatpush.msrb.mxu0 %v3482_v61  ;;  %778 = vmatpush.msrb.mxu2 %v4147_v37  ;;  %v4161_v61 = vld [vmem:[%s6362_s1 + $0x80] sm:$0xff] }
 0x5a7   :  { %737 = vmatpush.msrb.mxu0 %v3496_v63  ;;  %779 = vmatpush.msrb.mxu2 %v4154_v8  ;;  %v2651_v63 = vld [vmem:[%s6366_s0 + $0x28] sm:$0xff] }
 0x5a9   :  { %738 = vmatpush.msrb.mxu0 %v3501_v55  ;;  %780 = vmatpush.msrb.mxu2 %v4161_v61 }
 0x60d   :  { %v604_v10 = vpop.f32.mrf.mxu2 }
 0x60e   :  { %v605_v12 = vadd.f32 %v604_v10, %v584_v6  ;;  %v4192_v6 = vld [vmem:[%s6363_s2 + $0x28] sm:$0xff]  ;;  %v4206_v10 = vld [vmem:[%s6363_s2 + $0x18] sm:$0xff] }
 0x610   :  { %v607_v16 = vadd.f32 %v2651_v63, %v605_v12  ;;  %v4199_v63 = vld [vmem:[%s6363_s2 + $0x20] sm:$0xff]  ;;  %v562_v12 = vpop.f32.mrf.mxu0 }
 0x612   :  { %2697 = vtanh.f32 %v607_v16  ;;  %624 = vmatmul.f32.vlgmr.msrb.gmra.mxu3 %v607_v16  ;;  %v563_v16 = vadd.f32 %v3592_v34, %v562_v12  ;;  %v4268_v12 = vld [vmem:[%s6364_s3] sm:$0xff] }
 0x613   :  { %786 = vmatpush.msrb.mxu3 %v3892_v33 }
 0x615   :  { %787 = vmatpush.msrb.mxu3 %v3898_v35 }
 0x617   :  { %788 = vmatpush.msrb.mxu3 %v3904_v36 }
 0x618   :  { %v2698_v55 = vpop.eup %2697 }
 0x619   :  { %672 = vmatmul.f32.vlgmr.msra.gmra.mxu1 %v2698_v55  ;;  %789 = vmatpush.msrb.mxu3 %v3910_v39 }
 0x61a   :  { %834 = vmatpush.msra.mxu1 %v3916_v41 }
 0x61b   :  { %790 = vmatpush.msrb.mxu3 %v3922_v43 }
 0x61c   :  { %835 = vmatpush.msra.mxu1 %v3928_v44 }
 0x61d   :  { %791 = vmatpush.msrb.mxu3 %v3934_v45 }
 0x61e   :  { %836 = vmatpush.msra.mxu1 %v3940_v48 }
 0x61f   :  { %792 = vmatpush.msrb.mxu3 %v3946_v52 }
 0x620   :  { %837 = vmatpush.msra.mxu1 %v3952_v54 }
 0x621   :  { %793 = vmatpush.msrb.mxu3 %v3958_v42 }
 0x622   :  { %838 = vmatpush.msra.mxu1 %v3964_v46 }
 0x623   :  { %794 = vmatpush.msrb.mxu3 %v3970_v30 }
 0x624   :  { %839 = vmatpush.msra.mxu1 %v3976_v57 }
 0x625   :  { %795 = vmatpush.msrb.mxu3 %v4185_v17 }
 0x626   :  { %840 = vmatpush.msra.mxu1 %v3983_v59 }
 0x627   :  { %796 = vmatpush.msrb.mxu3 %v4192_v6 }
 0x628   :  { %841 = vmatpush.msra.mxu1 %v3990_v40 }
 0x629   :  { %797 = vmatpush.msrb.mxu3 %v4199_v63 }
 0x62a   :  { %842 = vmatpush.msra.mxu1 %v3997_v47 }
 0x62b   :  { %798 = vmatpush.msrb.mxu3 %v4206_v10 }
 0x62c   :  { %843 = vmatpush.msra.mxu1 %v4004_v51 }
 0x62d   :  { %799 = vmatpush.msrb.mxu3 %v3466_v58 }
 0x62e   :  { %844 = vmatpush.msra.mxu1 %v4011_v53 }
 0x62f   :  { %800 = vmatpush.msrb.mxu3 %v3477_v60  ;;  %v4247_v60 = vld [vmem:[%s6364_s3 + $0x18] sm:$0xff] }
 0x630   :  { %845 = vmatpush.msra.mxu1 %v4018_v56  ;;  %6505 = vst [vmem:[#allocation12_spill] sm:$0xff] %v4247_v60 }
 0x631   :  { %801 = vmatpush.msrb.mxu3 %v3489_v62  ;;  %v4254_v62 = vld [vmem:[%s6364_s3 + $0x10] sm:$0xff] }
 0x632   :  { %846 = vmatpush.msra.mxu1 %v4025_v38  ;;  %6506 = vst [vmem:[#allocation5_spill] sm:$0xff] %v4254_v62 }
 0x634   :  { %847 = vmatpush.msra.mxu1 %v4031_v0 }
 0x636   :  { %848 = vmatpush.msra.mxu1 %v4037_v1 }
 0x638   :  { %849 = vmatpush.msra.mxu1 %v4043_v4 }
 0x695   :  { %v625_v58 = vpop.f32.mrf.mxu3 }
 0x696   :  { %v626_v55 = vadd.f32 %v625_v58, %v563_v16  ;;  %v673_v16 = vpop.f32.mrf.mxu1  ;;  %v2652_v58 = vld [vmem:[%s6366_s0 + $0x30] sm:$0xff] }
 0x698   :  { %2699 = vtanh.f32 %v626_v55 }
 0x69e   :  { %v2700_v53 = vpop.eup %2699 }
 0x69f   :  { %650 = vmatmul.f32.vlgmr.msra.gmra.mxu0 %v2700_v53  ;;  %692 = vmatmul.f32.vlgmr.msra.gmra.mxu2 %v2700_v53  ;;  %v4261_v53 = vld [vmem:[%s6364_s3 + $0x8] sm:$0xff] }
 0x6a0   :  { %812 = vmatpush.msra.mxu0 %v3802_v11  ;;  %854 = vmatpush.msra.mxu2 %v3808_v13 }
 0x6a2   :  { %813 = vmatpush.msra.mxu0 %v4052_v22  ;;  %855 = vmatpush.msra.mxu2 %v3815_v14 }
 0x6a4   :  { %814 = vmatpush.msra.mxu0 %v4059_v26  ;;  %856 = vmatpush.msra.mxu2 %v3822_v15 }
 0x6a6   :  { %815 = vmatpush.msra.mxu0 %v4066_v50  ;;  %857 = vmatpush.msra.mxu2 %v3829_v18 }
 0x6a8   :  { %816 = vmatpush.msra.mxu0 %v4073_v49  ;;  %858 = vmatpush.msra.mxu2 %v3836_v19 }
 0x6aa   :  { %817 = vmatpush.msra.mxu0 %v4080_v2  ;;  %859 = vmatpush.msra.mxu2 %v3843_v20 }
 0x6ac   :  { %818 = vmatpush.msra.mxu0 %v4087_v3  ;;  %860 = vmatpush.msra.mxu2 %v3850_v21 }
 0x6ae   :  { %819 = vmatpush.msra.mxu0 %v4094_v5  ;;  %861 = vmatpush.msra.mxu2 %v3857_v23 }
 0x6b0   :  { %820 = vmatpush.msra.mxu0 %v4101_v7  ;;  %862 = vmatpush.msra.mxu2 %v3864_v24 }
 0x6b2   :  { %821 = vmatpush.msra.mxu0 %v4108_v9  ;;  %863 = vmatpush.msra.mxu2 %v3871_v25 }
 0x6b4   :  { %822 = vmatpush.msra.mxu0 %v4115_v27  ;;  %864 = vmatpush.msra.mxu2 %v4121_v28 }
 0x6b6   :  { %823 = vmatpush.msra.mxu0 %v4127_v29  ;;  %865 = vmatpush.msra.mxu2 %v4133_v31 }
 0x6b8   :  { %824 = vmatpush.msra.mxu0 %v4247_v60  ;;  %866 = vmatpush.msra.mxu2 %v4140_v32 }
 0x6ba   :  { %825 = vmatpush.msra.mxu0 %v4254_v62  ;;  %867 = vmatpush.msra.mxu2 %v4147_v37 }
 0x6bc   :  { %826 = vmatpush.msra.mxu0 %v4261_v53  ;;  %868 = vmatpush.msra.mxu2 %v4154_v8 }
 0x6be   :  { %827 = vmatpush.msra.mxu0 %v4268_v12  ;;  %869 = vmatpush.msra.mxu2 %v4161_v61 }
 0x722   :  { %v693_v55 = vpop.f32.mrf.mxu2 }
 0x723   :  { %v694_v37 = vadd.f32 %v693_v55, %v673_v16  ;;  %v4315_v16 = vld [vmem:[%s6363_s2] sm:$0xff] }
 0x724   :  { %6510 = vst [vmem:[#allocation14_spill] sm:$0xff] %v4315_v16 }
 0x725   :  { %v696_v62 = vadd.f32 %v2652_v58, %v694_v37  ;;  %v4301_v37 = vld [vmem:[%s6363_s2 + $0x10] sm:$0xff]  ;;  %v651_v58 = vpop.f32.mrf.mxu0 }
 0x726   :  { %6507 = vst [vmem:[#allocation8_spill] sm:$0xff] %v4301_v37  ;;  %v652_v55 = vadd.f32 %v3592_v34, %v651_v58  ;;  %v6511_v34 = vld [vmem:[#allocation5_spill] sm:$0xff]  ;;  %v2653_v58 = vld [vmem:[%s6366_s0 + $0x38] sm:$0xff] }
 0x727   :  { %2701 = vtanh.f32 %v696_v62  ;;  %713 = vmatmul.f32.vlgmr.msra.gmra.mxu3 %v696_v62  ;;  %v4308_v62 = vld [vmem:[%s6363_s2 + $0x8] sm:$0xff] }
 0x728   :  { %875 = vmatpush.msra.mxu3 %v3892_v33  ;;  %6509 = vst [vmem:[#allocation13_spill] sm:$0xff] %v4308_v62 }
 0x72a   :  { %876 = vmatpush.msra.mxu3 %v3898_v35 }
 0x72c   :  { %877 = vmatpush.msra.mxu3 %v3904_v36 }
 0x72d   :  { %v2702_v8 = vpop.eup %2701 }
 0x72e   :  { %761 = vmatmul.f32.vlgmr.msrb.gmra.mxu1 %v2702_v8  ;;  %878 = vmatpush.msra.mxu3 %v3910_v39  ;;  %v6508_v8 = vld [vmem:[#allocation7_spill] sm:$0xff] }
 0x72f   :  { %923 = vmatpush.msrb.mxu1 %v3916_v41 }
 0x730   :  { %879 = vmatpush.msra.mxu3 %v3922_v43 }
 0x731   :  { %924 = vmatpush.msrb.mxu1 %v3928_v44 }
 0x732   :  { %880 = vmatpush.msra.mxu3 %v3934_v45 }
 0x733   :  { %925 = vmatpush.msrb.mxu1 %v3940_v48 }
 0x734   :  { %881 = vmatpush.msra.mxu3 %v3946_v52 }
 0x735   :  { %926 = vmatpush.msrb.mxu1 %v3952_v54 }
 0x736   :  { %882 = vmatpush.msra.mxu3 %v3958_v42 }
 0x737   :  { %927 = vmatpush.msrb.mxu1 %v3964_v46 }
 0x738   :  { %883 = vmatpush.msra.mxu3 %v3970_v30 }
 0x739   :  { %928 = vmatpush.msrb.mxu1 %v3976_v57 }
 0x73a   :  { %884 = vmatpush.msra.mxu3 %v4185_v17 }
 0x73b   :  { %929 = vmatpush.msrb.mxu1 %v3983_v59 }
 0x73c   :  { %885 = vmatpush.msra.mxu3 %v4192_v6 }
 0x73d   :  { %930 = vmatpush.msrb.mxu1 %v3990_v40 }
 0x73e   :  { %886 = vmatpush.msra.mxu3 %v4199_v63 }
 0x73f   :  { %931 = vmatpush.msrb.mxu1 %v3997_v47 }
 0x740   :  { %887 = vmatpush.msra.mxu3 %v4206_v10 }
 0x741   :  { %932 = vmatpush.msrb.mxu1 %v4004_v51 }
 0x742   :  { %888 = vmatpush.msra.mxu3 %v4301_v37 }
 0x743   :  { %933 = vmatpush.msrb.mxu1 %v6508_v8 }
 0x744   :  { %889 = vmatpush.msra.mxu3 %v4308_v62 }
 0x745   :  { %934 = vmatpush.msrb.mxu1 %v4018_v56 }
 0x746   :  { %890 = vmatpush.msra.mxu3 %v4315_v16 }
 0x747   :  { %935 = vmatpush.msrb.mxu1 %v4025_v38 }
 0x749   :  { %936 = vmatpush.msrb.mxu1 %v4031_v0 }
 0x74b   :  { %937 = vmatpush.msrb.mxu1 %v4037_v1 }
 0x74d   :  { %938 = vmatpush.msrb.mxu1 %v4043_v4 }
 0x7aa   :  { %v714_v62 = vpop.f32.mrf.mxu3 }
 0x7ab   :  { %v715_v56 = vadd.f32 %v714_v62, %v652_v55  ;;  %v762_v62 = vpop.f32.mrf.mxu1 }
 0x7ad   :  { %2703 = vtanh.f32 %v715_v56  ;;  %v6512_v56 = vld [vmem:[#allocation11_spill] sm:$0xff] }
 0x7b3   :  { %v2704_v8 = vpop.eup %2703 }
 0x7b4   :  { %739 = vmatmul.f32.vlgmr.msrb.gmra.mxu0 %v2704_v8  ;;  %781 = vmatmul.f32.vlgmr.msrb.gmra.mxu2 %v2704_v8  ;;  %v6513_v8 = vld [vmem:[#allocation4_spill] sm:$0xff] }
 0x7b5   :  { %901 = vmatpush.msrb.mxu0 %v3802_v11  ;;  %943 = vmatpush.msrb.mxu2 %v3808_v13 }
 0x7b7   :  { %902 = vmatpush.msrb.mxu0 %v4052_v22  ;;  %944 = vmatpush.msrb.mxu2 %v3815_v14 }
 0x7b9   :  { %903 = vmatpush.msrb.mxu0 %v4059_v26  ;;  %945 = vmatpush.msrb.mxu2 %v3822_v15 }
 0x7bb   :  { %904 = vmatpush.msrb.mxu0 %v4066_v50  ;;  %946 = vmatpush.msrb.mxu2 %v3829_v18 }
 0x7bd   :  { %905 = vmatpush.msrb.mxu0 %v4073_v49  ;;  %947 = vmatpush.msrb.mxu2 %v3836_v19 }
 0x7bf   :  { %906 = vmatpush.msrb.mxu0 %v4080_v2  ;;  %948 = vmatpush.msrb.mxu2 %v3843_v20 }
 0x7c1   :  { %907 = vmatpush.msrb.mxu0 %v4087_v3  ;;  %949 = vmatpush.msrb.mxu2 %v3850_v21 }
 0x7c3   :  { %908 = vmatpush.msrb.mxu0 %v4094_v5  ;;  %950 = vmatpush.msrb.mxu2 %v3857_v23 }
 0x7c5   :  { %909 = vmatpush.msrb.mxu0 %v4101_v7  ;;  %951 = vmatpush.msrb.mxu2 %v3864_v24 }
 0x7c7   :  { %910 = vmatpush.msrb.mxu0 %v4108_v9  ;;  %952 = vmatpush.msrb.mxu2 %v3871_v25 }
 0x7c9   :  { %911 = vmatpush.msrb.mxu0 %v4115_v27  ;;  %953 = vmatpush.msrb.mxu2 %v4121_v28 }
 0x7cb   :  { %912 = vmatpush.msrb.mxu0 %v4127_v29  ;;  %954 = vmatpush.msrb.mxu2 %v4133_v31 }
 0x7cd   :  { %913 = vmatpush.msrb.mxu0 %v4247_v60  ;;  %955 = vmatpush.msrb.mxu2 %v4140_v32 }
 0x7cf   :  { %914 = vmatpush.msrb.mxu0 %v6511_v34  ;;  %956 = vmatpush.msrb.mxu2 %v6512_v56 }
 0x7d1   :  { %915 = vmatpush.msrb.mxu0 %v4261_v53  ;;  %957 = vmatpush.msrb.mxu2 %v6513_v8 }
 0x7d3   :  { %916 = vmatpush.msrb.mxu0 %v4268_v12  ;;  %958 = vmatpush.msrb.mxu2 %v4161_v61 }
 0x837   :  { %v782_v55 = vpop.f32.mrf.mxu2 }
 0x838   :  { %v783_v60 = vadd.f32 %v782_v55, %v762_v62  ;;  %v740_v62 = vpop.f32.mrf.mxu0 }
 0x83a   :  { %v785_v32 = vadd.f32 %v2653_v58, %v783_v60  ;;  %v6515_v60 = vld [vmem:[#allocation13_spill] sm:$0xff]  ;;  %v4393_v58 = vld [vmem:[%s6365_s4] ss:$0 sm:$0xff] }
 0x83b   :  { %v741_v55 = vadd.f32 %v4393_v58, %v740_v62 }
 0x83c   :  { %2705 = vtanh.f32 %v785_v32  ;;  %802 = vmatmul.f32.vlgmr.msrb.gmra.mxu3 %v785_v32  ;;  %v6514_v32 = vld [vmem:[#allocation7_spill] sm:$0xff] }
 0x83d   :  { %964 = vmatpush.msrb.mxu3 %v3892_v33 }
 0x83f   :  { %965 = vmatpush.msrb.mxu3 %v3898_v35 }
 0x841   :  { %966 = vmatpush.msrb.mxu3 %v3904_v36 }
 0x842   :  { %v2706_v8 = vpop.eup %2705 }
 0x843   :  { %850 = vmatmul.f32.vlgmr.msra.gmra.mxu1 %v2706_v8  ;;  %967 = vmatpush.msrb.mxu3 %v3910_v39  ;;  %v6516_v8 = vld [vmem:[#allocation10_spill] sm:$0xff] }
 0x844   :  { %1012 = vmatpush.msra.mxu1 %v3916_v41 }
 0x845   :  { %968 = vmatpush.msrb.mxu3 %v3922_v43 }
 0x846   :  { %1013 = vmatpush.msra.mxu1 %v3928_v44 }
 0x847   :  { %969 = vmatpush.msrb.mxu3 %v3934_v45 }
 0x848   :  { %1014 = vmatpush.msra.mxu1 %v3940_v48 }
 0x849   :  { %970 = vmatpush.msrb.mxu3 %v3946_v52 }
 0x84a   :  { %1015 = vmatpush.msra.mxu1 %v3952_v54 }
 0x84b   :  { %971 = vmatpush.msrb.mxu3 %v3958_v42 }
 0x84c   :  { %1016 = vmatpush.msra.mxu1 %v3964_v46 }
 0x84d   :  { %972 = vmatpush.msrb.mxu3 %v3970_v30 }
 0x84e   :  { %1017 = vmatpush.msra.mxu1 %v3976_v57 }
 0x84f   :  { %973 = vmatpush.msrb.mxu3 %v4185_v17 }
 0x850   :  { %1018 = vmatpush.msra.mxu1 %v3983_v59 }
 0x851   :  { %974 = vmatpush.msrb.mxu3 %v4192_v6 }
 0x852   :  { %1019 = vmatpush.msra.mxu1 %v3990_v40 }
 0x853   :  { %975 = vmatpush.msrb.mxu3 %v4199_v63 }
 0x854   :  { %1020 = vmatpush.msra.mxu1 %v3997_v47 }
 0x855   :  { %976 = vmatpush.msrb.mxu3 %v4206_v10 }
 0x856   :  { %1021 = vmatpush.msra.mxu1 %v4004_v51 }
 0x857   :  { %977 = vmatpush.msrb.mxu3 %v4301_v37 }
 0x858   :  { %1022 = vmatpush.msra.mxu1 %v6514_v32 }
 0x859   :  { %978 = vmatpush.msrb.mxu3 %v6515_v60 }
 0x85a   :  { %1023 = vmatpush.msra.mxu1 %v6516_v8 }
 0x85b   :  { %979 = vmatpush.msrb.mxu3 %v4315_v16 }
 0x85c   :  { %1024 = vmatpush.msra.mxu1 %v4025_v38 }
 0x85e   :  { %1025 = vmatpush.msra.mxu1 %v4031_v0 }
 0x860   :  { %1026 = vmatpush.msra.mxu1 %v4037_v1 }
 0x862   :  { %1027 = vmatpush.msra.mxu1 %v4043_v4 }
 0x8bf   :  { %v803_v60 = vpop.f32.mrf.mxu3 }
 0x8c0   :  { %v804_v8 = vadd.f32 %v803_v60, %v741_v55  ;;  %v6518_v60 = vld [vmem:[#allocation3_spill] sm:$0xff]  ;;  %v851_v62 = vpop.f32.mrf.mxu1 }
 0x8c1   :  { %v2654_v55 = vld [vmem:[%s6366_s0 + $0x40] sm:$0xff] }
 0x8c2   :  { %2707 = vtanh.f32 %v804_v8  ;;  %v6519_v8 = vld [vmem:[#allocation4_spill] sm:$0xff] }
 0x8c8   :  { %v2708_v16 = vpop.eup %2707 }
 0x8c9   :  { %828 = vmatmul.f32.vlgmr.msra.gmra.mxu0 %v2708_v16  ;;  %870 = vmatmul.f32.vlgmr.msra.gmra.mxu2 %v2708_v16  ;;  %v6517_v16 = vld [vmem:[#allocation12_spill] sm:$0xff] }
 0x8ca   :  { %990 = vmatpush.msra.mxu0 %v3802_v11  ;;  %1032 = vmatpush.msra.mxu2 %v3808_v13 }
 0x8cc   :  { %991 = vmatpush.msra.mxu0 %v4052_v22  ;;  %1033 = vmatpush.msra.mxu2 %v3815_v14 }
 0x8ce   :  { %992 = vmatpush.msra.mxu0 %v4059_v26  ;;  %1034 = vmatpush.msra.mxu2 %v3822_v15 }
 0x8d0   :  { %993 = vmatpush.msra.mxu0 %v4066_v50  ;;  %1035 = vmatpush.msra.mxu2 %v3829_v18 }
 0x8d2   :  { %994 = vmatpush.msra.mxu0 %v4073_v49  ;;  %1036 = vmatpush.msra.mxu2 %v3836_v19 }
 0x8d4   :  { %995 = vmatpush.msra.mxu0 %v4080_v2  ;;  %1037 = vmatpush.msra.mxu2 %v3843_v20 }
 0x8d6   :  { %996 = vmatpush.msra.mxu0 %v4087_v3  ;;  %1038 = vmatpush.msra.mxu2 %v3850_v21 }
 0x8d8   :  { %997 = vmatpush.msra.mxu0 %v4094_v5  ;;  %1039 = vmatpush.msra.mxu2 %v3857_v23 }
 0x8da   :  { %998 = vmatpush.msra.mxu0 %v4101_v7  ;;  %1040 = vmatpush.msra.mxu2 %v3864_v24 }
 0x8dc   :  { %999 = vmatpush.msra.mxu0 %v4108_v9  ;;  %1041 = vmatpush.msra.mxu2 %v3871_v25 }
 0x8de   :  { %1000 = vmatpush.msra.mxu0 %v4115_v27  ;;  %1042 = vmatpush.msra.mxu2 %v4121_v28 }
 0x8e0   :  { %1001 = vmatpush.msra.mxu0 %v4127_v29  ;;  %1043 = vmatpush.msra.mxu2 %v4133_v31 }
 0x8e2   :  { %1002 = vmatpush.msra.mxu0 %v6517_v16  ;;  %1044 = vmatpush.msra.mxu2 %v6518_v60 }
 0x8e4   :  { %1003 = vmatpush.msra.mxu0 %v6511_v34  ;;  %1045 = vmatpush.msra.mxu2 %v6512_v56 }
 0x8e6   :  { %1004 = vmatpush.msra.mxu0 %v4261_v53  ;;  %1046 = vmatpush.msra.mxu2 %v6519_v8 }
 0x8e8   :  { %1005 = vmatpush.msra.mxu0 %v4268_v12  ;;  %1047 = vmatpush.msra.mxu2 %v4161_v61 }
 0x94c   :  { %v871_v16 = vpop.f32.mrf.mxu2 }
 0x94d   :  { %v872_v31 = vadd.f32 %v871_v16, %v851_v62  ;;  %v6521_v16 = vld [vmem:[#allocation10_spill] sm:$0xff] }
 0x94f   :  { %v874_v60 = vadd.f32 %v2654_v55, %v872_v31  ;;  %v6520_v31 = vld [vmem:[#allocation13_spill] sm:$0xff] }
 0x951   :  { %2709 = vtanh.f32 %v874_v60  ;;  %891 = vmatmul.f32.vlgmr.msra.gmra.mxu3 %v874_v60  ;;  %v6522_v60 = vld [vmem:[#allocation14_spill] sm:$0xff] }
 0x952   :  { %1053 = vmatpush.msra.mxu3 %v3892_v33 }
 0x954   :  { %1054 = vmatpush.msra.mxu3 %v3898_v35 }
 0x956   :  { %1055 = vmatpush.msra.mxu3 %v3904_v36 }
 0x957   :  { %v2710_v8 = vpop.eup %2709 }
 0x958   :  { %939 = vmatmul.f32.vlgmr.msrb.gmra.mxu1 %v2710_v8  ;;  %1056 = vmatpush.msra.mxu3 %v3910_v39  ;;  %v829_v8 = vpop.f32.mrf.mxu0 }
 0x959   :  { %1101 = vmatpush.msrb.mxu1 %v3916_v41  ;;  %v830_v62 = vadd.f32 %v4393_v58, %v829_v8  ;;  %v6525_v8 = vld [vmem:[#allocation3_spill] sm:$0xff] }
 0x95a   :  { %1057 = vmatpush.msra.mxu3 %v3922_v43 }
 0x95b   :  { %1102 = vmatpush.msrb.mxu1 %v3928_v44 }
 0x95c   :  { %1058 = vmatpush.msra.mxu3 %v3934_v45 }
 0x95d   :  { %1103 = vmatpush.msrb.mxu1 %v3940_v48 }
 0x95e   :  { %1059 = vmatpush.msra.mxu3 %v3946_v52 }
 0x95f   :  { %1104 = vmatpush.msrb.mxu1 %v3952_v54 }
 0x960   :  { %1060 = vmatpush.msra.mxu3 %v3958_v42 }
 0x961   :  { %1105 = vmatpush.msrb.mxu1 %v3964_v46 }
 0x962   :  { %1061 = vmatpush.msra.mxu3 %v3970_v30 }
 0x963   :  { %1106 = vmatpush.msrb.mxu1 %v3976_v57 }
 0x964   :  { %1062 = vmatpush.msra.mxu3 %v4185_v17 }
 0x965   :  { %1107 = vmatpush.msrb.mxu1 %v3983_v59 }
 0x966   :  { %1063 = vmatpush.msra.mxu3 %v4192_v6 }
 0x967   :  { %1108 = vmatpush.msrb.mxu1 %v3990_v40 }
 0x968   :  { %1064 = vmatpush.msra.mxu3 %v4199_v63 }
 0x969   :  { %1109 = vmatpush.msrb.mxu1 %v3997_v47 }
 0x96a   :  { %1065 = vmatpush.msra.mxu3 %v4206_v10 }
 0x96b   :  { %1110 = vmatpush.msrb.mxu1 %v4004_v51 }
 0x96c   :  { %1066 = vmatpush.msra.mxu3 %v4301_v37 }
 0x96d   :  { %1111 = vmatpush.msrb.mxu1 %v6514_v32 }
 0x96e   :  { %1067 = vmatpush.msra.mxu3 %v6520_v31 }
 0x96f   :  { %1112 = vmatpush.msrb.mxu1 %v6521_v16 }
 0x970   :  { %1068 = vmatpush.msra.mxu3 %v6522_v60 }
 0x971   :  { %1113 = vmatpush.msrb.mxu1 %v4025_v38 }
 0x973   :  { %1114 = vmatpush.msrb.mxu1 %v4031_v0 }
 0x975   :  { %1115 = vmatpush.msrb.mxu1 %v4037_v1 }
 0x977   :  { %1116 = vmatpush.msrb.mxu1 %v4043_v4 }
 0x9d4   :  { %v892_v55 = vpop.f32.mrf.mxu3 }
 0x9d5   :  { %v893_v37 = vadd.f32 %v892_v55, %v830_v62  ;;  %v6526_v62 = vld [vmem:[#allocation4_spill] sm:$0xff]  ;;  %v940_v55 = vpop.f32.mrf.mxu1 }
 0x9d7   :  { %2711 = vtanh.f32 %v893_v37  ;;  %v6523_v37 = vld [vmem:[#allocation9_spill] sm:$0xff] }
 0x9dd   :  { %v2712_v32 = vpop.eup %2711 }
 0x9de   :  { %917 = vmatmul.f32.vlgmr.msrb.gmra.mxu0 %v2712_v32  ;;  %959 = vmatmul.f32.vlgmr.msrb.gmra.mxu2 %v2712_v32  ;;  %v6524_v32 = vld [vmem:[#allocation12_spill] sm:$0xff] }
 0x9df   :  { %1079 = vmatpush.msrb.mxu0 %v3802_v11  ;;  %1121 = vmatpush.msrb.mxu2 %v3808_v13 }
 0x9e1   :  { %1080 = vmatpush.msrb.mxu0 %v4052_v22  ;;  %1122 = vmatpush.msrb.mxu2 %v3815_v14 }
 0x9e3   :  { %1081 = vmatpush.msrb.mxu0 %v4059_v26  ;;  %1123 = vmatpush.msrb.mxu2 %v3822_v15 }
 0x9e5   :  { %1082 = vmatpush.msrb.mxu0 %v4066_v50  ;;  %1124 = vmatpush.msrb.mxu2 %v3829_v18 }
 0x9e7   :  { %1083 = vmatpush.msrb.mxu0 %v4073_v49  ;;  %1125 = vmatpush.msrb.mxu2 %v3836_v19 }
 0x9e9   :  { %1084 = vmatpush.msrb.mxu0 %v4080_v2  ;;  %1126 = vmatpush.msrb.mxu2 %v3843_v20 }
 0x9eb   :  { %1085 = vmatpush.msrb.mxu0 %v4087_v3  ;;  %1127 = vmatpush.msrb.mxu2 %v3850_v21 }
 0x9ed   :  { %1086 = vmatpush.msrb.mxu0 %v4094_v5  ;;  %1128 = vmatpush.msrb.mxu2 %v3857_v23 }
 0x9ef   :  { %1087 = vmatpush.msrb.mxu0 %v4101_v7  ;;  %1129 = vmatpush.msrb.mxu2 %v3864_v24 }
 0x9f1   :  { %1088 = vmatpush.msrb.mxu0 %v4108_v9  ;;  %1130 = vmatpush.msrb.mxu2 %v3871_v25 }
 0x9f3   :  { %1089 = vmatpush.msrb.mxu0 %v4115_v27  ;;  %1131 = vmatpush.msrb.mxu2 %v4121_v28 }
 0x9f5   :  { %1090 = vmatpush.msrb.mxu0 %v4127_v29  ;;  %1132 = vmatpush.msrb.mxu2 %v6523_v37  ;;  %v2655_v37 = vld [vmem:[%s6366_s0 + $0x48] sm:$0xff] }
 0x9f7   :  { %1091 = vmatpush.msrb.mxu0 %v6524_v32  ;;  %1133 = vmatpush.msrb.mxu2 %v6525_v8 }
 0x9f9   :  { %1092 = vmatpush.msrb.mxu0 %v6511_v34  ;;  %1134 = vmatpush.msrb.mxu2 %v6512_v56 }
 0x9fb   :  { %1093 = vmatpush.msrb.mxu0 %v4261_v53  ;;  %1135 = vmatpush.msrb.mxu2 %v6526_v62 }
 0x9fd   :  { %1094 = vmatpush.msrb.mxu0 %v4268_v12  ;;  %1136 = vmatpush.msrb.mxu2 %v4161_v61 }
 0xa61   :  { %v960_v32 = vpop.f32.mrf.mxu2 }
 0xa62   :  { %v961_v29 = vadd.f32 %v960_v32, %v940_v55  ;;  %v918_v32 = vpop.f32.mrf.mxu0 }
 0xa64   :  { %v963_v8 = vadd.f32 %v2655_v37, %v961_v29  ;;  %v6527_v29 = vld [vmem:[#allocation8_spill] sm:$0xff]  ;;  %v6528_v37 = vld [vmem:[#allocation7_spill] sm:$0xff] }
 0xa66   :  { %2713 = vtanh.f32 %v963_v8  ;;  %980 = vmatmul.f32.vlgmr.msrb.gmra.mxu3 %v963_v8  ;;  %v919_v8 = vadd.f32 %v4393_v58, %v918_v32  ;;  %v4784_v32 = vld [vmem:[%s6362_s1 + $0x48] sm:$0xff] }
 0xa67   :  { %1142 = vmatpush.msrb.mxu3 %v3892_v33 }
 0xa69   :  { %1143 = vmatpush.msrb.mxu3 %v3898_v35 }
 0xa6b   :  { %1144 = vmatpush.msrb.mxu3 %v3904_v36 }
 0xa6c   :  { %v2714_v62 = vpop.eup %2713 }
 0xa6d   :  { %1028 = vmatmul.f32.vlgmr.msra.gmra.mxu1 %v2714_v62  ;;  %1145 = vmatpush.msrb.mxu3 %v3910_v39 }
 0xa6e   :  { %1190 = vmatpush.msra.mxu1 %v3916_v41 }
 0xa6f   :  { %1146 = vmatpush.msrb.mxu3 %v3922_v43 }
 0xa70   :  { %1191 = vmatpush.msra.mxu1 %v3928_v44 }
 0xa71   :  { %1147 = vmatpush.msrb.mxu3 %v3934_v45 }
 0xa72   :  { %1192 = vmatpush.msra.mxu1 %v3940_v48 }
 0xa73   :  { %1148 = vmatpush.msrb.mxu3 %v3946_v52 }
 0xa74   :  { %1193 = vmatpush.msra.mxu1 %v3952_v54 }
 0xa75   :  { %1149 = vmatpush.msrb.mxu3 %v3958_v42 }
 0xa76   :  { %1194 = vmatpush.msra.mxu1 %v3964_v46 }
 0xa77   :  { %1150 = vmatpush.msrb.mxu3 %v3970_v30 }
 0xa78   :  { %1195 = vmatpush.msra.mxu1 %v3976_v57 }
 0xa79   :  { %1151 = vmatpush.msrb.mxu3 %v4185_v17 }
 0xa7a   :  { %1196 = vmatpush.msra.mxu1 %v3983_v59 }
 0xa7b   :  { %1152 = vmatpush.msrb.mxu3 %v4192_v6 }
 0xa7c   :  { %1197 = vmatpush.msra.mxu1 %v3990_v40 }
 0xa7d   :  { %1153 = vmatpush.msrb.mxu3 %v4199_v63 }
 0xa7e   :  { %1198 = vmatpush.msra.mxu1 %v3997_v47 }
 0xa7f   :  { %1154 = vmatpush.msrb.mxu3 %v4206_v10 }
 0xa80   :  { %1199 = vmatpush.msra.mxu1 %v4004_v51 }
 0xa81   :  { %1155 = vmatpush.msrb.mxu3 %v6527_v29 }
 0xa82   :  { %1200 = vmatpush.msra.mxu1 %v6528_v37 }
 0xa83   :  { %1156 = vmatpush.msrb.mxu3 %v6520_v31 }
 0xa84   :  { %1201 = vmatpush.msra.mxu1 %v6521_v16 }
 0xa85   :  { %1157 = vmatpush.msrb.mxu3 %v6522_v60 }
 0xa86   :  { %1202 = vmatpush.msra.mxu1 %v4025_v38 }
 0xa88   :  { %1203 = vmatpush.msra.mxu1 %v4031_v0 }
 0xa8a   :  { %1204 = vmatpush.msra.mxu1 %v4037_v1 }
 0xa8c   :  { %1205 = vmatpush.msra.mxu1 %v4043_v4 }
 0xae9   :  { %v981_v62 = vpop.f32.mrf.mxu3 }
 0xaea   :  { %v982_v55 = vadd.f32 %v981_v62, %v919_v8  ;;  %v4791_v8 = vld [vmem:[%s6362_s1 + $0x40] sm:$0xff]  ;;  %v4826_v62 = vld [vmem:[%s6362_s1 + $0x18] sm:$0xff] }
 0xaec   :  { %2715 = vtanh.f32 %v982_v55  ;;  %v4832_v55 = vld [vmem:[%s6362_s1 + $0x10] sm:$0xff] }
 0xaf2   :  { %v2716_v37 = vpop.eup %2715 }
 0xaf3   :  { %1006 = vmatmul.f32.vlgmr.msra.gmra.mxu0 %v2716_v37  ;;  %1048 = vmatmul.f32.vlgmr.msra.gmra.mxu2 %v2716_v37  ;;  %v4777_v37 = vld [vmem:[%s6362_s1 + $0x50] sm:$0xff] }
 0xaf4   :  { %1168 = vmatpush.msra.mxu0 %v3802_v11  ;;  %1210 = vmatpush.msra.mxu2 %v3808_v13  ;;  %v6529_v11 = vld [vmem:[#allocation6_spill] sm:$0xff]  ;;  %v6530_v13 = vld [vmem:[#allocation9_spill] sm:$0xff] }
 0xaf6   :  { %1169 = vmatpush.msra.mxu0 %v4052_v22  ;;  %1211 = vmatpush.msra.mxu2 %v3815_v14  ;;  %v6531_v14 = vld [vmem:[#allocation12_spill] sm:$0xff] }
 0xaf8   :  { %1170 = vmatpush.msra.mxu0 %v4059_v26  ;;  %1212 = vmatpush.msra.mxu2 %v3822_v15  ;;  %v6532_v15 = vld [vmem:[#allocation3_spill] sm:$0xff] }
 0xafa   :  { %1171 = vmatpush.msra.mxu0 %v4066_v50  ;;  %1213 = vmatpush.msra.mxu2 %v3829_v18  ;;  %v6533_v18 = vld [vmem:[#allocation4_spill] sm:$0xff] }
 0xafc   :  { %1172 = vmatpush.msra.mxu0 %v4073_v49  ;;  %1214 = vmatpush.msra.mxu2 %v3836_v19  ;;  %v1029_v19 = vpop.f32.mrf.mxu1 }
 0xafe   :  { %1173 = vmatpush.msra.mxu0 %v4080_v2  ;;  %1215 = vmatpush.msra.mxu2 %v3843_v20  ;;  %v2656_v20 = vld [vmem:[%s6366_s0 + $0x50] sm:$0xff] }
 0xb00   :  { %1174 = vmatpush.msra.mxu0 %v4087_v3  ;;  %1216 = vmatpush.msra.mxu2 %v3850_v21 }
 0xb02   :  { %1175 = vmatpush.msra.mxu0 %v4094_v5  ;;  %1217 = vmatpush.msra.mxu2 %v3857_v23 }
 0xb04   :  { %1176 = vmatpush.msra.mxu0 %v4101_v7  ;;  %1218 = vmatpush.msra.mxu2 %v3864_v24 }
 0xb06   :  { %1177 = vmatpush.msra.mxu0 %v4108_v9  ;;  %1219 = vmatpush.msra.mxu2 %v3871_v25 }
 0xb08   :  { %1178 = vmatpush.msra.mxu0 %v4115_v27  ;;  %1220 = vmatpush.msra.mxu2 %v4121_v28 }
 0xb0a   :  { %1179 = vmatpush.msra.mxu0 %v6529_v11  ;;  %1221 = vmatpush.msra.mxu2 %v6530_v13 }
 0xb0c   :  { %1180 = vmatpush.msra.mxu0 %v6531_v14  ;;  %1222 = vmatpush.msra.mxu2 %v6532_v15 }
 0xb0e   :  { %1181 = vmatpush.msra.mxu0 %v6511_v34  ;;  %1223 = vmatpush.msra.mxu2 %v6512_v56 }
 0xb10   :  { %1182 = vmatpush.msra.mxu0 %v4261_v53  ;;  %1224 = vmatpush.msra.mxu2 %v6533_v18 }
 0xb12   :  { %1183 = vmatpush.msra.mxu0 %v4268_v12  ;;  %1225 = vmatpush.msra.mxu2 %v4161_v61 }
 0xb76   :  { %v1049_v21 = vpop.f32.mrf.mxu2 }
 0xb77   :  { %v1050_v23 = vadd.f32 %v1049_v21, %v1029_v19 }
 0xb79   :  { %v1052_v24 = vadd.f32 %v2656_v20, %v1050_v23  ;;  %v4853_v23 = vld [vmem:[%s6364_s3 + $0x70] sm:$0xff] }
 0xb7b   :  { %2717 = vtanh.f32 %v1052_v24  ;;  %1069 = vmatmul.f32.vlgmr.msra.gmra.mxu3 %v1052_v24  ;;  %v4860_v24 = vld [vmem:[%s6364_s3 + $0x68] sm:$0xff] }
 0xb7c   :  { %1231 = vmatpush.msra.mxu3 %v3892_v33  ;;  %v6534_v33 = vld [vmem:[#allocation7_spill] sm:$0xff] }
 0xb7e   :  { %1232 = vmatpush.msra.mxu3 %v3898_v35  ;;  %v1007_v35 = vpop.f32.mrf.mxu0 }
 0xb80   :  { %1233 = vmatpush.msra.mxu3 %v3904_v36  ;;  %v1008_v36 = vadd.f32 %v4393_v58, %v1007_v35  ;;  %v4881_v35 = vld [vmem:[%s6364_s3 + $0x50] sm:$0xff] }
 0xb81   :  { %v2718_v25 = vpop.eup %2717 }
 0xb82   :  { %1117 = vmatmul.f32.vlgmr.msrb.gmra.mxu1 %v2718_v25  ;;  %1234 = vmatpush.msra.mxu3 %v3910_v39  ;;  %v4867_v25 = vld [vmem:[%s6364_s3 + $0x60] sm:$0xff] }
 0xb83   :  { %1279 = vmatpush.msrb.mxu1 %v3916_v41 }
 0xb84   :  { %1235 = vmatpush.msra.mxu3 %v3922_v43 }
 0xb85   :  { %1280 = vmatpush.msrb.mxu1 %v3928_v44  ;;  %v4603_v44 = vld [vmem:[%s6364_s3 + $0x78] sm:$0xff] }
 0xb86   :  { %1236 = vmatpush.msra.mxu3 %v3934_v45  ;;  %v4609_v45 = vld [vmem:[%s6362_s1 + $0xf8] sm:$0xff] }
 0xb87   :  { %1281 = vmatpush.msrb.mxu1 %v3940_v48  ;;  %v4616_v48 = vld [vmem:[%s6362_s1 + $0xf0] sm:$0xff] }
 0xb88   :  { %1237 = vmatpush.msra.mxu3 %v3946_v52  ;;  %v4623_v52 = vld [vmem:[%s6362_s1 + $0xe8] sm:$0xff] }
 0xb89   :  { %1282 = vmatpush.msrb.mxu1 %v3952_v54  ;;  %v4630_v54 = vld [vmem:[%s6362_s1 + $0xe0] sm:$0xff] }
 0xb8a   :  { %1238 = vmatpush.msra.mxu3 %v3958_v42  ;;  %v4637_v42 = vld [vmem:[%s6362_s1 + $0xd8] sm:$0xff] }
 0xb8b   :  { %1283 = vmatpush.msrb.mxu1 %v3964_v46  ;;  %v4644_v46 = vld [vmem:[%s6362_s1 + $0xd0] sm:$0xff] }
 0xb8c   :  { %1239 = vmatpush.msra.mxu3 %v3970_v30  ;;  %v4651_v30 = vld [vmem:[%s6362_s1 + $0xc8] sm:$0xff] }
 0xb8d   :  { %1284 = vmatpush.msrb.mxu1 %v3976_v57  ;;  %v4658_v57 = vld [vmem:[%s6362_s1 + $0xc0] sm:$0xff] }
 0xb8e   :  { %1240 = vmatpush.msra.mxu3 %v4185_v17 }
 0xb8f   :  { %1285 = vmatpush.msrb.mxu1 %v3983_v59  ;;  %v4665_v59 = vld [vmem:[%s6362_s1 + $0xb8] sm:$0xff] }
 0xb90   :  { %1241 = vmatpush.msra.mxu3 %v4192_v6 }
 0xb91   :  { %1286 = vmatpush.msrb.mxu1 %v3990_v40  ;;  %v4672_v40 = vld [vmem:[%s6362_s1 + $0xb0] sm:$0xff] }
 0xb92   :  { %1242 = vmatpush.msra.mxu3 %v4199_v63 }
 0xb93   :  { %1287 = vmatpush.msrb.mxu1 %v3997_v47 }
 0xb94   :  { %1243 = vmatpush.msra.mxu3 %v4206_v10 }
 0xb95   :  { %1288 = vmatpush.msrb.mxu1 %v4004_v51  ;;  %v2657_v51 = vld [vmem:[%s6366_s0 + $0x58] sm:$0xff] }
 0xb96   :  { %1244 = vmatpush.msra.mxu3 %v6527_v29 }
 0xb97   :  { %1289 = vmatpush.msrb.mxu1 %v6534_v33  ;;  %v4874_v33 = vld [vmem:[%s6364_s3 + $0x58] sm:$0xff] }
 0xb98   :  { %1245 = vmatpush.msra.mxu3 %v6520_v31 }
 0xb99   :  { %1290 = vmatpush.msrb.mxu1 %v6521_v16  ;;  %v4771_v16 = vld [vmem:[%s6363_s2 + $0x38] sm:$0xff] }
 0xb9a   :  { %1246 = vmatpush.msra.mxu3 %v6522_v60 }
 0xb9b   :  { %1291 = vmatpush.msrb.mxu1 %v4025_v38 }
 0xb9d   :  { %1292 = vmatpush.msrb.mxu1 %v4031_v0 }
 0xb9f   :  { %1293 = vmatpush.msrb.mxu1 %v4037_v1 }
 0xba1   :  { %1294 = vmatpush.msrb.mxu1 %v4043_v4  ;;  %v4693_v4 = vld [vmem:[%s6363_s2 + $0x78] sm:$0xff] }
 0xbfe   :  { %v1070_v39 = vpop.f32.mrf.mxu3 }
 0xbff   :  { %v1071_v41 = vadd.f32 %v1070_v39, %v1008_v36  ;;  %v1118_v47 = vpop.f32.mrf.mxu1  ;;  %v4888_v36 = vld [vmem:[%s6364_s3 + $0x48] sm:$0xff]  ;;  %v4895_v39 = vld [vmem:[%s6364_s3 + $0x40] sm:$0xff] }
 0xc01   :  { %2719 = vtanh.f32 %v1071_v41  ;;  %v4902_v41 = vld [vmem:[%s6364_s3 + $0x38] sm:$0xff] }
 0xc07   :  { %v2720_v43 = vpop.eup %2719 }
 0xc08   :  { %1095 = vmatmul.f32.vlgmr.msrb.gmra.mxu0 %v2720_v43  ;;  %1137 = vmatmul.f32.vlgmr.msrb.gmra.mxu2 %v2720_v43  ;;  %v4909_v43 = vld [vmem:[%s6364_s3 + $0x30] sm:$0xff] }
 0xc09   :  { %1257 = vmatpush.msrb.mxu0 %v4603_v44  ;;  %1299 = vmatpush.msrb.mxu2 %v4609_v45 }
 0xc0b   :  { %1258 = vmatpush.msrb.mxu0 %v4052_v22  ;;  %1300 = vmatpush.msrb.mxu2 %v4616_v48  ;;  %v4699_v22 = vld [vmem:[%s6363_s2 + $0x70] sm:$0xff] }
 0xc0d   :  { %1259 = vmatpush.msrb.mxu0 %v4059_v26  ;;  %1301 = vmatpush.msrb.mxu2 %v4623_v52  ;;  %v4705_v26 = vld [vmem:[%s6363_s2 + $0x68] sm:$0xff] }
 0xc0f   :  { %1260 = vmatpush.msrb.mxu0 %v4066_v50  ;;  %1302 = vmatpush.msrb.mxu2 %v4630_v54 }
 0xc11   :  { %1261 = vmatpush.msrb.mxu0 %v4073_v49  ;;  %1303 = vmatpush.msrb.mxu2 %v4637_v42  ;;  %v4711_v49 = vld [vmem:[%s6363_s2 + $0x60] sm:$0xff] }
 0xc13   :  { %1262 = vmatpush.msrb.mxu0 %v4080_v2  ;;  %1304 = vmatpush.msrb.mxu2 %v4644_v46  ;;  %v4717_v2 = vld [vmem:[%s6362_s1 + $0x78] sm:$0xff] }
 0xc15   :  { %1263 = vmatpush.msrb.mxu0 %v4087_v3  ;;  %1305 = vmatpush.msrb.mxu2 %v4651_v30  ;;  %v4723_v3 = vld [vmem:[%s6363_s2 + $0x58] sm:$0xff] }
 0xc17   :  { %1264 = vmatpush.msrb.mxu0 %v4094_v5  ;;  %1306 = vmatpush.msrb.mxu2 %v4658_v57  ;;  %v4729_v5 = vld [vmem:[%s6362_s1 + $0x70] sm:$0xff] }
 0xc19   :  { %1265 = vmatpush.msrb.mxu0 %v4101_v7  ;;  %1307 = vmatpush.msrb.mxu2 %v4665_v59  ;;  %v4735_v7 = vld [vmem:[%s6363_s2 + $0x50] sm:$0xff] }
 0xc1b   :  { %1266 = vmatpush.msrb.mxu0 %v4108_v9  ;;  %1308 = vmatpush.msrb.mxu2 %v4672_v40  ;;  %v4741_v9 = vld [vmem:[%s6362_s1 + $0x68] sm:$0xff] }
 0xc1d   :  { %1267 = vmatpush.msrb.mxu0 %v4115_v27  ;;  %1309 = vmatpush.msrb.mxu2 %v4121_v28  ;;  %v4747_v27 = vld [vmem:[%s6363_s2 + $0x48] sm:$0xff]  ;;  %v4753_v28 = vld [vmem:[%s6362_s1 + $0x60] sm:$0xff] }
 0xc1f   :  { %1268 = vmatpush.msrb.mxu0 %v6529_v11  ;;  %1310 = vmatpush.msrb.mxu2 %v6530_v13  ;;  %v4838_v11 = vld [vmem:[%s6362_s1 + $0x8] sm:$0xff]  ;;  %v4844_v13 = vld [vmem:[%s6362_s1] sm:$0xff] }
 0xc21   :  { %1269 = vmatpush.msrb.mxu0 %v6531_v14  ;;  %1311 = vmatpush.msrb.mxu2 %v6532_v15 }
 0xc23   :  { %1270 = vmatpush.msrb.mxu0 %v6511_v34  ;;  %1312 = vmatpush.msrb.mxu2 %v6512_v56  ;;  %v4765_v56 = vld [vmem:[%s6362_s1 + $0x58] sm:$0xff] }
 0xc25   :  { %1271 = vmatpush.msrb.mxu0 %v4261_v53  ;;  %1313 = vmatpush.msrb.mxu2 %v6533_v18 }
 0xc27   :  { %1272 = vmatpush.msrb.mxu0 %v4268_v12  ;;  %1314 = vmatpush.msrb.mxu2 %v4161_v61  ;;  %v4759_v61 = vld [vmem:[%s6363_s2 + $0x40] sm:$0xff] }
 0xc85   :  { %v1096_v15 = vpop.f32.mrf.mxu0 }
 0xc86   :  { %v1097_v18 = vadd.f32 %v4393_v58, %v1096_v15 }
 0xc8b   :  { %v1138_v38 = vpop.f32.mrf.mxu2 }
 0xc8c   :  { %v1139_v0 = vadd.f32 %v1138_v38, %v1118_v47  ;;  %v4916_v47 = vld [vmem:[%s6364_s3 + $0x28] sm:$0xff]  ;;  %v4928_v38 = vld [vmem:[%s6364_s3 + $0x20] sm:$0xff] }
 0xc8d   :  { %6537 = vst [vmem:[#allocation13_spill] sm:$0xff] %v4928_v38 }
 0xc8e   :  { %v1141_v1 = vadd.f32 %v2657_v51, %v1139_v0  ;;  %v4922_v51 = vld [vmem:[%s6362_s1 + $0xa8] sm:$0xff]  ;;  %v4934_v0 = vld [vmem:[%s6362_s1 + $0xa0] sm:$0xff] }
 0xc8f   :  { %6538 = vst [vmem:[#allocation10_spill] sm:$0xff] %v4934_v0 }
 0xc90   :  { %2721 = vtanh.f32 %v1141_v1  ;;  %1158 = vmatmul.f32.vlgmr.msrb.gmra.mxu3 %v1141_v1  ;;  %v4941_v1 = vld [vmem:[%s6362_s1 + $0x98] sm:$0xff] }
 0xc91   :  { %1320 = vmatpush.msrb.mxu3 %v4693_v4  ;;  %6539 = vst [vmem:[#allocation14_spill] sm:$0xff] %v4941_v1 }
 0xc93   :  { %1321 = vmatpush.msrb.mxu3 %v4699_v22 }
 0xc95   :  { %1322 = vmatpush.msrb.mxu3 %v4705_v26 }
 0xc96   :  { %v2722_v50 = vpop.eup %2721 }
 0xc97   :  { %1206 = vmatmul.f32.vlgmr.msra.gmra.mxu1 %v2722_v50  ;;  %1323 = vmatpush.msrb.mxu3 %v4711_v49  ;;  %v4948_v50 = vld [vmem:[%s6362_s1 + $0x90] sm:$0xff] }
 0xc98   :  { %1368 = vmatpush.msra.mxu1 %v4717_v2  ;;  %6540 = vst [vmem:[#allocation8_spill] sm:$0xff] %v4948_v50 }
 0xc99   :  { %1324 = vmatpush.msrb.mxu3 %v4723_v3 }
 0xc9a   :  { %1369 = vmatpush.msra.mxu1 %v4729_v5 }
 0xc9b   :  { %1325 = vmatpush.msrb.mxu3 %v4735_v7 }
 0xc9c   :  { %1370 = vmatpush.msra.mxu1 %v4741_v9 }
 0xc9d   :  { %1326 = vmatpush.msrb.mxu3 %v4747_v27 }
 0xc9e   :  { %1371 = vmatpush.msra.mxu1 %v4753_v28 }
 0xc9f   :  { %1327 = vmatpush.msrb.mxu3 %v4759_v61 }
 0xca0   :  { %1372 = vmatpush.msra.mxu1 %v4765_v56 }
 0xca1   :  { %1328 = vmatpush.msrb.mxu3 %v4771_v16 }
 0xca2   :  { %1373 = vmatpush.msra.mxu1 %v4777_v37 }
 0xca3   :  { %1329 = vmatpush.msrb.mxu3 %v4185_v17  ;;  %v4798_v17 = vld [vmem:[%s6362_s1 + $0x38] sm:$0xff] }
 0xca4   :  { %1374 = vmatpush.msra.mxu1 %v4784_v32 }
 0xca5   :  { %1330 = vmatpush.msrb.mxu3 %v4192_v6  ;;  %v4805_v6 = vld [vmem:[%s6362_s1 + $0x30] sm:$0xff] }
 0xca6   :  { %1375 = vmatpush.msra.mxu1 %v4791_v8 }
 0xca7   :  { %1331 = vmatpush.msrb.mxu3 %v4199_v63  ;;  %v4812_v63 = vld [vmem:[%s6362_s1 + $0x28] sm:$0xff] }
 0xca8   :  { %1376 = vmatpush.msra.mxu1 %v4798_v17  ;;  %6535 = vst [vmem:[#allocation5_spill] sm:$0xff] %v4812_v63 }
 0xca9   :  { %1332 = vmatpush.msrb.mxu3 %v4206_v10  ;;  %v4819_v10 = vld [vmem:[%s6362_s1 + $0x20] sm:$0xff] }
 0xcaa   :  { %1377 = vmatpush.msra.mxu1 %v4805_v6  ;;  %6536 = vst [vmem:[#allocation11_spill] sm:$0xff] %v4819_v10 }
 0xcab   :  { %1333 = vmatpush.msrb.mxu3 %v6527_v29 }
 0xcac   :  { %1378 = vmatpush.msra.mxu1 %v4812_v63 }
 0xcad   :  { %1334 = vmatpush.msrb.mxu3 %v6520_v31 }
 0xcae   :  { %1379 = vmatpush.msra.mxu1 %v4819_v10 }
 0xcaf   :  { %1335 = vmatpush.msrb.mxu3 %v6522_v60 }
 0xcb0   :  { %1380 = vmatpush.msra.mxu1 %v4826_v62 }
 0xcb2   :  { %1381 = vmatpush.msra.mxu1 %v4832_v55 }
 0xcb4   :  { %1382 = vmatpush.msra.mxu1 %v4838_v11 }
 0xcb6   :  { %1383 = vmatpush.msra.mxu1 %v4844_v13 }
 0xd13   :  { %v1159_v19 = vpop.f32.mrf.mxu3 }
 0xd14   :  { %v1160_v20 = vadd.f32 %v1159_v19, %v1097_v18  ;;  %v1207_v15 = vpop.f32.mrf.mxu1 }
 0xd16   :  { %2723 = vtanh.f32 %v1160_v20 }
 0xd1c   :  { %v2724_v21 = vpop.eup %2723 }
 0xd1d   :  { %1184 = vmatmul.f32.vlgmr.msra.gmra.mxu0 %v2724_v21  ;;  %1226 = vmatmul.f32.vlgmr.msra.gmra.mxu2 %v2724_v21  ;;  %v4986_v21 = vld [vmem:[%s6363_s2 + $0x30] sm:$0xff] }
 0xd1e   :  { %1346 = vmatpush.msra.mxu0 %v4603_v44  ;;  %1388 = vmatpush.msra.mxu2 %v4609_v45 }
 0xd20   :  { %1347 = vmatpush.msra.mxu0 %v4853_v23  ;;  %1389 = vmatpush.msra.mxu2 %v4616_v48 }
 0xd22   :  { %1348 = vmatpush.msra.mxu0 %v4860_v24  ;;  %1390 = vmatpush.msra.mxu2 %v4623_v52 }
 0xd24   :  { %1349 = vmatpush.msra.mxu0 %v4867_v25  ;;  %1391 = vmatpush.msra.mxu2 %v4630_v54 }
 0xd26   :  { %1350 = vmatpush.msra.mxu0 %v4874_v33  ;;  %1392 = vmatpush.msra.mxu2 %v4637_v42 }
 0xd28   :  { %1351 = vmatpush.msra.mxu0 %v4881_v35  ;;  %1393 = vmatpush.msra.mxu2 %v4644_v46 }
 0xd2a   :  { %1352 = vmatpush.msra.mxu0 %v4888_v36  ;;  %1394 = vmatpush.msra.mxu2 %v4651_v30 }
 0xd2c   :  { %1353 = vmatpush.msra.mxu0 %v4895_v39  ;;  %1395 = vmatpush.msra.mxu2 %v4658_v57 }
 0xd2e   :  { %1354 = vmatpush.msra.mxu0 %v4902_v41  ;;  %1396 = vmatpush.msra.mxu2 %v4665_v59 }
 0xd30   :  { %1355 = vmatpush.msra.mxu0 %v4909_v43  ;;  %1397 = vmatpush.msra.mxu2 %v4672_v40 }
 0xd32   :  { %1356 = vmatpush.msra.mxu0 %v4916_v47  ;;  %1398 = vmatpush.msra.mxu2 %v4922_v51 }
 0xd34   :  { %1357 = vmatpush.msra.mxu0 %v4928_v38  ;;  %1399 = vmatpush.msra.mxu2 %v4934_v0 }
 0xd36   :  { %1358 = vmatpush.msra.mxu0 %v6531_v14  ;;  %1400 = vmatpush.msra.mxu2 %v4941_v1  ;;  %v4955_v14 = vld [vmem:[%s6362_s1 + $0x88] sm:$0xff] }
 0xd37   :  { %6541 = vst [vmem:[#allocation6_spill] sm:$0xff] %v4955_v14 }
 0xd38   :  { %1359 = vmatpush.msra.mxu0 %v6511_v34  ;;  %1401 = vmatpush.msra.mxu2 %v4948_v50  ;;  %v4962_v34 = vld [vmem:[%s6362_s1 + $0x80] sm:$0xff] }
 0xd3a   :  { %1360 = vmatpush.msra.mxu0 %v4261_v53  ;;  %1402 = vmatpush.msra.mxu2 %v4955_v14  ;;  %v2658_v53 = vld [vmem:[%s6366_s0 + $0x60] sm:$0xff] }
 0xd3c   :  { %1361 = vmatpush.msra.mxu0 %v4268_v12  ;;  %1403 = vmatpush.msra.mxu2 %v4962_v34 }
 0xda0   :  { %v1227_v18 = vpop.f32.mrf.mxu2 }
 0xda1   :  { %v1228_v19 = vadd.f32 %v1227_v18, %v1207_v15  ;;  %v4993_v15 = vld [vmem:[%s6363_s2 + $0x28] sm:$0xff]  ;;  %v5007_v18 = vld [vmem:[%s6363_s2 + $0x18] sm:$0xff] }
 0xda3   :  { %v1230_v20 = vadd.f32 %v2658_v53, %v1228_v19  ;;  %v5000_v53 = vld [vmem:[%s6363_s2 + $0x20] sm:$0xff]  ;;  %v1185_v19 = vpop.f32.mrf.mxu0 }
 0xda5   :  { %2725 = vtanh.f32 %v1230_v20  ;;  %1247 = vmatmul.f32.vlgmr.msra.gmra.mxu3 %v1230_v20  ;;  %v1186_v20 = vadd.f32 %v4393_v58, %v1185_v19  ;;  %v5069_v19 = vld [vmem:[%s6364_s3] sm:$0xff] }
 0xda6   :  { %1409 = vmatpush.msra.mxu3 %v4693_v4 }
 0xda8   :  { %1410 = vmatpush.msra.mxu3 %v4699_v22 }
 0xdaa   :  { %1411 = vmatpush.msra.mxu3 %v4705_v26 }
 0xdab   :  { %v2726_v12 = vpop.eup %2725 }
 0xdac   :  { %1295 = vmatmul.f32.vlgmr.msrb.gmra.mxu1 %v2726_v12  ;;  %1412 = vmatpush.msra.mxu3 %v4711_v49 }
 0xdad   :  { %1457 = vmatpush.msrb.mxu1 %v4717_v2 }
 0xdae   :  { %1413 = vmatpush.msra.mxu3 %v4723_v3 }
 0xdaf   :  { %1458 = vmatpush.msrb.mxu1 %v4729_v5 }
 0xdb0   :  { %1414 = vmatpush.msra.mxu3 %v4735_v7 }
 0xdb1   :  { %1459 = vmatpush.msrb.mxu1 %v4741_v9 }
 0xdb2   :  { %1415 = vmatpush.msra.mxu3 %v4747_v27 }
 0xdb3   :  { %1460 = vmatpush.msrb.mxu1 %v4753_v28 }
 0xdb4   :  { %1416 = vmatpush.msra.mxu3 %v4759_v61 }
 0xdb5   :  { %1461 = vmatpush.msrb.mxu1 %v4765_v56 }
 0xdb6   :  { %1417 = vmatpush.msra.mxu3 %v4771_v16 }
 0xdb7   :  { %1462 = vmatpush.msrb.mxu1 %v4777_v37 }
 0xdb8   :  { %1418 = vmatpush.msra.mxu3 %v4986_v21 }
 0xdb9   :  { %1463 = vmatpush.msrb.mxu1 %v4784_v32 }
 0xdba   :  { %1419 = vmatpush.msra.mxu3 %v4993_v15 }
 0xdbb   :  { %1464 = vmatpush.msrb.mxu1 %v4791_v8 }
 0xdbc   :  { %1420 = vmatpush.msra.mxu3 %v5000_v53 }
 0xdbd   :  { %1465 = vmatpush.msrb.mxu1 %v4798_v17 }
 0xdbe   :  { %1421 = vmatpush.msra.mxu3 %v5007_v18 }
 0xdbf   :  { %1466 = vmatpush.msrb.mxu1 %v4805_v6 }
 0xdc0   :  { %1422 = vmatpush.msra.mxu3 %v6527_v29 }
 0xdc1   :  { %1467 = vmatpush.msrb.mxu1 %v4812_v63 }
 0xdc2   :  { %1423 = vmatpush.msra.mxu3 %v6520_v31  ;;  %v5048_v31 = vld [vmem:[%s6364_s3 + $0x18] sm:$0xff] }
 0xdc3   :  { %1468 = vmatpush.msrb.mxu1 %v4819_v10  ;;  %6542 = vst [vmem:[#allocation9_spill] sm:$0xff] %v5048_v31 }
 0xdc4   :  { %1424 = vmatpush.msra.mxu3 %v6522_v60  ;;  %v5055_v60 = vld [vmem:[%s6364_s3 + $0x10] sm:$0xff] }
 0xdc5   :  { %1469 = vmatpush.msrb.mxu1 %v4826_v62  ;;  %6543 = vst [vmem:[#allocation12_spill] sm:$0xff] %v5055_v60 }
 0xdc7   :  { %1470 = vmatpush.msrb.mxu1 %v4832_v55 }
 0xdc9   :  { %1471 = vmatpush.msrb.mxu1 %v4838_v11 }
 0xdcb   :  { %1472 = vmatpush.msrb.mxu1 %v4844_v13 }
 0xe28   :  { %v1248_v29 = vpop.f32.mrf.mxu3 }
 0xe29   :  { %v1249_v12 = vadd.f32 %v1248_v29, %v1186_v20  ;;  %v1296_v20 = vpop.f32.mrf.mxu1  ;;  %v2659_v29 = vld [vmem:[%s6366_s0 + $0x68] sm:$0xff] }
 0xe2b   :  { %2727 = vtanh.f32 %v1249_v12 }
 0xe31   :  { %v2728_v63 = vpop.eup %2727 }
 0xe32   :  { %1273 = vmatmul.f32.vlgmr.msrb.gmra.mxu0 %v2728_v63  ;;  %1315 = vmatmul.f32.vlgmr.msrb.gmra.mxu2 %v2728_v63  ;;  %v5062_v63 = vld [vmem:[%s6364_s3 + $0x8] sm:$0xff] }
 0xe33   :  { %1435 = vmatpush.msrb.mxu0 %v4603_v44  ;;  %1477 = vmatpush.msrb.mxu2 %v4609_v45 }
 0xe35   :  { %1436 = vmatpush.msrb.mxu0 %v4853_v23  ;;  %1478 = vmatpush.msrb.mxu2 %v4616_v48 }
 0xe37   :  { %1437 = vmatpush.msrb.mxu0 %v4860_v24  ;;  %1479 = vmatpush.msrb.mxu2 %v4623_v52 }
 0xe39   :  { %1438 = vmatpush.msrb.mxu0 %v4867_v25  ;;  %1480 = vmatpush.msrb.mxu2 %v4630_v54 }
 0xe3b   :  { %1439 = vmatpush.msrb.mxu0 %v4874_v33  ;;  %1481 = vmatpush.msrb.mxu2 %v4637_v42 }
 0xe3d   :  { %1440 = vmatpush.msrb.mxu0 %v4881_v35  ;;  %1482 = vmatpush.msrb.mxu2 %v4644_v46 }
 0xe3f   :  { %1441 = vmatpush.msrb.mxu0 %v4888_v36  ;;  %1483 = vmatpush.msrb.mxu2 %v4651_v30 }
 0xe41   :  { %1442 = vmatpush.msrb.mxu0 %v4895_v39  ;;  %1484 = vmatpush.msrb.mxu2 %v4658_v57 }
 0xe43   :  { %1443 = vmatpush.msrb.mxu0 %v4902_v41  ;;  %1485 = vmatpush.msrb.mxu2 %v4665_v59 }
 0xe45   :  { %1444 = vmatpush.msrb.mxu0 %v4909_v43  ;;  %1486 = vmatpush.msrb.mxu2 %v4672_v40 }
 0xe47   :  { %1445 = vmatpush.msrb.mxu0 %v4916_v47  ;;  %1487 = vmatpush.msrb.mxu2 %v4922_v51 }
 0xe49   :  { %1446 = vmatpush.msrb.mxu0 %v4928_v38  ;;  %1488 = vmatpush.msrb.mxu2 %v4934_v0 }
 0xe4b   :  { %1447 = vmatpush.msrb.mxu0 %v5048_v31  ;;  %1489 = vmatpush.msrb.mxu2 %v4941_v1 }
 0xe4d   :  { %1448 = vmatpush.msrb.mxu0 %v5055_v60  ;;  %1490 = vmatpush.msrb.mxu2 %v4948_v50 }
 0xe4f   :  { %1449 = vmatpush.msrb.mxu0 %v5062_v63  ;;  %1491 = vmatpush.msrb.mxu2 %v4955_v14 }
 0xe51   :  { %1450 = vmatpush.msrb.mxu0 %v5069_v19  ;;  %1492 = vmatpush.msrb.mxu2 %v4962_v34 }
 0xeb5   :  { %v1316_v12 = vpop.f32.mrf.mxu2 }
 0xeb6   :  { %v1317_v50 = vadd.f32 %v1316_v12, %v1296_v20  ;;  %v5116_v20 = vld [vmem:[%s6363_s2] sm:$0xff] }
 0xeb7   :  { %6547 = vst [vmem:[#allocation7_spill] sm:$0xff] %v5116_v20 }
 0xeb8   :  { %v1319_v60 = vadd.f32 %v2659_v29, %v1317_v50  ;;  %v5102_v50 = vld [vmem:[%s6363_s2 + $0x10] sm:$0xff]  ;;  %v1274_v29 = vpop.f32.mrf.mxu0 }
 0xeb9   :  { %6544 = vst [vmem:[#allocation3_spill] sm:$0xff] %v5102_v50  ;;  %v1275_v12 = vadd.f32 %v4393_v58, %v1274_v29  ;;  %v6548_v58 = vld [vmem:[#allocation12_spill] sm:$0xff]  ;;  %v2660_v29 = vld [vmem:[%s6366_s0 + $0x70] sm:$0xff] }
 0xeba   :  { %2729 = vtanh.f32 %v1319_v60  ;;  %1336 = vmatmul.f32.vlgmr.msrb.gmra.mxu3 %v1319_v60  ;;  %v5109_v60 = vld [vmem:[%s6363_s2 + $0x8] sm:$0xff] }
 0xebb   :  { %1498 = vmatpush.msrb.mxu3 %v4693_v4  ;;  %6546 = vst [vmem:[#allocation4_spill] sm:$0xff] %v5109_v60 }
 0xebd   :  { %1499 = vmatpush.msrb.mxu3 %v4699_v22 }
 0xebf   :  { %1500 = vmatpush.msrb.mxu3 %v4705_v26 }
 0xec0   :  { %v2730_v14 = vpop.eup %2729 }
 0xec1   :  { %1384 = vmatmul.f32.vlgmr.msra.gmra.mxu1 %v2730_v14  ;;  %1501 = vmatpush.msrb.mxu3 %v4711_v49  ;;  %v6545_v14 = vld [vmem:[#allocation5_spill] sm:$0xff] }
 0xec2   :  { %1546 = vmatpush.msra.mxu1 %v4717_v2 }
 0xec3   :  { %1502 = vmatpush.msrb.mxu3 %v4723_v3 }
 0xec4   :  { %1547 = vmatpush.msra.mxu1 %v4729_v5 }
 0xec5   :  { %1503 = vmatpush.msrb.mxu3 %v4735_v7 }
 0xec6   :  { %1548 = vmatpush.msra.mxu1 %v4741_v9 }
 0xec7   :  { %1504 = vmatpush.msrb.mxu3 %v4747_v27 }
 0xec8   :  { %1549 = vmatpush.msra.mxu1 %v4753_v28 }
 0xec9   :  { %1505 = vmatpush.msrb.mxu3 %v4759_v61 }
 0xeca   :  { %1550 = vmatpush.msra.mxu1 %v4765_v56 }
 0xecb   :  { %1506 = vmatpush.msrb.mxu3 %v4771_v16 }
 0xecc   :  { %1551 = vmatpush.msra.mxu1 %v4777_v37 }
 0xecd   :  { %1507 = vmatpush.msrb.mxu3 %v4986_v21 }
 0xece   :  { %1552 = vmatpush.msra.mxu1 %v4784_v32 }
 0xecf   :  { %1508 = vmatpush.msrb.mxu3 %v4993_v15 }
 0xed0   :  { %1553 = vmatpush.msra.mxu1 %v4791_v8 }
 0xed1   :  { %1509 = vmatpush.msrb.mxu3 %v5000_v53 }
 0xed2   :  { %1554 = vmatpush.msra.mxu1 %v4798_v17 }
 0xed3   :  { %1510 = vmatpush.msrb.mxu3 %v5007_v18 }
 0xed4   :  { %1555 = vmatpush.msra.mxu1 %v4805_v6 }
 0xed5   :  { %1511 = vmatpush.msrb.mxu3 %v5102_v50 }
 0xed6   :  { %1556 = vmatpush.msra.mxu1 %v6545_v14 }
 0xed7   :  { %1512 = vmatpush.msrb.mxu3 %v5109_v60 }
 0xed8   :  { %1557 = vmatpush.msra.mxu1 %v4819_v10 }
 0xed9   :  { %1513 = vmatpush.msrb.mxu3 %v5116_v20 }
 0xeda   :  { %1558 = vmatpush.msra.mxu1 %v4826_v62 }
 0xedc   :  { %1559 = vmatpush.msra.mxu1 %v4832_v55 }
 0xede   :  { %1560 = vmatpush.msra.mxu1 %v4838_v11 }
 0xee0   :  { %1561 = vmatpush.msra.mxu1 %v4844_v13 }
 0xf3d   :  { %v1337_v60 = vpop.f32.mrf.mxu3 }
 0xf3e   :  { %v1338_v10 = vadd.f32 %v1337_v60, %v1275_v12  ;;  %v1385_v60 = vpop.f32.mrf.mxu1 }
 0xf40   :  { %2731 = vtanh.f32 %v1338_v10  ;;  %v6549_v10 = vld [vmem:[#allocation8_spill] sm:$0xff] }
 0xf46   :  { %v2732_v14 = vpop.eup %2731 }
 0xf47   :  { %1362 = vmatmul.f32.vlgmr.msra.gmra.mxu0 %v2732_v14  ;;  %1404 = vmatmul.f32.vlgmr.msra.gmra.mxu2 %v2732_v14  ;;  %v6550_v14 = vld [vmem:[#allocation6_spill] sm:$0xff] }
 0xf48   :  { %1524 = vmatpush.msra.mxu0 %v4603_v44  ;;  %1566 = vmatpush.msra.mxu2 %v4609_v45 }
 0xf4a   :  { %1525 = vmatpush.msra.mxu0 %v4853_v23  ;;  %1567 = vmatpush.msra.mxu2 %v4616_v48 }
 0xf4c   :  { %1526 = vmatpush.msra.mxu0 %v4860_v24  ;;  %1568 = vmatpush.msra.mxu2 %v4623_v52 }
 0xf4e   :  { %1527 = vmatpush.msra.mxu0 %v4867_v25  ;;  %1569 = vmatpush.msra.mxu2 %v4630_v54 }
 0xf50   :  { %1528 = vmatpush.msra.mxu0 %v4874_v33  ;;  %1570 = vmatpush.msra.mxu2 %v4637_v42 }
 0xf52   :  { %1529 = vmatpush.msra.mxu0 %v4881_v35  ;;  %1571 = vmatpush.msra.mxu2 %v4644_v46 }
 0xf54   :  { %1530 = vmatpush.msra.mxu0 %v4888_v36  ;;  %1572 = vmatpush.msra.mxu2 %v4651_v30 }
 0xf56   :  { %1531 = vmatpush.msra.mxu0 %v4895_v39  ;;  %1573 = vmatpush.msra.mxu2 %v4658_v57 }
 0xf58   :  { %1532 = vmatpush.msra.mxu0 %v4902_v41  ;;  %1574 = vmatpush.msra.mxu2 %v4665_v59 }
 0xf5a   :  { %1533 = vmatpush.msra.mxu0 %v4909_v43  ;;  %1575 = vmatpush.msra.mxu2 %v4672_v40 }
 0xf5c   :  { %1534 = vmatpush.msra.mxu0 %v4916_v47  ;;  %1576 = vmatpush.msra.mxu2 %v4922_v51 }
 0xf5e   :  { %1535 = vmatpush.msra.mxu0 %v4928_v38  ;;  %1577 = vmatpush.msra.mxu2 %v4934_v0 }
 0xf60   :  { %1536 = vmatpush.msra.mxu0 %v5048_v31  ;;  %1578 = vmatpush.msra.mxu2 %v4941_v1 }
 0xf62   :  { %1537 = vmatpush.msra.mxu0 %v6548_v58  ;;  %1579 = vmatpush.msra.mxu2 %v6549_v10 }
 0xf64   :  { %1538 = vmatpush.msra.mxu0 %v5062_v63  ;;  %1580 = vmatpush.msra.mxu2 %v6550_v14 }
 0xf66   :  { %1539 = vmatpush.msra.mxu0 %v5069_v19  ;;  %1581 = vmatpush.msra.mxu2 %v4962_v34 }
 0xfca   :  { %v1405_v12 = vpop.f32.mrf.mxu2 }
 0xfcb   :  { %v1406_v31 = vadd.f32 %v1405_v12, %v1385_v60  ;;  %v1363_v60 = vpop.f32.mrf.mxu0 }
 0xfcd   :  { %v1408_v1 = vadd.f32 %v2660_v29, %v1406_v31  ;;  %v6552_v31 = vld [vmem:[#allocation4_spill] sm:$0xff]  ;;  %v5194_v29 = vld [vmem:[%s6365_s4] ss:$0 sm:$0xff] }
 0xfce   :  { %v1364_v12 = vadd.f32 %v5194_v29, %v1363_v60 }
 0xfcf   :  { %2733 = vtanh.f32 %v1408_v1  ;;  %1425 = vmatmul.f32.vlgmr.msra.gmra.mxu3 %v1408_v1  ;;  %v6551_v1 = vld [vmem:[#allocation5_spill] sm:$0xff] }
 0xfd0   :  { %1587 = vmatpush.msra.mxu3 %v4693_v4 }
 0xfd2   :  { %1588 = vmatpush.msra.mxu3 %v4699_v22 }
 0xfd4   :  { %1589 = vmatpush.msra.mxu3 %v4705_v26 }
 0xfd5   :  { %v2734_v14 = vpop.eup %2733 }
 0xfd6   :  { %1473 = vmatmul.f32.vlgmr.msrb.gmra.mxu1 %v2734_v14  ;;  %1590 = vmatpush.msra.mxu3 %v4711_v49  ;;  %v6553_v14 = vld [vmem:[#allocation11_spill] sm:$0xff] }
 0xfd7   :  { %1635 = vmatpush.msrb.mxu1 %v4717_v2 }
 0xfd8   :  { %1591 = vmatpush.msra.mxu3 %v4723_v3 }
 0xfd9   :  { %1636 = vmatpush.msrb.mxu1 %v4729_v5 }
 0xfda   :  { %1592 = vmatpush.msra.mxu3 %v4735_v7 }
 0xfdb   :  { %1637 = vmatpush.msrb.mxu1 %v4741_v9 }
 0xfdc   :  { %1593 = vmatpush.msra.mxu3 %v4747_v27 }
 0xfdd   :  { %1638 = vmatpush.msrb.mxu1 %v4753_v28 }
 0xfde   :  { %1594 = vmatpush.msra.mxu3 %v4759_v61 }
 0xfdf   :  { %1639 = vmatpush.msrb.mxu1 %v4765_v56 }
 0xfe0   :  { %1595 = vmatpush.msra.mxu3 %v4771_v16 }
 0xfe1   :  { %1640 = vmatpush.msrb.mxu1 %v4777_v37 }
 0xfe2   :  { %1596 = vmatpush.msra.mxu3 %v4986_v21 }
 0xfe3   :  { %1641 = vmatpush.msrb.mxu1 %v4784_v32 }
 0xfe4   :  { %1597 = vmatpush.msra.mxu3 %v4993_v15 }
 0xfe5   :  { %1642 = vmatpush.msrb.mxu1 %v4791_v8 }
 0xfe6   :  { %1598 = vmatpush.msra.mxu3 %v5000_v53 }
 0xfe7   :  { %1643 = vmatpush.msrb.mxu1 %v4798_v17 }
 0xfe8   :  { %1599 = vmatpush.msra.mxu3 %v5007_v18 }
 0xfe9   :  { %1644 = vmatpush.msrb.mxu1 %v4805_v6 }
 0xfea   :  { %1600 = vmatpush.msra.mxu3 %v5102_v50 }
 0xfeb   :  { %1645 = vmatpush.msrb.mxu1 %v6551_v1 }
 0xfec   :  { %1601 = vmatpush.msra.mxu3 %v6552_v31 }
 0xfed   :  { %1646 = vmatpush.msrb.mxu1 %v6553_v14 }
 0xfee   :  { %1602 = vmatpush.msra.mxu3 %v5116_v20 }
 0xfef   :  { %1647 = vmatpush.msrb.mxu1 %v4826_v62 }
 0xff1   :  { %1648 = vmatpush.msrb.mxu1 %v4832_v55 }
 0xff3   :  { %1649 = vmatpush.msrb.mxu1 %v4838_v11 }
 0xff5   :  { %1650 = vmatpush.msrb.mxu1 %v4844_v13 }
0x1052   :  { %v1426_v31 = vpop.f32.mrf.mxu3 }
0x1053   :  { %v1427_v14 = vadd.f32 %v1426_v31, %v1364_v12  ;;  %v6555_v31 = vld [vmem:[#allocation14_spill] sm:$0xff]  ;;  %v1474_v60 = vpop.f32.mrf.mxu1 }
0x1054   :  { %v2661_v12 = vld [vmem:[%s6366_s0 + $0x78] sm:$0xff] }
0x1055   :  { %2735 = vtanh.f32 %v1427_v14  ;;  %v6556_v14 = vld [vmem:[#allocation6_spill] sm:$0xff] }
0x105b   :  { %v2736_v20 = vpop.eup %2735 }
0x105c   :  { %1451 = vmatmul.f32.vlgmr.msrb.gmra.mxu0 %v2736_v20  ;;  %1493 = vmatmul.f32.vlgmr.msrb.gmra.mxu2 %v2736_v20  ;;  %v6554_v20 = vld [vmem:[#allocation9_spill] sm:$0xff] }
0x105d   :  { %1613 = vmatpush.msrb.mxu0 %v4603_v44  ;;  %1655 = vmatpush.msrb.mxu2 %v4609_v45 }
0x105f   :  { %1614 = vmatpush.msrb.mxu0 %v4853_v23  ;;  %1656 = vmatpush.msrb.mxu2 %v4616_v48 }
0x1061   :  { %1615 = vmatpush.msrb.mxu0 %v4860_v24  ;;  %1657 = vmatpush.msrb.mxu2 %v4623_v52 }
0x1063   :  { %1616 = vmatpush.msrb.mxu0 %v4867_v25  ;;  %1658 = vmatpush.msrb.mxu2 %v4630_v54 }
0x1065   :  { %1617 = vmatpush.msrb.mxu0 %v4874_v33  ;;  %1659 = vmatpush.msrb.mxu2 %v4637_v42 }
0x1067   :  { %1618 = vmatpush.msrb.mxu0 %v4881_v35  ;;  %1660 = vmatpush.msrb.mxu2 %v4644_v46 }
0x1069   :  { %1619 = vmatpush.msrb.mxu0 %v4888_v36  ;;  %1661 = vmatpush.msrb.mxu2 %v4651_v30 }
0x106b   :  { %1620 = vmatpush.msrb.mxu0 %v4895_v39  ;;  %1662 = vmatpush.msrb.mxu2 %v4658_v57 }
0x106d   :  { %1621 = vmatpush.msrb.mxu0 %v4902_v41  ;;  %1663 = vmatpush.msrb.mxu2 %v4665_v59 }
0x106f   :  { %1622 = vmatpush.msrb.mxu0 %v4909_v43  ;;  %1664 = vmatpush.msrb.mxu2 %v4672_v40 }
0x1071   :  { %1623 = vmatpush.msrb.mxu0 %v4916_v47  ;;  %1665 = vmatpush.msrb.mxu2 %v4922_v51 }
0x1073   :  { %1624 = vmatpush.msrb.mxu0 %v4928_v38  ;;  %1666 = vmatpush.msrb.mxu2 %v4934_v0 }
0x1075   :  { %1625 = vmatpush.msrb.mxu0 %v6554_v20  ;;  %1667 = vmatpush.msrb.mxu2 %v6555_v31 }
0x1077   :  { %1626 = vmatpush.msrb.mxu0 %v6548_v58  ;;  %1668 = vmatpush.msrb.mxu2 %v6549_v10 }
0x1079   :  { %1627 = vmatpush.msrb.mxu0 %v5062_v63  ;;  %1669 = vmatpush.msrb.mxu2 %v6556_v14 }
0x107b   :  { %1628 = vmatpush.msrb.mxu0 %v5069_v19  ;;  %1670 = vmatpush.msrb.mxu2 %v4962_v34 }
0x10df   :  { %v1494_v20 = vpop.f32.mrf.mxu2 }
0x10e0   :  { %v1495_v0 = vadd.f32 %v1494_v20, %v1474_v60  ;;  %v6558_v20 = vld [vmem:[#allocation11_spill] sm:$0xff] }
0x10e2   :  { %v1497_v31 = vadd.f32 %v2661_v12, %v1495_v0  ;;  %v6557_v0 = vld [vmem:[#allocation4_spill] sm:$0xff] }
0x10e4   :  { %2737 = vtanh.f32 %v1497_v31  ;;  %1514 = vmatmul.f32.vlgmr.msrb.gmra.mxu3 %v1497_v31  ;;  %v6559_v31 = vld [vmem:[#allocation7_spill] sm:$0xff] }
0x10e5   :  { %1676 = vmatpush.msrb.mxu3 %v4693_v4 }
0x10e7   :  { %1677 = vmatpush.msrb.mxu3 %v4699_v22 }
0x10e9   :  { %1678 = vmatpush.msrb.mxu3 %v4705_v26 }
0x10ea   :  { %v2738_v14 = vpop.eup %2737 }
0x10eb   :  { %1562 = vmatmul.f32.vlgmr.msra.gmra.mxu1 %v2738_v14  ;;  %1679 = vmatpush.msrb.mxu3 %v4711_v49  ;;  %v1452_v14 = vpop.f32.mrf.mxu0 }
0x10ec   :  { %1724 = vmatpush.msra.mxu1 %v4717_v2  ;;  %v1453_v60 = vadd.f32 %v5194_v29, %v1452_v14  ;;  %v6562_v14 = vld [vmem:[#allocation14_spill] sm:$0xff] }
0x10ed   :  { %1680 = vmatpush.msrb.mxu3 %v4723_v3 }
0x10ee   :  { %1725 = vmatpush.msra.mxu1 %v4729_v5 }
0x10ef   :  { %1681 = vmatpush.msrb.mxu3 %v4735_v7 }
0x10f0   :  { %1726 = vmatpush.msra.mxu1 %v4741_v9 }
0x10f1   :  { %1682 = vmatpush.msrb.mxu3 %v4747_v27 }
0x10f2   :  { %1727 = vmatpush.msra.mxu1 %v4753_v28 }
0x10f3   :  { %1683 = vmatpush.msrb.mxu3 %v4759_v61 }
0x10f4   :  { %1728 = vmatpush.msra.mxu1 %v4765_v56 }
0x10f5   :  { %1684 = vmatpush.msrb.mxu3 %v4771_v16 }
0x10f6   :  { %1729 = vmatpush.msra.mxu1 %v4777_v37 }
0x10f7   :  { %1685 = vmatpush.msrb.mxu3 %v4986_v21 }
0x10f8   :  { %1730 = vmatpush.msra.mxu1 %v4784_v32 }
0x10f9   :  { %1686 = vmatpush.msrb.mxu3 %v4993_v15 }
0x10fa   :  { %1731 = vmatpush.msra.mxu1 %v4791_v8 }
0x10fb   :  { %1687 = vmatpush.msrb.mxu3 %v5000_v53 }
0x10fc   :  { %1732 = vmatpush.msra.mxu1 %v4798_v17 }
0x10fd   :  { %1688 = vmatpush.msrb.mxu3 %v5007_v18 }
0x10fe   :  { %1733 = vmatpush.msra.mxu1 %v4805_v6 }
0x10ff   :  { %1689 = vmatpush.msrb.mxu3 %v5102_v50 }
0x1100   :  { %1734 = vmatpush.msra.mxu1 %v6551_v1 }
0x1101   :  { %1690 = vmatpush.msrb.mxu3 %v6557_v0 }
0x1102   :  { %1735 = vmatpush.msra.mxu1 %v6558_v20 }
0x1103   :  { %1691 = vmatpush.msrb.mxu3 %v6559_v31 }
0x1104   :  { %1736 = vmatpush.msra.mxu1 %v4826_v62 }
0x1106   :  { %1737 = vmatpush.msra.mxu1 %v4832_v55 }
0x1108   :  { %1738 = vmatpush.msra.mxu1 %v4838_v11 }
0x110a   :  { %1739 = vmatpush.msra.mxu1 %v4844_v13 }
0x1167   :  { %v1515_v12 = vpop.f32.mrf.mxu3 }
0x1168   :  { %v1516_v50 = vadd.f32 %v1515_v12, %v1453_v60  ;;  %v6563_v60 = vld [vmem:[#allocation6_spill] sm:$0xff]  ;;  %v1563_v12 = vpop.f32.mrf.mxu1 }
0x116a   :  { %2739 = vtanh.f32 %v1516_v50  ;;  %v6560_v50 = vld [vmem:[#allocation10_spill] sm:$0xff] }
0x1170   :  { %v2740_v1 = vpop.eup %2739 }
0x1171   :  { %1540 = vmatmul.f32.vlgmr.msra.gmra.mxu0 %v2740_v1  ;;  %1582 = vmatmul.f32.vlgmr.msra.gmra.mxu2 %v2740_v1  ;;  %v6561_v1 = vld [vmem:[#allocation9_spill] sm:$0xff] }
0x1172   :  { %1702 = vmatpush.msra.mxu0 %v4603_v44  ;;  %1744 = vmatpush.msra.mxu2 %v4609_v45 }
0x1174   :  { %1703 = vmatpush.msra.mxu0 %v4853_v23  ;;  %1745 = vmatpush.msra.mxu2 %v4616_v48 }
0x1176   :  { %1704 = vmatpush.msra.mxu0 %v4860_v24  ;;  %1746 = vmatpush.msra.mxu2 %v4623_v52 }
0x1178   :  { %1705 = vmatpush.msra.mxu0 %v4867_v25  ;;  %1747 = vmatpush.msra.mxu2 %v4630_v54 }
0x117a   :  { %1706 = vmatpush.msra.mxu0 %v4874_v33  ;;  %1748 = vmatpush.msra.mxu2 %v4637_v42 }
0x117c   :  { %1707 = vmatpush.msra.mxu0 %v4881_v35  ;;  %1749 = vmatpush.msra.mxu2 %v4644_v46 }
0x117e   :  { %1708 = vmatpush.msra.mxu0 %v4888_v36  ;;  %1750 = vmatpush.msra.mxu2 %v4651_v30 }
0x1180   :  { %1709 = vmatpush.msra.mxu0 %v4895_v39  ;;  %1751 = vmatpush.msra.mxu2 %v4658_v57 }
0x1182   :  { %1710 = vmatpush.msra.mxu0 %v4902_v41  ;;  %1752 = vmatpush.msra.mxu2 %v4665_v59 }
0x1184   :  { %1711 = vmatpush.msra.mxu0 %v4909_v43  ;;  %1753 = vmatpush.msra.mxu2 %v4672_v40 }
0x1186   :  { %1712 = vmatpush.msra.mxu0 %v4916_v47  ;;  %1754 = vmatpush.msra.mxu2 %v4922_v51 }
0x1188   :  { %1713 = vmatpush.msra.mxu0 %v4928_v38  ;;  %1755 = vmatpush.msra.mxu2 %v6560_v50  ;;  %v2662_v50 = vld [vmem:[%s6366_s0 + $0x80] sm:$0xff] }
0x118a   :  { %1714 = vmatpush.msra.mxu0 %v6561_v1  ;;  %1756 = vmatpush.msra.mxu2 %v6562_v14 }
0x118c   :  { %1715 = vmatpush.msra.mxu0 %v6548_v58  ;;  %1757 = vmatpush.msra.mxu2 %v6549_v10 }
0x118e   :  { %1716 = vmatpush.msra.mxu0 %v5062_v63  ;;  %1758 = vmatpush.msra.mxu2 %v6563_v60 }
0x1190   :  { %1717 = vmatpush.msra.mxu0 %v5069_v19  ;;  %1759 = vmatpush.msra.mxu2 %v4962_v34 }
0x11f4   :  { %v1583_v1 = vpop.f32.mrf.mxu2 }
0x11f5   :  { %v1584_v38 = vadd.f32 %v1583_v1, %v1563_v12  ;;  %v1541_v1 = vpop.f32.mrf.mxu0 }
0x11f7   :  { %v1586_v14 = vadd.f32 %v2662_v50, %v1584_v38  ;;  %v6564_v38 = vld [vmem:[#allocation3_spill] sm:$0xff]  ;;  %v6565_v50 = vld [vmem:[#allocation5_spill] sm:$0xff] }
0x11f9   :  { %2741 = vtanh.f32 %v1586_v14  ;;  %1603 = vmatmul.f32.vlgmr.msra.gmra.mxu3 %v1586_v14  ;;  %v1542_v14 = vadd.f32 %v5194_v29, %v1541_v1  ;;  %v5585_v1 = vld [vmem:[%s6362_s1 + $0x48] sm:$0xff] }
0x11fa   :  { %1765 = vmatpush.msra.mxu3 %v4693_v4 }
0x11fc   :  { %1766 = vmatpush.msra.mxu3 %v4699_v22 }
0x11fe   :  { %1767 = vmatpush.msra.mxu3 %v4705_v26 }
0x11ff   :  { %v2742_v60 = vpop.eup %2741 }
0x1200   :  { %1651 = vmatmul.f32.vlgmr.msrb.gmra.mxu1 %v2742_v60  ;;  %1768 = vmatpush.msra.mxu3 %v4711_v49 }
0x1201   :  { %1813 = vmatpush.msrb.mxu1 %v4717_v2 }
0x1202   :  { %1769 = vmatpush.msra.mxu3 %v4723_v3 }
0x1203   :  { %1814 = vmatpush.msrb.mxu1 %v4729_v5 }
0x1204   :  { %1770 = vmatpush.msra.mxu3 %v4735_v7 }
0x1205   :  { %1815 = vmatpush.msrb.mxu1 %v4741_v9 }
0x1206   :  { %1771 = vmatpush.msra.mxu3 %v4747_v27 }
0x1207   :  { %1816 = vmatpush.msrb.mxu1 %v4753_v28 }
0x1208   :  { %1772 = vmatpush.msra.mxu3 %v4759_v61 }
0x1209   :  { %1817 = vmatpush.msrb.mxu1 %v4765_v56 }
0x120a   :  { %1773 = vmatpush.msra.mxu3 %v4771_v16 }
0x120b   :  { %1818 = vmatpush.msrb.mxu1 %v4777_v37 }
0x120c   :  { %1774 = vmatpush.msra.mxu3 %v4986_v21 }
0x120d   :  { %1819 = vmatpush.msrb.mxu1 %v4784_v32 }
0x120e   :  { %1775 = vmatpush.msra.mxu3 %v4993_v15 }
0x120f   :  { %1820 = vmatpush.msrb.mxu1 %v4791_v8 }
0x1210   :  { %1776 = vmatpush.msra.mxu3 %v5000_v53 }
0x1211   :  { %1821 = vmatpush.msrb.mxu1 %v4798_v17 }
0x1212   :  { %1777 = vmatpush.msra.mxu3 %v5007_v18 }
0x1213   :  { %1822 = vmatpush.msrb.mxu1 %v4805_v6 }
0x1214   :  { %1778 = vmatpush.msra.mxu3 %v6564_v38 }
0x1215   :  { %1823 = vmatpush.msrb.mxu1 %v6565_v50 }
0x1216   :  { %1779 = vmatpush.msra.mxu3 %v6557_v0 }
0x1217   :  { %1824 = vmatpush.msrb.mxu1 %v6558_v20 }
0x1218   :  { %1780 = vmatpush.msra.mxu3 %v6559_v31 }
0x1219   :  { %1825 = vmatpush.msrb.mxu1 %v4826_v62 }
0x121b   :  { %1826 = vmatpush.msrb.mxu1 %v4832_v55 }
0x121d   :  { %1827 = vmatpush.msrb.mxu1 %v4838_v11 }
0x121f   :  { %1828 = vmatpush.msrb.mxu1 %v4844_v13 }
0x127c   :  { %v1604_v60 = vpop.f32.mrf.mxu3 }
0x127d   :  { %v1605_v12 = vadd.f32 %v1604_v60, %v1542_v14  ;;  %v5592_v14 = vld [vmem:[%s6362_s1 + $0x40] sm:$0xff]  ;;  %v5627_v60 = vld [vmem:[%s6362_s1 + $0x18] sm:$0xff] }
0x127f   :  { %2743 = vtanh.f32 %v1605_v12  ;;  %v5633_v12 = vld [vmem:[%s6362_s1 + $0x10] sm:$0xff] }
0x1285   :  { %v2744_v50 = vpop.eup %2743 }
0x1286   :  { %1629 = vmatmul.f32.vlgmr.msrb.gmra.mxu0 %v2744_v50  ;;  %1671 = vmatmul.f32.vlgmr.msrb.gmra.mxu2 %v2744_v50  ;;  %v5578_v50 = vld [vmem:[%s6362_s1 + $0x50] sm:$0xff] }
0x1287   :  { %1791 = vmatpush.msrb.mxu0 %v4603_v44  ;;  %1833 = vmatpush.msrb.mxu2 %v4609_v45  ;;  %v6566_v44 = vld [vmem:[#allocation13_spill] sm:$0xff]  ;;  %v6567_v45 = vld [vmem:[#allocation10_spill] sm:$0xff] }
0x1289   :  { %1792 = vmatpush.msrb.mxu0 %v4853_v23  ;;  %1834 = vmatpush.msrb.mxu2 %v4616_v48  ;;  %v6568_v48 = vld [vmem:[#allocation9_spill] sm:$0xff] }
0x128b   :  { %1793 = vmatpush.msrb.mxu0 %v4860_v24  ;;  %1835 = vmatpush.msrb.mxu2 %v4623_v52  ;;  %v6569_v52 = vld [vmem:[#allocation14_spill] sm:$0xff] }
0x128d   :  { %1794 = vmatpush.msrb.mxu0 %v4867_v25  ;;  %1836 = vmatpush.msrb.mxu2 %v4630_v54  ;;  %v6570_v54 = vld [vmem:[#allocation6_spill] sm:$0xff] }
0x128f   :  { %1795 = vmatpush.msrb.mxu0 %v4874_v33  ;;  %1837 = vmatpush.msrb.mxu2 %v4637_v42  ;;  %v1652_v42 = vpop.f32.mrf.mxu1 }
0x1291   :  { %1796 = vmatpush.msrb.mxu0 %v4881_v35  ;;  %1838 = vmatpush.msrb.mxu2 %v4644_v46  ;;  %v2663_v46 = vld [vmem:[%s6366_s0 + $0x88] sm:$0xff] }
0x1293   :  { %1797 = vmatpush.msrb.mxu0 %v4888_v36  ;;  %1839 = vmatpush.msrb.mxu2 %v4651_v30 }
0x1295   :  { %1798 = vmatpush.msrb.mxu0 %v4895_v39  ;;  %1840 = vmatpush.msrb.mxu2 %v4658_v57 }
0x1297   :  { %1799 = vmatpush.msrb.mxu0 %v4902_v41  ;;  %1841 = vmatpush.msrb.mxu2 %v4665_v59 }
0x1299   :  { %1800 = vmatpush.msrb.mxu0 %v4909_v43  ;;  %1842 = vmatpush.msrb.mxu2 %v4672_v40 }
0x129b   :  { %1801 = vmatpush.msrb.mxu0 %v4916_v47  ;;  %1843 = vmatpush.msrb.mxu2 %v4922_v51 }
0x129d   :  { %1802 = vmatpush.msrb.mxu0 %v6566_v44  ;;  %1844 = vmatpush.msrb.mxu2 %v6567_v45 }
0x129f   :  { %1803 = vmatpush.msrb.mxu0 %v6568_v48  ;;  %1845 = vmatpush.msrb.mxu2 %v6569_v52 }
0x12a1   :  { %1804 = vmatpush.msrb.mxu0 %v6548_v58  ;;  %1846 = vmatpush.msrb.mxu2 %v6549_v10 }
0x12a3   :  { %1805 = vmatpush.msrb.mxu0 %v5062_v63  ;;  %1847 = vmatpush.msrb.mxu2 %v6570_v54 }
0x12a5   :  { %1806 = vmatpush.msrb.mxu0 %v5069_v19  ;;  %1848 = vmatpush.msrb.mxu2 %v4962_v34 }
0x1309   :  { %v1672_v30 = vpop.f32.mrf.mxu2 }
0x130a   :  { %v1673_v57 = vadd.f32 %v1672_v30, %v1652_v42 }
0x130c   :  { %v1675_v59 = vadd.f32 %v2663_v46, %v1673_v57  ;;  %v5654_v57 = vld [vmem:[%s6364_s3 + $0x70] sm:$0xff] }
0x130e   :  { %2745 = vtanh.f32 %v1675_v59  ;;  %1692 = vmatmul.f32.vlgmr.msrb.gmra.mxu3 %v1675_v59  ;;  %v5661_v59 = vld [vmem:[%s6364_s3 + $0x68] sm:$0xff] }
0x130f   :  { %1854 = vmatpush.msrb.mxu3 %v4693_v4  ;;  %v6571_v4 = vld [vmem:[#allocation5_spill] sm:$0xff] }
0x1311   :  { %1855 = vmatpush.msrb.mxu3 %v4699_v22  ;;  %v1630_v22 = vpop.f32.mrf.mxu0 }
0x1313   :  { %1856 = vmatpush.msrb.mxu3 %v4705_v26  ;;  %v1631_v26 = vadd.f32 %v5194_v29, %v1630_v22  ;;  %v5682_v22 = vld [vmem:[%s6364_s3 + $0x50] sm:$0xff] }
0x1314   :  { %v2746_v40 = vpop.eup %2745 }
0x1315   :  { %1740 = vmatmul.f32.vlgmr.msra.gmra.mxu1 %v2746_v40  ;;  %1857 = vmatpush.msrb.mxu3 %v4711_v49  ;;  %v5668_v40 = vld [vmem:[%s6364_s3 + $0x60] sm:$0xff] }
0x1316   :  { %1902 = vmatpush.msra.mxu1 %v4717_v2 }
0x1317   :  { %1858 = vmatpush.msrb.mxu3 %v4723_v3 }
0x1318   :  { %1903 = vmatpush.msra.mxu1 %v4729_v5  ;;  %v5404_v5 = vld [vmem:[%s6364_s3 + $0x78] sm:$0xff] }
0x1319   :  { %1859 = vmatpush.msrb.mxu3 %v4735_v7  ;;  %v5410_v7 = vld [vmem:[%s6362_s1 + $0xf8] sm:$0xff] }
0x131a   :  { %1904 = vmatpush.msra.mxu1 %v4741_v9  ;;  %v5417_v9 = vld [vmem:[%s6362_s1 + $0xf0] sm:$0xff] }
0x131b   :  { %1860 = vmatpush.msrb.mxu3 %v4747_v27  ;;  %v5424_v27 = vld [vmem:[%s6362_s1 + $0xe8] sm:$0xff] }
0x131c   :  { %1905 = vmatpush.msra.mxu1 %v4753_v28  ;;  %v5431_v28 = vld [vmem:[%s6362_s1 + $0xe0] sm:$0xff] }
0x131d   :  { %1861 = vmatpush.msrb.mxu3 %v4759_v61  ;;  %v5438_v61 = vld [vmem:[%s6362_s1 + $0xd8] sm:$0xff] }
0x131e   :  { %1906 = vmatpush.msra.mxu1 %v4765_v56  ;;  %v5445_v56 = vld [vmem:[%s6362_s1 + $0xd0] sm:$0xff] }
0x131f   :  { %1862 = vmatpush.msrb.mxu3 %v4771_v16  ;;  %v5452_v16 = vld [vmem:[%s6362_s1 + $0xc8] sm:$0xff] }
0x1320   :  { %1907 = vmatpush.msra.mxu1 %v4777_v37  ;;  %v5459_v37 = vld [vmem:[%s6362_s1 + $0xc0] sm:$0xff] }
0x1321   :  { %1863 = vmatpush.msrb.mxu3 %v4986_v21 }
0x1322   :  { %1908 = vmatpush.msra.mxu1 %v4784_v32  ;;  %v5466_v32 = vld [vmem:[%s6362_s1 + $0xb8] sm:$0xff] }
0x1323   :  { %1864 = vmatpush.msrb.mxu3 %v4993_v15 }
0x1324   :  { %1909 = vmatpush.msra.mxu1 %v4791_v8  ;;  %v5473_v8 = vld [vmem:[%s6362_s1 + $0xb0] sm:$0xff] }
0x1325   :  { %1865 = vmatpush.msrb.mxu3 %v5000_v53 }
0x1326   :  { %1910 = vmatpush.msra.mxu1 %v4798_v17 }
0x1327   :  { %1866 = vmatpush.msrb.mxu3 %v5007_v18 }
0x1328   :  { %1911 = vmatpush.msra.mxu1 %v4805_v6  ;;  %v2664_v6 = vld [vmem:[%s6366_s0 + $0x90] sm:$0xff] }
0x1329   :  { %1867 = vmatpush.msrb.mxu3 %v6564_v38 }
0x132a   :  { %1912 = vmatpush.msra.mxu1 %v6571_v4  ;;  %v5675_v4 = vld [vmem:[%s6364_s3 + $0x58] sm:$0xff] }
0x132b   :  { %1868 = vmatpush.msrb.mxu3 %v6557_v0 }
0x132c   :  { %1913 = vmatpush.msra.mxu1 %v6558_v20  ;;  %v5572_v20 = vld [vmem:[%s6363_s2 + $0x38] sm:$0xff] }
0x132d   :  { %1869 = vmatpush.msrb.mxu3 %v6559_v31 }
0x132e   :  { %1914 = vmatpush.msra.mxu1 %v4826_v62 }
0x1330   :  { %1915 = vmatpush.msra.mxu1 %v4832_v55 }
0x1332   :  { %1916 = vmatpush.msra.mxu1 %v4838_v11 }
0x1334   :  { %1917 = vmatpush.msra.mxu1 %v4844_v13  ;;  %v5494_v13 = vld [vmem:[%s6363_s2 + $0x78] sm:$0xff] }
0x1391   :  { %v1693_v49 = vpop.f32.mrf.mxu3 }
0x1392   :  { %v1694_v2 = vadd.f32 %v1693_v49, %v1631_v26  ;;  %v1741_v17 = vpop.f32.mrf.mxu1  ;;  %v5689_v26 = vld [vmem:[%s6364_s3 + $0x48] sm:$0xff]  ;;  %v5696_v49 = vld [vmem:[%s6364_s3 + $0x40] sm:$0xff] }
0x1394   :  { %2747 = vtanh.f32 %v1694_v2  ;;  %v5703_v2 = vld [vmem:[%s6364_s3 + $0x38] sm:$0xff] }
0x139a   :  { %v2748_v3 = vpop.eup %2747 }
0x139b   :  { %1718 = vmatmul.f32.vlgmr.msra.gmra.mxu0 %v2748_v3  ;;  %1760 = vmatmul.f32.vlgmr.msra.gmra.mxu2 %v2748_v3  ;;  %v5710_v3 = vld [vmem:[%s6364_s3 + $0x30] sm:$0xff] }
0x139c   :  { %1880 = vmatpush.msra.mxu0 %v5404_v5  ;;  %1922 = vmatpush.msra.mxu2 %v5410_v7 }
0x139e   :  { %1881 = vmatpush.msra.mxu0 %v4853_v23  ;;  %1923 = vmatpush.msra.mxu2 %v5417_v9  ;;  %v5500_v23 = vld [vmem:[%s6363_s2 + $0x70] sm:$0xff] }
0x13a0   :  { %1882 = vmatpush.msra.mxu0 %v4860_v24  ;;  %1924 = vmatpush.msra.mxu2 %v5424_v27  ;;  %v5506_v24 = vld [vmem:[%s6363_s2 + $0x68] sm:$0xff] }
0x13a2   :  { %1883 = vmatpush.msra.mxu0 %v4867_v25  ;;  %1925 = vmatpush.msra.mxu2 %v5431_v28 }
0x13a4   :  { %1884 = vmatpush.msra.mxu0 %v4874_v33  ;;  %1926 = vmatpush.msra.mxu2 %v5438_v61  ;;  %v5512_v33 = vld [vmem:[%s6363_s2 + $0x60] sm:$0xff] }
0x13a6   :  { %1885 = vmatpush.msra.mxu0 %v4881_v35  ;;  %1927 = vmatpush.msra.mxu2 %v5445_v56  ;;  %v5518_v35 = vld [vmem:[%s6362_s1 + $0x78] sm:$0xff] }
0x13a8   :  { %1886 = vmatpush.msra.mxu0 %v4888_v36  ;;  %1928 = vmatpush.msra.mxu2 %v5452_v16  ;;  %v5524_v36 = vld [vmem:[%s6363_s2 + $0x58] sm:$0xff] }
0x13aa   :  { %1887 = vmatpush.msra.mxu0 %v4895_v39  ;;  %1929 = vmatpush.msra.mxu2 %v5459_v37  ;;  %v5530_v39 = vld [vmem:[%s6362_s1 + $0x70] sm:$0xff] }
0x13ac   :  { %1888 = vmatpush.msra.mxu0 %v4902_v41  ;;  %1930 = vmatpush.msra.mxu2 %v5466_v32  ;;  %v5536_v41 = vld [vmem:[%s6363_s2 + $0x50] sm:$0xff] }
0x13ae   :  { %1889 = vmatpush.msra.mxu0 %v4909_v43  ;;  %1931 = vmatpush.msra.mxu2 %v5473_v8  ;;  %v5542_v43 = vld [vmem:[%s6362_s1 + $0x68] sm:$0xff] }
0x13b0   :  { %1890 = vmatpush.msra.mxu0 %v4916_v47  ;;  %1932 = vmatpush.msra.mxu2 %v4922_v51  ;;  %v5548_v47 = vld [vmem:[%s6363_s2 + $0x48] sm:$0xff]  ;;  %v5554_v51 = vld [vmem:[%s6362_s1 + $0x60] sm:$0xff] }
0x13b2   :  { %1891 = vmatpush.msra.mxu0 %v6566_v44  ;;  %1933 = vmatpush.msra.mxu2 %v6567_v45  ;;  %v5639_v44 = vld [vmem:[%s6362_s1 + $0x8] sm:$0xff]  ;;  %v5645_v45 = vld [vmem:[%s6362_s1] sm:$0xff] }
0x13b4   :  { %1892 = vmatpush.msra.mxu0 %v6568_v48  ;;  %1934 = vmatpush.msra.mxu2 %v6569_v52 }
0x13b6   :  { %1893 = vmatpush.msra.mxu0 %v6548_v58  ;;  %1935 = vmatpush.msra.mxu2 %v6549_v10  ;;  %v5566_v10 = vld [vmem:[%s6362_s1 + $0x58] sm:$0xff] }
0x13b8   :  { %1894 = vmatpush.msra.mxu0 %v5062_v63  ;;  %1936 = vmatpush.msra.mxu2 %v6570_v54 }
0x13ba   :  { %1895 = vmatpush.msra.mxu0 %v5069_v19  ;;  %1937 = vmatpush.msra.mxu2 %v4962_v34  ;;  %v5560_v34 = vld [vmem:[%s6363_s2 + $0x40] sm:$0xff] }
0x1418   :  { %v1719_v52 = vpop.f32.mrf.mxu0 }
0x1419   :  { %v1720_v54 = vadd.f32 %v5194_v29, %v1719_v52 }
0x141e   :  { %v1761_v62 = vpop.f32.mrf.mxu2 }
0x141f   :  { %v1762_v55 = vadd.f32 %v1761_v62, %v1741_v17  ;;  %v5717_v17 = vld [vmem:[%s6364_s3 + $0x28] sm:$0xff]  ;;  %v5729_v62 = vld [vmem:[%s6364_s3 + $0x20] sm:$0xff] }
0x1420   :  { %6574 = vst [vmem:[#allocation4_spill] sm:$0xff] %v5729_v62 }
0x1421   :  { %v1764_v11 = vadd.f32 %v2664_v6, %v1762_v55  ;;  %v5723_v6 = vld [vmem:[%s6362_s1 + $0xa8] sm:$0xff]  ;;  %v5735_v55 = vld [vmem:[%s6362_s1 + $0xa0] sm:$0xff] }
0x1422   :  { %6575 = vst [vmem:[#allocation11_spill] sm:$0xff] %v5735_v55 }
0x1423   :  { %2749 = vtanh.f32 %v1764_v11  ;;  %1781 = vmatmul.f32.vlgmr.msra.gmra.mxu3 %v1764_v11  ;;  %v5742_v11 = vld [vmem:[%s6362_s1 + $0x98] sm:$0xff] }
0x1424   :  { %1943 = vmatpush.msra.mxu3 %v5494_v13  ;;  %6576 = vst [vmem:[#allocation7_spill] sm:$0xff] %v5742_v11 }
0x1426   :  { %1944 = vmatpush.msra.mxu3 %v5500_v23 }
0x1428   :  { %1945 = vmatpush.msra.mxu3 %v5506_v24 }
0x1429   :  { %v2750_v25 = vpop.eup %2749 }
0x142a   :  { %1829 = vmatmul.f32.vlgmr.msrb.gmra.mxu1 %v2750_v25  ;;  %1946 = vmatpush.msra.mxu3 %v5512_v33  ;;  %v5749_v25 = vld [vmem:[%s6362_s1 + $0x90] sm:$0xff] }
0x142b   :  { %1991 = vmatpush.msrb.mxu1 %v5518_v35  ;;  %6577 = vst [vmem:[#allocation3_spill] sm:$0xff] %v5749_v25 }
0x142c   :  { %1947 = vmatpush.msra.mxu3 %v5524_v36 }
0x142d   :  { %1992 = vmatpush.msrb.mxu1 %v5530_v39 }
0x142e   :  { %1948 = vmatpush.msra.mxu3 %v5536_v41 }
0x142f   :  { %1993 = vmatpush.msrb.mxu1 %v5542_v43 }
0x1430   :  { %1949 = vmatpush.msra.mxu3 %v5548_v47 }
0x1431   :  { %1994 = vmatpush.msrb.mxu1 %v5554_v51 }
0x1432   :  { %1950 = vmatpush.msra.mxu3 %v5560_v34 }
0x1433   :  { %1995 = vmatpush.msrb.mxu1 %v5566_v10 }
0x1434   :  { %1951 = vmatpush.msra.mxu3 %v5572_v20 }
0x1435   :  { %1996 = vmatpush.msrb.mxu1 %v5578_v50 }
0x1436   :  { %1952 = vmatpush.msra.mxu3 %v4986_v21  ;;  %v5599_v21 = vld [vmem:[%s6362_s1 + $0x38] sm:$0xff] }
0x1437   :  { %1997 = vmatpush.msrb.mxu1 %v5585_v1 }
0x1438   :  { %1953 = vmatpush.msra.mxu3 %v4993_v15  ;;  %v5606_v15 = vld [vmem:[%s6362_s1 + $0x30] sm:$0xff] }
0x1439   :  { %1998 = vmatpush.msrb.mxu1 %v5592_v14 }
0x143a   :  { %1954 = vmatpush.msra.mxu3 %v5000_v53  ;;  %v5613_v53 = vld [vmem:[%s6362_s1 + $0x28] sm:$0xff] }
0x143b   :  { %1999 = vmatpush.msrb.mxu1 %v5599_v21  ;;  %6572 = vst [vmem:[#allocation12_spill] sm:$0xff] %v5613_v53 }
0x143c   :  { %1955 = vmatpush.msra.mxu3 %v5007_v18  ;;  %v5620_v18 = vld [vmem:[%s6362_s1 + $0x20] sm:$0xff] }
0x143d   :  { %2000 = vmatpush.msrb.mxu1 %v5606_v15  ;;  %6573 = vst [vmem:[#allocation8_spill] sm:$0xff] %v5620_v18 }
0x143e   :  { %1956 = vmatpush.msra.mxu3 %v6564_v38 }
0x143f   :  { %2001 = vmatpush.msrb.mxu1 %v5613_v53 }
0x1440   :  { %1957 = vmatpush.msra.mxu3 %v6557_v0 }
0x1441   :  { %2002 = vmatpush.msrb.mxu1 %v5620_v18 }
0x1442   :  { %1958 = vmatpush.msra.mxu3 %v6559_v31 }
0x1443   :  { %2003 = vmatpush.msrb.mxu1 %v5627_v60 }
0x1445   :  { %2004 = vmatpush.msrb.mxu1 %v5633_v12 }
0x1447   :  { %2005 = vmatpush.msrb.mxu1 %v5639_v44 }
0x1449   :  { %2006 = vmatpush.msrb.mxu1 %v5645_v45 }
0x14a6   :  { %v1782_v42 = vpop.f32.mrf.mxu3 }
0x14a7   :  { %v1783_v46 = vadd.f32 %v1782_v42, %v1720_v54  ;;  %v1830_v52 = vpop.f32.mrf.mxu1 }
0x14a9   :  { %2751 = vtanh.f32 %v1783_v46 }
0x14af   :  { %v2752_v30 = vpop.eup %2751 }
0x14b0   :  { %1807 = vmatmul.f32.vlgmr.msrb.gmra.mxu0 %v2752_v30  ;;  %1849 = vmatmul.f32.vlgmr.msrb.gmra.mxu2 %v2752_v30  ;;  %v5787_v30 = vld [vmem:[%s6363_s2 + $0x30] sm:$0xff] }
0x14b1   :  { %1969 = vmatpush.msrb.mxu0 %v5404_v5  ;;  %2011 = vmatpush.msrb.mxu2 %v5410_v7 }
0x14b3   :  { %1970 = vmatpush.msrb.mxu0 %v5654_v57  ;;  %2012 = vmatpush.msrb.mxu2 %v5417_v9 }
0x14b5   :  { %1971 = vmatpush.msrb.mxu0 %v5661_v59  ;;  %2013 = vmatpush.msrb.mxu2 %v5424_v27 }
0x14b7   :  { %1972 = vmatpush.msrb.mxu0 %v5668_v40  ;;  %2014 = vmatpush.msrb.mxu2 %v5431_v28 }
0x14b9   :  { %1973 = vmatpush.msrb.mxu0 %v5675_v4  ;;  %2015 = vmatpush.msrb.mxu2 %v5438_v61 }
0x14bb   :  { %1974 = vmatpush.msrb.mxu0 %v5682_v22  ;;  %2016 = vmatpush.msrb.mxu2 %v5445_v56 }
0x14bd   :  { %1975 = vmatpush.msrb.mxu0 %v5689_v26  ;;  %2017 = vmatpush.msrb.mxu2 %v5452_v16 }
0x14bf   :  { %1976 = vmatpush.msrb.mxu0 %v5696_v49  ;;  %2018 = vmatpush.msrb.mxu2 %v5459_v37 }
0x14c1   :  { %1977 = vmatpush.msrb.mxu0 %v5703_v2  ;;  %2019 = vmatpush.msrb.mxu2 %v5466_v32 }
0x14c3   :  { %1978 = vmatpush.msrb.mxu0 %v5710_v3  ;;  %2020 = vmatpush.msrb.mxu2 %v5473_v8 }
0x14c5   :  { %1979 = vmatpush.msrb.mxu0 %v5717_v17  ;;  %2021 = vmatpush.msrb.mxu2 %v5723_v6 }
0x14c7   :  { %1980 = vmatpush.msrb.mxu0 %v5729_v62  ;;  %2022 = vmatpush.msrb.mxu2 %v5735_v55 }
0x14c9   :  { %1981 = vmatpush.msrb.mxu0 %v6568_v48  ;;  %2023 = vmatpush.msrb.mxu2 %v5742_v11  ;;  %v5756_v48 = vld [vmem:[%s6362_s1 + $0x88] sm:$0xff] }
0x14ca   :  { %6578 = vst [vmem:[#allocation13_spill] sm:$0xff] %v5756_v48 }
0x14cb   :  { %1982 = vmatpush.msrb.mxu0 %v6548_v58  ;;  %2024 = vmatpush.msrb.mxu2 %v5749_v25  ;;  %v5763_v58 = vld [vmem:[%s6362_s1 + $0x80] sm:$0xff] }
0x14cd   :  { %1983 = vmatpush.msrb.mxu0 %v5062_v63  ;;  %2025 = vmatpush.msrb.mxu2 %v5756_v48  ;;  %v2665_v63 = vld [vmem:[%s6366_s0 + $0x98] sm:$0xff] }
0x14cf   :  { %1984 = vmatpush.msrb.mxu0 %v5069_v19  ;;  %2026 = vmatpush.msrb.mxu2 %v5763_v58 }
0x1533   :  { %v1850_v54 = vpop.f32.mrf.mxu2 }
0x1534   :  { %v1851_v42 = vadd.f32 %v1850_v54, %v1830_v52  ;;  %v5794_v52 = vld [vmem:[%s6363_s2 + $0x28] sm:$0xff]  ;;  %v5808_v54 = vld [vmem:[%s6363_s2 + $0x18] sm:$0xff] }
0x1536   :  { %v1853_v46 = vadd.f32 %v2665_v63, %v1851_v42  ;;  %v5801_v63 = vld [vmem:[%s6363_s2 + $0x20] sm:$0xff]  ;;  %v1808_v42 = vpop.f32.mrf.mxu0 }
0x1538   :  { %2753 = vtanh.f32 %v1853_v46  ;;  %1870 = vmatmul.f32.vlgmr.msrb.gmra.mxu3 %v1853_v46  ;;  %v1809_v46 = vadd.f32 %v5194_v29, %v1808_v42  ;;  %v5870_v42 = vld [vmem:[%s6364_s3] sm:$0xff] }
0x1539   :  { %2032 = vmatpush.msrb.mxu3 %v5494_v13 }
0x153b   :  { %2033 = vmatpush.msrb.mxu3 %v5500_v23 }
0x153d   :  { %2034 = vmatpush.msrb.mxu3 %v5506_v24 }
0x153e   :  { %v2754_v19 = vpop.eup %2753 }
0x153f   :  { %1918 = vmatmul.f32.vlgmr.msra.gmra.mxu1 %v2754_v19  ;;  %2035 = vmatpush.msrb.mxu3 %v5512_v33 }
0x1540   :  { %2080 = vmatpush.msra.mxu1 %v5518_v35 }
0x1541   :  { %2036 = vmatpush.msrb.mxu3 %v5524_v36 }
0x1542   :  { %2081 = vmatpush.msra.mxu1 %v5530_v39 }
0x1543   :  { %2037 = vmatpush.msrb.mxu3 %v5536_v41 }
0x1544   :  { %2082 = vmatpush.msra.mxu1 %v5542_v43 }
0x1545   :  { %2038 = vmatpush.msrb.mxu3 %v5548_v47 }
0x1546   :  { %2083 = vmatpush.msra.mxu1 %v5554_v51 }
0x1547   :  { %2039 = vmatpush.msrb.mxu3 %v5560_v34 }
0x1548   :  { %2084 = vmatpush.msra.mxu1 %v5566_v10 }
0x1549   :  { %2040 = vmatpush.msrb.mxu3 %v5572_v20 }
0x154a   :  { %2085 = vmatpush.msra.mxu1 %v5578_v50 }
0x154b   :  { %2041 = vmatpush.msrb.mxu3 %v5787_v30 }
0x154c   :  { %2086 = vmatpush.msra.mxu1 %v5585_v1 }
0x154d   :  { %2042 = vmatpush.msrb.mxu3 %v5794_v52 }
0x154e   :  { %2087 = vmatpush.msra.mxu1 %v5592_v14 }
0x154f   :  { %2043 = vmatpush.msrb.mxu3 %v5801_v63 }
0x1550   :  { %2088 = vmatpush.msra.mxu1 %v5599_v21 }
0x1551   :  { %2044 = vmatpush.msrb.mxu3 %v5808_v54 }
0x1552   :  { %2089 = vmatpush.msra.mxu1 %v5606_v15 }
0x1553   :  { %2045 = vmatpush.msrb.mxu3 %v6564_v38 }
0x1554   :  { %2090 = vmatpush.msra.mxu1 %v5613_v53 }
0x1555   :  { %2046 = vmatpush.msrb.mxu3 %v6557_v0  ;;  %v5849_v0 = vld [vmem:[%s6364_s3 + $0x18] sm:$0xff] }
0x1556   :  { %2091 = vmatpush.msra.mxu1 %v5620_v18  ;;  %6579 = vst [vmem:[#allocation10_spill] sm:$0xff] %v5849_v0 }
0x1557   :  { %2047 = vmatpush.msrb.mxu3 %v6559_v31  ;;  %v5856_v31 = vld [vmem:[%s6364_s3 + $0x10] sm:$0xff] }
0x1558   :  { %2092 = vmatpush.msra.mxu1 %v5627_v60  ;;  %6580 = vst [vmem:[#allocation9_spill] sm:$0xff] %v5856_v31 }
0x155a   :  { %2093 = vmatpush.msra.mxu1 %v5633_v12 }
0x155c   :  { %2094 = vmatpush.msra.mxu1 %v5639_v44 }
0x155e   :  { %2095 = vmatpush.msra.mxu1 %v5645_v45 }
0x15bb   :  { %v1871_v38 = vpop.f32.mrf.mxu3 }
0x15bc   :  { %v1872_v19 = vadd.f32 %v1871_v38, %v1809_v46  ;;  %v1919_v46 = vpop.f32.mrf.mxu1  ;;  %v2666_v38 = vld [vmem:[%s6366_s0 + $0xa0] sm:$0xff] }
0x15be   :  { %2755 = vtanh.f32 %v1872_v19 }
0x15c4   :  { %v2756_v53 = vpop.eup %2755 }
0x15c5   :  { %1896 = vmatmul.f32.vlgmr.msra.gmra.mxu0 %v2756_v53  ;;  %1938 = vmatmul.f32.vlgmr.msra.gmra.mxu2 %v2756_v53  ;;  %v5863_v53 = vld [vmem:[%s6364_s3 + $0x8] sm:$0xff] }
0x15c6   :  { %2058 = vmatpush.msra.mxu0 %v5404_v5  ;;  %2100 = vmatpush.msra.mxu2 %v5410_v7 }
0x15c8   :  { %2059 = vmatpush.msra.mxu0 %v5654_v57  ;;  %2101 = vmatpush.msra.mxu2 %v5417_v9 }
0x15ca   :  { %2060 = vmatpush.msra.mxu0 %v5661_v59  ;;  %2102 = vmatpush.msra.mxu2 %v5424_v27 }
0x15cc   :  { %2061 = vmatpush.msra.mxu0 %v5668_v40  ;;  %2103 = vmatpush.msra.mxu2 %v5431_v28 }
0x15ce   :  { %2062 = vmatpush.msra.mxu0 %v5675_v4  ;;  %2104 = vmatpush.msra.mxu2 %v5438_v61 }
0x15d0   :  { %2063 = vmatpush.msra.mxu0 %v5682_v22  ;;  %2105 = vmatpush.msra.mxu2 %v5445_v56 }
0x15d2   :  { %2064 = vmatpush.msra.mxu0 %v5689_v26  ;;  %2106 = vmatpush.msra.mxu2 %v5452_v16 }
0x15d4   :  { %2065 = vmatpush.msra.mxu0 %v5696_v49  ;;  %2107 = vmatpush.msra.mxu2 %v5459_v37 }
0x15d6   :  { %2066 = vmatpush.msra.mxu0 %v5703_v2  ;;  %2108 = vmatpush.msra.mxu2 %v5466_v32 }
0x15d8   :  { %2067 = vmatpush.msra.mxu0 %v5710_v3  ;;  %2109 = vmatpush.msra.mxu2 %v5473_v8 }
0x15da   :  { %2068 = vmatpush.msra.mxu0 %v5717_v17  ;;  %2110 = vmatpush.msra.mxu2 %v5723_v6 }
0x15dc   :  { %2069 = vmatpush.msra.mxu0 %v5729_v62  ;;  %2111 = vmatpush.msra.mxu2 %v5735_v55 }
0x15de   :  { %2070 = vmatpush.msra.mxu0 %v5849_v0  ;;  %2112 = vmatpush.msra.mxu2 %v5742_v11 }
0x15e0   :  { %2071 = vmatpush.msra.mxu0 %v5856_v31  ;;  %2113 = vmatpush.msra.mxu2 %v5749_v25 }
0x15e2   :  { %2072 = vmatpush.msra.mxu0 %v5863_v53  ;;  %2114 = vmatpush.msra.mxu2 %v5756_v48 }
0x15e4   :  { %2073 = vmatpush.msra.mxu0 %v5870_v42  ;;  %2115 = vmatpush.msra.mxu2 %v5763_v58 }
0x1648   :  { %v1939_v19 = vpop.f32.mrf.mxu2 }
0x1649   :  { %v1940_v25 = vadd.f32 %v1939_v19, %v1919_v46  ;;  %v5917_v46 = vld [vmem:[%s6363_s2] sm:$0xff] }
0x164a   :  { %6584 = vst [vmem:[#allocation5_spill] sm:$0xff] %v5917_v46 }
0x164b   :  { %v1942_v31 = vadd.f32 %v2666_v38, %v1940_v25  ;;  %v5903_v25 = vld [vmem:[%s6363_s2 + $0x10] sm:$0xff]  ;;  %v1897_v38 = vpop.f32.mrf.mxu0 }
0x164c   :  { %6581 = vst [vmem:[#allocation14_spill] sm:$0xff] %v5903_v25  ;;  %v1898_v19 = vadd.f32 %v5194_v29, %v1897_v38  ;;  %v6585_v29 = vld [vmem:[#allocation9_spill] sm:$0xff]  ;;  %v2667_v38 = vld [vmem:[%s6366_s0 + $0xa8] sm:$0xff] }
0x164d   :  { %2757 = vtanh.f32 %v1942_v31  ;;  %1959 = vmatmul.f32.vlgmr.msra.gmra.mxu3 %v1942_v31  ;;  %v5910_v31 = vld [vmem:[%s6363_s2 + $0x8] sm:$0xff] }
0x164e   :  { %2121 = vmatpush.msra.mxu3 %v5494_v13  ;;  %6583 = vst [vmem:[#allocation6_spill] sm:$0xff] %v5910_v31 }
0x1650   :  { %2122 = vmatpush.msra.mxu3 %v5500_v23 }
0x1652   :  { %2123 = vmatpush.msra.mxu3 %v5506_v24 }
0x1653   :  { %v2758_v48 = vpop.eup %2757 }
0x1654   :  { %2007 = vmatmul.f32.vlgmr.msrb.gmra.mxu1 %v2758_v48  ;;  %2124 = vmatpush.msra.mxu3 %v5512_v33  ;;  %v6582_v48 = vld [vmem:[#allocation12_spill] sm:$0xff] }
0x1655   :  { %2169 = vmatpush.msrb.mxu1 %v5518_v35 }
0x1656   :  { %2125 = vmatpush.msra.mxu3 %v5524_v36 }
0x1657   :  { %2170 = vmatpush.msrb.mxu1 %v5530_v39 }
0x1658   :  { %2126 = vmatpush.msra.mxu3 %v5536_v41 }
0x1659   :  { %2171 = vmatpush.msrb.mxu1 %v5542_v43 }
0x165a   :  { %2127 = vmatpush.msra.mxu3 %v5548_v47 }
0x165b   :  { %2172 = vmatpush.msrb.mxu1 %v5554_v51 }
0x165c   :  { %2128 = vmatpush.msra.mxu3 %v5560_v34 }
0x165d   :  { %2173 = vmatpush.msrb.mxu1 %v5566_v10 }
0x165e   :  { %2129 = vmatpush.msra.mxu3 %v5572_v20 }
0x165f   :  { %2174 = vmatpush.msrb.mxu1 %v5578_v50 }
0x1660   :  { %2130 = vmatpush.msra.mxu3 %v5787_v30 }
0x1661   :  { %2175 = vmatpush.msrb.mxu1 %v5585_v1 }
0x1662   :  { %2131 = vmatpush.msra.mxu3 %v5794_v52 }
0x1663   :  { %2176 = vmatpush.msrb.mxu1 %v5592_v14 }
0x1664   :  { %2132 = vmatpush.msra.mxu3 %v5801_v63 }
0x1665   :  { %2177 = vmatpush.msrb.mxu1 %v5599_v21 }
0x1666   :  { %2133 = vmatpush.msra.mxu3 %v5808_v54 }
0x1667   :  { %2178 = vmatpush.msrb.mxu1 %v5606_v15 }
0x1668   :  { %2134 = vmatpush.msra.mxu3 %v5903_v25 }
0x1669   :  { %2179 = vmatpush.msrb.mxu1 %v6582_v48 }
0x166a   :  { %2135 = vmatpush.msra.mxu3 %v5910_v31 }
0x166b   :  { %2180 = vmatpush.msrb.mxu1 %v5620_v18 }
0x166c   :  { %2136 = vmatpush.msra.mxu3 %v5917_v46 }
0x166d   :  { %2181 = vmatpush.msrb.mxu1 %v5627_v60 }
0x166f   :  { %2182 = vmatpush.msrb.mxu1 %v5633_v12 }
0x1671   :  { %2183 = vmatpush.msrb.mxu1 %v5639_v44 }
0x1673   :  { %2184 = vmatpush.msrb.mxu1 %v5645_v45 }
0x16d0   :  { %v1960_v31 = vpop.f32.mrf.mxu3 }
0x16d1   :  { %v1961_v18 = vadd.f32 %v1960_v31, %v1898_v19  ;;  %v2008_v31 = vpop.f32.mrf.mxu1 }
0x16d3   :  { %2759 = vtanh.f32 %v1961_v18  ;;  %v6586_v18 = vld [vmem:[#allocation3_spill] sm:$0xff] }
0x16d9   :  { %v2760_v48 = vpop.eup %2759 }
0x16da   :  { %1985 = vmatmul.f32.vlgmr.msrb.gmra.mxu0 %v2760_v48  ;;  %2027 = vmatmul.f32.vlgmr.msrb.gmra.mxu2 %v2760_v48  ;;  %v6587_v48 = vld [vmem:[#allocation13_spill] sm:$0xff] }
0x16db   :  { %2147 = vmatpush.msrb.mxu0 %v5404_v5  ;;  %2189 = vmatpush.msrb.mxu2 %v5410_v7 }
0x16dd   :  { %2148 = vmatpush.msrb.mxu0 %v5654_v57  ;;  %2190 = vmatpush.msrb.mxu2 %v5417_v9 }
0x16df   :  { %2149 = vmatpush.msrb.mxu0 %v5661_v59  ;;  %2191 = vmatpush.msrb.mxu2 %v5424_v27 }
0x16e1   :  { %2150 = vmatpush.msrb.mxu0 %v5668_v40  ;;  %2192 = vmatpush.msrb.mxu2 %v5431_v28 }
0x16e3   :  { %2151 = vmatpush.msrb.mxu0 %v5675_v4  ;;  %2193 = vmatpush.msrb.mxu2 %v5438_v61 }
0x16e5   :  { %2152 = vmatpush.msrb.mxu0 %v5682_v22  ;;  %2194 = vmatpush.msrb.mxu2 %v5445_v56 }
0x16e7   :  { %2153 = vmatpush.msrb.mxu0 %v5689_v26  ;;  %2195 = vmatpush.msrb.mxu2 %v5452_v16 }
0x16e9   :  { %2154 = vmatpush.msrb.mxu0 %v5696_v49  ;;  %2196 = vmatpush.msrb.mxu2 %v5459_v37 }
0x16eb   :  { %2155 = vmatpush.msrb.mxu0 %v5703_v2  ;;  %2197 = vmatpush.msrb.mxu2 %v5466_v32 }
0x16ed   :  { %2156 = vmatpush.msrb.mxu0 %v5710_v3  ;;  %2198 = vmatpush.msrb.mxu2 %v5473_v8 }
0x16ef   :  { %2157 = vmatpush.msrb.mxu0 %v5717_v17  ;;  %2199 = vmatpush.msrb.mxu2 %v5723_v6 }
0x16f1   :  { %2158 = vmatpush.msrb.mxu0 %v5729_v62  ;;  %2200 = vmatpush.msrb.mxu2 %v5735_v55 }
0x16f3   :  { %2159 = vmatpush.msrb.mxu0 %v5849_v0  ;;  %2201 = vmatpush.msrb.mxu2 %v5742_v11 }
0x16f5   :  { %2160 = vmatpush.msrb.mxu0 %v6585_v29  ;;  %2202 = vmatpush.msrb.mxu2 %v6586_v18 }
0x16f7   :  { %2161 = vmatpush.msrb.mxu0 %v5863_v53  ;;  %2203 = vmatpush.msrb.mxu2 %v6587_v48 }
0x16f9   :  { %2162 = vmatpush.msrb.mxu0 %v5870_v42  ;;  %2204 = vmatpush.msrb.mxu2 %v5763_v58 }
0x175d   :  { %v2028_v19 = vpop.f32.mrf.mxu2 }
0x175e   :  { %v2029_v0 = vadd.f32 %v2028_v19, %v2008_v31  ;;  %v1986_v31 = vpop.f32.mrf.mxu0 }
0x1760   :  { %v2031_v11 = vadd.f32 %v2667_v38, %v2029_v0  ;;  %v6589_v0 = vld [vmem:[#allocation6_spill] sm:$0xff]  ;;  %v5995_v38 = vld [vmem:[%s6365_s4] ss:$0 sm:$0xff] }
0x1761   :  { %v1987_v19 = vadd.f32 %v5995_v38, %v1986_v31 }
0x1762   :  { %2761 = vtanh.f32 %v2031_v11  ;;  %2048 = vmatmul.f32.vlgmr.msrb.gmra.mxu3 %v2031_v11  ;;  %v6588_v11 = vld [vmem:[#allocation12_spill] sm:$0xff] }
0x1763   :  { %2210 = vmatpush.msrb.mxu3 %v5494_v13 }
0x1765   :  { %2211 = vmatpush.msrb.mxu3 %v5500_v23 }
0x1767   :  { %2212 = vmatpush.msrb.mxu3 %v5506_v24 }
0x1768   :  { %v2762_v48 = vpop.eup %2761 }
0x1769   :  { %2096 = vmatmul.f32.vlgmr.msra.gmra.mxu1 %v2762_v48  ;;  %2213 = vmatpush.msrb.mxu3 %v5512_v33  ;;  %v6590_v48 = vld [vmem:[#allocation8_spill] sm:$0xff] }
0x176a   :  { %2258 = vmatpush.msra.mxu1 %v5518_v35 }
0x176b   :  { %2214 = vmatpush.msrb.mxu3 %v5524_v36 }
0x176c   :  { %2259 = vmatpush.msra.mxu1 %v5530_v39 }
0x176d   :  { %2215 = vmatpush.msrb.mxu3 %v5536_v41 }
0x176e   :  { %2260 = vmatpush.msra.mxu1 %v5542_v43 }
0x176f   :  { %2216 = vmatpush.msrb.mxu3 %v5548_v47 }
0x1770   :  { %2261 = vmatpush.msra.mxu1 %v5554_v51 }
0x1771   :  { %2217 = vmatpush.msrb.mxu3 %v5560_v34 }
0x1772   :  { %2262 = vmatpush.msra.mxu1 %v5566_v10 }
0x1773   :  { %2218 = vmatpush.msrb.mxu3 %v5572_v20 }
0x1774   :  { %2263 = vmatpush.msra.mxu1 %v5578_v50 }
0x1775   :  { %2219 = vmatpush.msrb.mxu3 %v5787_v30 }
0x1776   :  { %2264 = vmatpush.msra.mxu1 %v5585_v1 }
0x1777   :  { %2220 = vmatpush.msrb.mxu3 %v5794_v52 }
0x1778   :  { %2265 = vmatpush.msra.mxu1 %v5592_v14 }
0x1779   :  { %2221 = vmatpush.msrb.mxu3 %v5801_v63 }
0x177a   :  { %2266 = vmatpush.msra.mxu1 %v5599_v21 }
0x177b   :  { %2222 = vmatpush.msrb.mxu3 %v5808_v54 }
0x177c   :  { %2267 = vmatpush.msra.mxu1 %v5606_v15 }
0x177d   :  { %2223 = vmatpush.msrb.mxu3 %v5903_v25 }
0x177e   :  { %2268 = vmatpush.msra.mxu1 %v6588_v11 }
0x177f   :  { %2224 = vmatpush.msrb.mxu3 %v6589_v0 }
0x1780   :  { %2269 = vmatpush.msra.mxu1 %v6590_v48 }
0x1781   :  { %2225 = vmatpush.msrb.mxu3 %v5917_v46 }
0x1782   :  { %2270 = vmatpush.msra.mxu1 %v5627_v60 }
0x1784   :  { %2271 = vmatpush.msra.mxu1 %v5633_v12 }
0x1786   :  { %2272 = vmatpush.msra.mxu1 %v5639_v44 }
0x1788   :  { %2273 = vmatpush.msra.mxu1 %v5645_v45 }
0x17e5   :  { %v2049_v0 = vpop.f32.mrf.mxu3 }
0x17e6   :  { %v2050_v48 = vadd.f32 %v2049_v0, %v1987_v19  ;;  %v6592_v0 = vld [vmem:[#allocation7_spill] sm:$0xff]  ;;  %v2097_v31 = vpop.f32.mrf.mxu1  ;;  %v2668_v19 = vld [vmem:[%s6366_s0 + $0xb0] sm:$0xff] }
0x17e8   :  { %2763 = vtanh.f32 %v2050_v48  ;;  %v6593_v48 = vld [vmem:[#allocation13_spill] sm:$0xff] }
0x17ee   :  { %v2764_v46 = vpop.eup %2763 }
0x17ef   :  { %2074 = vmatmul.f32.vlgmr.msra.gmra.mxu0 %v2764_v46  ;;  %2116 = vmatmul.f32.vlgmr.msra.gmra.mxu2 %v2764_v46  ;;  %v6591_v46 = vld [vmem:[#allocation10_spill] sm:$0xff] }
0x17f0   :  { %2236 = vmatpush.msra.mxu0 %v5404_v5  ;;  %2278 = vmatpush.msra.mxu2 %v5410_v7 }
0x17f2   :  { %2237 = vmatpush.msra.mxu0 %v5654_v57  ;;  %2279 = vmatpush.msra.mxu2 %v5417_v9 }
0x17f4   :  { %2238 = vmatpush.msra.mxu0 %v5661_v59  ;;  %2280 = vmatpush.msra.mxu2 %v5424_v27 }
0x17f6   :  { %2239 = vmatpush.msra.mxu0 %v5668_v40  ;;  %2281 = vmatpush.msra.mxu2 %v5431_v28 }
0x17f8   :  { %2240 = vmatpush.msra.mxu0 %v5675_v4  ;;  %2282 = vmatpush.msra.mxu2 %v5438_v61 }
0x17fa   :  { %2241 = vmatpush.msra.mxu0 %v5682_v22  ;;  %2283 = vmatpush.msra.mxu2 %v5445_v56 }
0x17fc   :  { %2242 = vmatpush.msra.mxu0 %v5689_v26  ;;  %2284 = vmatpush.msra.mxu2 %v5452_v16 }
0x17fe   :  { %2243 = vmatpush.msra.mxu0 %v5696_v49  ;;  %2285 = vmatpush.msra.mxu2 %v5459_v37 }
0x1800   :  { %2244 = vmatpush.msra.mxu0 %v5703_v2  ;;  %2286 = vmatpush.msra.mxu2 %v5466_v32 }
0x1802   :  { %2245 = vmatpush.msra.mxu0 %v5710_v3  ;;  %2287 = vmatpush.msra.mxu2 %v5473_v8 }
0x1804   :  { %2246 = vmatpush.msra.mxu0 %v5717_v17  ;;  %2288 = vmatpush.msra.mxu2 %v5723_v6 }
0x1806   :  { %2247 = vmatpush.msra.mxu0 %v5729_v62  ;;  %2289 = vmatpush.msra.mxu2 %v5735_v55 }
0x1808   :  { %2248 = vmatpush.msra.mxu0 %v6591_v46  ;;  %2290 = vmatpush.msra.mxu2 %v6592_v0 }
0x180a   :  { %2249 = vmatpush.msra.mxu0 %v6585_v29  ;;  %2291 = vmatpush.msra.mxu2 %v6586_v18 }
0x180c   :  { %2250 = vmatpush.msra.mxu0 %v5863_v53  ;;  %2292 = vmatpush.msra.mxu2 %v6593_v48 }
0x180e   :  { %2251 = vmatpush.msra.mxu0 %v5870_v42  ;;  %2293 = vmatpush.msra.mxu2 %v5763_v58 }
0x1872   :  { %v2117_v46 = vpop.f32.mrf.mxu2 }
0x1873   :  { %v2118_v55 = vadd.f32 %v2117_v46, %v2097_v31  ;;  %v6595_v46 = vld [vmem:[#allocation8_spill] sm:$0xff] }
0x1875   :  { %v2120_v0 = vadd.f32 %v2668_v19, %v2118_v55  ;;  %v6594_v55 = vld [vmem:[#allocation6_spill] sm:$0xff] }
0x1877   :  { %2765 = vtanh.f32 %v2120_v0  ;;  %2137 = vmatmul.f32.vlgmr.msra.gmra.mxu3 %v2120_v0  ;;  %v6596_v0 = vld [vmem:[#allocation5_spill] sm:$0xff] }
0x1878   :  { %2299 = vmatpush.msra.mxu3 %v5494_v13 }
0x187a   :  { %2300 = vmatpush.msra.mxu3 %v5500_v23 }
0x187c   :  { %2301 = vmatpush.msra.mxu3 %v5506_v24 }
0x187d   :  { %v2766_v48 = vpop.eup %2765 }
0x187e   :  { %2185 = vmatmul.f32.vlgmr.msrb.gmra.mxu1 %v2766_v48  ;;  %2302 = vmatpush.msra.mxu3 %v5512_v33  ;;  %v2075_v48 = vpop.f32.mrf.mxu0 }
0x187f   :  { %2347 = vmatpush.msrb.mxu1 %v5518_v35  ;;  %v2076_v31 = vadd.f32 %v5995_v38, %v2075_v48  ;;  %v6599_v48 = vld [vmem:[#allocation7_spill] sm:$0xff] }
0x1880   :  { %2303 = vmatpush.msra.mxu3 %v5524_v36 }
0x1881   :  { %2348 = vmatpush.msrb.mxu1 %v5530_v39 }
0x1882   :  { %2304 = vmatpush.msra.mxu3 %v5536_v41 }
0x1883   :  { %2349 = vmatpush.msrb.mxu1 %v5542_v43 }
0x1884   :  { %2305 = vmatpush.msra.mxu3 %v5548_v47 }
0x1885   :  { %2350 = vmatpush.msrb.mxu1 %v5554_v51 }
0x1886   :  { %2306 = vmatpush.msra.mxu3 %v5560_v34 }
0x1887   :  { %2351 = vmatpush.msrb.mxu1 %v5566_v10 }
0x1888   :  { %2307 = vmatpush.msra.mxu3 %v5572_v20 }
0x1889   :  { %2352 = vmatpush.msrb.mxu1 %v5578_v50 }
0x188a   :  { %2308 = vmatpush.msra.mxu3 %v5787_v30 }
0x188b   :  { %2353 = vmatpush.msrb.mxu1 %v5585_v1 }
0x188c   :  { %2309 = vmatpush.msra.mxu3 %v5794_v52 }
0x188d   :  { %2354 = vmatpush.msrb.mxu1 %v5592_v14 }
0x188e   :  { %2310 = vmatpush.msra.mxu3 %v5801_v63 }
0x188f   :  { %2355 = vmatpush.msrb.mxu1 %v5599_v21 }
0x1890   :  { %2311 = vmatpush.msra.mxu3 %v5808_v54 }
0x1891   :  { %2356 = vmatpush.msrb.mxu1 %v5606_v15 }
0x1892   :  { %2312 = vmatpush.msra.mxu3 %v5903_v25 }
0x1893   :  { %2357 = vmatpush.msrb.mxu1 %v6588_v11 }
0x1894   :  { %2313 = vmatpush.msra.mxu3 %v6594_v55 }
0x1895   :  { %2358 = vmatpush.msrb.mxu1 %v6595_v46 }
0x1896   :  { %2314 = vmatpush.msra.mxu3 %v6596_v0 }
0x1897   :  { %2359 = vmatpush.msrb.mxu1 %v5627_v60 }
0x1899   :  { %2360 = vmatpush.msrb.mxu1 %v5633_v12 }
0x189b   :  { %2361 = vmatpush.msrb.mxu1 %v5639_v44 }
0x189d   :  { %2362 = vmatpush.msrb.mxu1 %v5645_v45 }
0x18fa   :  { %v2138_v19 = vpop.f32.mrf.mxu3 }
0x18fb   :  { %v2139_v25 = vadd.f32 %v2138_v19, %v2076_v31  ;;  %v6600_v31 = vld [vmem:[#allocation13_spill] sm:$0xff]  ;;  %v2186_v19 = vpop.f32.mrf.mxu1 }
0x18fd   :  { %2767 = vtanh.f32 %v2139_v25  ;;  %v6597_v25 = vld [vmem:[#allocation11_spill] sm:$0xff] }
0x1903   :  { %v2768_v11 = vpop.eup %2767 }
0x1904   :  { %2163 = vmatmul.f32.vlgmr.msrb.gmra.mxu0 %v2768_v11  ;;  %2205 = vmatmul.f32.vlgmr.msrb.gmra.mxu2 %v2768_v11  ;;  %v6598_v11 = vld [vmem:[#allocation10_spill] sm:$0xff] }
0x1905   :  { %2325 = vmatpush.msrb.mxu0 %v5404_v5  ;;  %2367 = vmatpush.msrb.mxu2 %v5410_v7 }
0x1907   :  { %2326 = vmatpush.msrb.mxu0 %v5654_v57  ;;  %2368 = vmatpush.msrb.mxu2 %v5417_v9 }
0x1909   :  { %2327 = vmatpush.msrb.mxu0 %v5661_v59  ;;  %2369 = vmatpush.msrb.mxu2 %v5424_v27 }
0x190b   :  { %2328 = vmatpush.msrb.mxu0 %v5668_v40  ;;  %2370 = vmatpush.msrb.mxu2 %v5431_v28 }
0x190d   :  { %2329 = vmatpush.msrb.mxu0 %v5675_v4  ;;  %2371 = vmatpush.msrb.mxu2 %v5438_v61 }
0x190f   :  { %2330 = vmatpush.msrb.mxu0 %v5682_v22  ;;  %2372 = vmatpush.msrb.mxu2 %v5445_v56 }
0x1911   :  { %2331 = vmatpush.msrb.mxu0 %v5689_v26  ;;  %2373 = vmatpush.msrb.mxu2 %v5452_v16 }
0x1913   :  { %2332 = vmatpush.msrb.mxu0 %v5696_v49  ;;  %2374 = vmatpush.msrb.mxu2 %v5459_v37 }
0x1915   :  { %2333 = vmatpush.msrb.mxu0 %v5703_v2  ;;  %2375 = vmatpush.msrb.mxu2 %v5466_v32 }
0x1917   :  { %2334 = vmatpush.msrb.mxu0 %v5710_v3  ;;  %2376 = vmatpush.msrb.mxu2 %v5473_v8 }
0x1919   :  { %2335 = vmatpush.msrb.mxu0 %v5717_v17  ;;  %2377 = vmatpush.msrb.mxu2 %v5723_v6 }
0x191b   :  { %2336 = vmatpush.msrb.mxu0 %v5729_v62  ;;  %2378 = vmatpush.msrb.mxu2 %v6597_v25  ;;  %v2669_v25 = vld [vmem:[%s6366_s0 + $0xb8] sm:$0xff] }
0x191d   :  { %2337 = vmatpush.msrb.mxu0 %v6598_v11  ;;  %2379 = vmatpush.msrb.mxu2 %v6599_v48 }
0x191f   :  { %2338 = vmatpush.msrb.mxu0 %v6585_v29  ;;  %2380 = vmatpush.msrb.mxu2 %v6586_v18 }
0x1921   :  { %2339 = vmatpush.msrb.mxu0 %v5863_v53  ;;  %2381 = vmatpush.msrb.mxu2 %v6600_v31 }
0x1923   :  { %2340 = vmatpush.msrb.mxu0 %v5870_v42  ;;  %2382 = vmatpush.msrb.mxu2 %v5763_v58 }
0x1987   :  { %v2206_v11 = vpop.f32.mrf.mxu2 }
0x1988   :  { %v2207_v62 = vadd.f32 %v2206_v11, %v2186_v19  ;;  %v2164_v11 = vpop.f32.mrf.mxu0 }
0x198a   :  { %v2209_v48 = vadd.f32 %v2669_v25, %v2207_v62  ;;  %v6601_v62 = vld [vmem:[#allocation14_spill] sm:$0xff]  ;;  %v6602_v25 = vld [vmem:[#allocation12_spill] sm:$0xff] }
0x198c   :  { %2769 = vtanh.f32 %v2209_v48  ;;  %2226 = vmatmul.f32.vlgmr.msrb.gmra.mxu3 %v2209_v48  ;;  %v2165_v48 = vadd.f32 %v5995_v38, %v2164_v11  ;;  %v2609_v11 = vld [vmem:[%s6367_s5 + $0x78] sm:$0xff] }
0x198d   :  { %2388 = vmatpush.msrb.mxu3 %v5494_v13 }
0x198f   :  { %2389 = vmatpush.msrb.mxu3 %v5500_v23 }
0x1991   :  { %2390 = vmatpush.msrb.mxu3 %v5506_v24 }
0x1992   :  { %v2770_v31 = vpop.eup %2769 }
0x1993   :  { %2274 = vmatmul.f32.vlgmr.msra.gmra.mxu1 %v2770_v31  ;;  %2391 = vmatpush.msrb.mxu3 %v5512_v33 }
0x1994   :  { %2436 = vmatpush.msra.mxu1 %v5518_v35 }
0x1995   :  { %2392 = vmatpush.msrb.mxu3 %v5524_v36 }
0x1996   :  { %2437 = vmatpush.msra.mxu1 %v5530_v39 }
0x1997   :  { %2393 = vmatpush.msrb.mxu3 %v5536_v41 }
0x1998   :  { %2438 = vmatpush.msra.mxu1 %v5542_v43 }
0x1999   :  { %2394 = vmatpush.msrb.mxu3 %v5548_v47 }
0x199a   :  { %2439 = vmatpush.msra.mxu1 %v5554_v51 }
0x199b   :  { %2395 = vmatpush.msrb.mxu3 %v5560_v34 }
0x199c   :  { %2440 = vmatpush.msra.mxu1 %v5566_v10 }
0x199d   :  { %2396 = vmatpush.msrb.mxu3 %v5572_v20 }
0x199e   :  { %2441 = vmatpush.msra.mxu1 %v5578_v50 }
0x199f   :  { %2397 = vmatpush.msrb.mxu3 %v5787_v30 }
0x19a0   :  { %2442 = vmatpush.msra.mxu1 %v5585_v1 }
0x19a1   :  { %2398 = vmatpush.msrb.mxu3 %v5794_v52 }
0x19a2   :  { %2443 = vmatpush.msra.mxu1 %v5592_v14 }
0x19a3   :  { %2399 = vmatpush.msrb.mxu3 %v5801_v63 }
0x19a4   :  { %2444 = vmatpush.msra.mxu1 %v5599_v21 }
0x19a5   :  { %2400 = vmatpush.msrb.mxu3 %v5808_v54 }
0x19a6   :  { %2445 = vmatpush.msra.mxu1 %v5606_v15 }
0x19a7   :  { %2401 = vmatpush.msrb.mxu3 %v6601_v62 }
0x19a8   :  { %2446 = vmatpush.msra.mxu1 %v6602_v25 }
0x19a9   :  { %2402 = vmatpush.msrb.mxu3 %v6594_v55 }
0x19aa   :  { %2447 = vmatpush.msra.mxu1 %v6595_v46 }
0x19ab   :  { %2403 = vmatpush.msrb.mxu3 %v6596_v0 }
0x19ac   :  { %2448 = vmatpush.msra.mxu1 %v5627_v60 }
0x19ae   :  { %2449 = vmatpush.msra.mxu1 %v5633_v12 }
0x19b0   :  { %2450 = vmatpush.msra.mxu1 %v5639_v44 }
0x19b2   :  { %2451 = vmatpush.msra.mxu1 %v5645_v45 }
0x1a0f   :  { %v2227_v31 = vpop.f32.mrf.mxu3 }
0x1a10   :  { %v2228_v19 = vadd.f32 %v2227_v31, %v2165_v48  ;;  %v2608_v48 = vld [vmem:[%s6367_s5 + $0x70] sm:$0xff]  ;;  %v2607_v31 = vld [vmem:[%s6367_s5 + $0x68] sm:$0xff] }
0x1a12   :  { %2771 = vtanh.f32 %v2228_v19  ;;  %v2606_v19 = vld [vmem:[%s6367_s5 + $0x60] sm:$0xff] }
0x1a18   :  { %v2772_v25 = vpop.eup %2771 }
0x1a19   :  { %2252 = vmatmul.f32.vlgmr.msra.gmra.mxu0 %v2772_v25  ;;  %2294 = vmatmul.f32.vlgmr.msra.gmra.mxu2 %v2772_v25 }
0x1a1a   :  { %2414 = vmatpush.msra.mxu0 %v5404_v5  ;;  %2456 = vmatpush.msra.mxu2 %v5410_v7  ;;  %v6603_v5 = vld [vmem:[#allocation4_spill] sm:$0xff]  ;;  %v6604_v7 = vld [vmem:[#allocation11_spill] sm:$0xff] }
0x1a1c   :  { %2415 = vmatpush.msra.mxu0 %v5654_v57  ;;  %2457 = vmatpush.msra.mxu2 %v5417_v9  ;;  %v6605_v9 = vld [vmem:[#allocation10_spill] sm:$0xff] }
0x1a1e   :  { %2416 = vmatpush.msra.mxu0 %v5661_v59  ;;  %2458 = vmatpush.msra.mxu2 %v5424_v27  ;;  %v6606_v27 = vld [vmem:[#allocation7_spill] sm:$0xff] }
0x1a20   :  { %2417 = vmatpush.msra.mxu0 %v5668_v40  ;;  %2459 = vmatpush.msra.mxu2 %v5431_v28  ;;  %v6607_v28 = vld [vmem:[#allocation13_spill] sm:$0xff] }
0x1a22   :  { %2418 = vmatpush.msra.mxu0 %v5675_v4  ;;  %2460 = vmatpush.msra.mxu2 %v5438_v61  ;;  %v2275_v61 = vpop.f32.mrf.mxu1 }
0x1a24   :  { %2419 = vmatpush.msra.mxu0 %v5682_v22  ;;  %2461 = vmatpush.msra.mxu2 %v5445_v56  ;;  %v2670_v56 = vld [vmem:[%s6366_s0 + $0xc0] sm:$0xff] }
0x1a26   :  { %2420 = vmatpush.msra.mxu0 %v5689_v26  ;;  %2462 = vmatpush.msra.mxu2 %v5452_v16 }
0x1a28   :  { %2421 = vmatpush.msra.mxu0 %v5696_v49  ;;  %2463 = vmatpush.msra.mxu2 %v5459_v37 }
0x1a2a   :  { %2422 = vmatpush.msra.mxu0 %v5703_v2  ;;  %2464 = vmatpush.msra.mxu2 %v5466_v32 }
0x1a2c   :  { %2423 = vmatpush.msra.mxu0 %v5710_v3  ;;  %2465 = vmatpush.msra.mxu2 %v5473_v8 }
0x1a2e   :  { %2424 = vmatpush.msra.mxu0 %v5717_v17  ;;  %2466 = vmatpush.msra.mxu2 %v5723_v6 }
0x1a30   :  { %2425 = vmatpush.msra.mxu0 %v6603_v5  ;;  %2467 = vmatpush.msra.mxu2 %v6604_v7 }
0x1a32   :  { %2426 = vmatpush.msra.mxu0 %v6605_v9  ;;  %2468 = vmatpush.msra.mxu2 %v6606_v27 }
0x1a34   :  { %2427 = vmatpush.msra.mxu0 %v6585_v29  ;;  %2469 = vmatpush.msra.mxu2 %v6586_v18 }
0x1a36   :  { %2428 = vmatpush.msra.mxu0 %v5863_v53  ;;  %2470 = vmatpush.msra.mxu2 %v6607_v28 }
0x1a38   :  { %2429 = vmatpush.msra.mxu0 %v5870_v42  ;;  %2471 = vmatpush.msra.mxu2 %v5763_v58 }
0x1a9c   :  { %v2295_v16 = vpop.f32.mrf.mxu2 }
0x1a9d   :  { %v2296_v37 = vadd.f32 %v2295_v16, %v2275_v61  ;;  %v2600_v61 = vld [vmem:[%s6367_s5 + $0x30] sm:$0xff] }
0x1a9f   :  { %v2298_v32 = vadd.f32 %v2670_v56, %v2296_v37  ;;  %v2599_v56 = vld [vmem:[%s6367_s5 + $0x28] sm:$0xff]  ;;  %v2673_v37 = vld [vmem:[%s6366_s0 + $0xd8] sm:$0xff] }
0x1aa1   :  { %2773 = vtanh.f32 %v2298_v32  ;;  %2315 = vmatmul.f32.vlgmr.msra.gmra.mxu3 %v2298_v32 }
0x1aa2   :  { %2477 = vmatpush.msra.mxu3 %v5494_v13  ;;  %v6608_v13 = vld [vmem:[#allocation12_spill] sm:$0xff] }
0x1aa4   :  { %2478 = vmatpush.msra.mxu3 %v5500_v23  ;;  %v2253_v23 = vpop.f32.mrf.mxu0 }
0x1aa6   :  { %2479 = vmatpush.msra.mxu3 %v5506_v24  ;;  %v2254_v24 = vadd.f32 %v5995_v38, %v2253_v23 }
0x1aa7   :  { %v2774_v8 = vpop.eup %2773 }
0x1aa8   :  { %2363 = vmatmul.f32.vlgmr.msrb.gmra.mxu1 %v2774_v8  ;;  %2480 = vmatpush.msra.mxu3 %v5512_v33 }
0x1aa9   :  { %2525 = vmatpush.msrb.mxu1 %v5518_v35 }
0x1aaa   :  { %2481 = vmatpush.msra.mxu3 %v5524_v36 }
0x1aab   :  { %2526 = vmatpush.msrb.mxu1 %v5530_v39  ;;  %v2984_v39 = vld [vmem:[%s6364_s3 + $0x78] sm:$0xff] }
0x1aac   :  { %2482 = vmatpush.msra.mxu3 %v5536_v41  ;;  %v2985_v41 = vld [vmem:[%s6362_s1 + $0xf8] sm:$0xff] }
0x1aad   :  { %2527 = vmatpush.msrb.mxu1 %v5542_v43  ;;  %v2986_v43 = vld [vmem:[%s6362_s1 + $0xf0] sm:$0xff] }
0x1aae   :  { %2483 = vmatpush.msra.mxu3 %v5548_v47  ;;  %v2987_v47 = vld [vmem:[%s6362_s1 + $0xe8] sm:$0xff] }
0x1aaf   :  { %2528 = vmatpush.msrb.mxu1 %v5554_v51  ;;  %v2988_v51 = vld [vmem:[%s6362_s1 + $0xe0] sm:$0xff] }
0x1ab0   :  { %2484 = vmatpush.msra.mxu3 %v5560_v34  ;;  %v2989_v34 = vld [vmem:[%s6362_s1 + $0xd8] sm:$0xff] }
0x1ab1   :  { %2529 = vmatpush.msrb.mxu1 %v5566_v10  ;;  %v2990_v10 = vld [vmem:[%s6362_s1 + $0xd0] sm:$0xff] }
0x1ab2   :  { %2485 = vmatpush.msra.mxu3 %v5572_v20  ;;  %v2991_v20 = vld [vmem:[%s6362_s1 + $0xc8] sm:$0xff] }
0x1ab3   :  { %2530 = vmatpush.msrb.mxu1 %v5578_v50  ;;  %v2992_v50 = vld [vmem:[%s6362_s1 + $0xc0] sm:$0xff] }
0x1ab4   :  { %2486 = vmatpush.msra.mxu3 %v5787_v30 }
0x1ab5   :  { %2531 = vmatpush.msrb.mxu1 %v5585_v1  ;;  %v2993_v1 = vld [vmem:[%s6362_s1 + $0xb8] sm:$0xff] }
0x1ab6   :  { %2487 = vmatpush.msra.mxu3 %v5794_v52 }
0x1ab7   :  { %2532 = vmatpush.msrb.mxu1 %v5592_v14  ;;  %v2994_v14 = vld [vmem:[%s6362_s1 + $0xb0] sm:$0xff] }
0x1ab8   :  { %2488 = vmatpush.msra.mxu3 %v5801_v63 }
0x1ab9   :  { %2533 = vmatpush.msrb.mxu1 %v5599_v21 }
0x1aba   :  { %2489 = vmatpush.msra.mxu3 %v5808_v54 }
0x1abb   :  { %2534 = vmatpush.msrb.mxu1 %v5606_v15  ;;  %v2671_v15 = vld [vmem:[%s6366_s0 + $0xc8] sm:$0xff] }
0x1abc   :  { %2490 = vmatpush.msra.mxu3 %v6601_v62 }
0x1abd   :  { %2535 = vmatpush.msrb.mxu1 %v6608_v13 }
0x1abe   :  { %2491 = vmatpush.msra.mxu3 %v6594_v55 }
0x1abf   :  { %2536 = vmatpush.msrb.mxu1 %v6595_v46 }
0x1ac0   :  { %2492 = vmatpush.msra.mxu3 %v6596_v0 }
0x1ac1   :  { %2537 = vmatpush.msrb.mxu1 %v5627_v60 }
0x1ac3   :  { %2538 = vmatpush.msrb.mxu1 %v5633_v12 }
0x1ac5   :  { %2539 = vmatpush.msrb.mxu1 %v5639_v44 }
0x1ac7   :  { %2540 = vmatpush.msrb.mxu1 %v5645_v45  ;;  %v2995_v45 = vld [vmem:[%s6363_s2 + $0x78] sm:$0xff] }
0x1b24   :  { %v2316_v33 = vpop.f32.mrf.mxu3 }
0x1b25   :  { %v2317_v35 = vadd.f32 %v2316_v33, %v2254_v24  ;;  %v2364_v21 = vpop.f32.mrf.mxu1  ;;  %v2598_v24 = vld [vmem:[%s6367_s5 + $0x20] sm:$0xff]  ;;  %v2597_v33 = vld [vmem:[%s6367_s5 + $0x18] sm:$0xff] }
0x1b27   :  { %2775 = vtanh.f32 %v2317_v35  ;;  %v2596_v35 = vld [vmem:[%s6367_s5 + $0x10] sm:$0xff] }
0x1b2d   :  { %v2776_v36 = vpop.eup %2775 }
0x1b2e   :  { %2341 = vmatmul.f32.vlgmr.msrb.gmra.mxu0 %v2776_v36  ;;  %2383 = vmatmul.f32.vlgmr.msrb.gmra.mxu2 %v2776_v36  ;;  %v2595_v36 = vld [vmem:[%s6367_s5 + $0x8] sm:$0xff] }
0x1b2f   :  { %2503 = vmatpush.msrb.mxu0 %v2984_v39  ;;  %2545 = vmatpush.msrb.mxu2 %v2985_v41  ;;  %v2594_v39 = vld [vmem:[%s6367_s5] sm:$0xff] }
0x1b31   :  { %2504 = vmatpush.msrb.mxu0 %v5654_v57  ;;  %2546 = vmatpush.msrb.mxu2 %v2986_v43  ;;  %v2996_v57 = vld [vmem:[%s6363_s2 + $0x70] sm:$0xff] }
0x1b33   :  { %2505 = vmatpush.msrb.mxu0 %v5661_v59  ;;  %2547 = vmatpush.msrb.mxu2 %v2987_v47  ;;  %v2997_v59 = vld [vmem:[%s6363_s2 + $0x68] sm:$0xff] }
0x1b35   :  { %2506 = vmatpush.msrb.mxu0 %v5668_v40  ;;  %2548 = vmatpush.msrb.mxu2 %v2988_v51 }
0x1b37   :  { %2507 = vmatpush.msrb.mxu0 %v5675_v4  ;;  %2549 = vmatpush.msrb.mxu2 %v2989_v34  ;;  %v2998_v4 = vld [vmem:[%s6363_s2 + $0x60] sm:$0xff] }
0x1b39   :  { %2508 = vmatpush.msrb.mxu0 %v5682_v22  ;;  %2550 = vmatpush.msrb.mxu2 %v2990_v10  ;;  %v2999_v22 = vld [vmem:[%s6363_s2 + $0x58] sm:$0xff]  ;;  %v2676_v10 = vld [vmem:[%s6369_s6] ss:$0 sm:$0xff] }
0x1b3b   :  { %2509 = vmatpush.msrb.mxu0 %v5689_v26  ;;  %2551 = vmatpush.msrb.mxu2 %v2991_v20  ;;  %v3000_v26 = vld [vmem:[%s6363_s2 + $0x50] sm:$0xff] }
0x1b3d   :  { %2510 = vmatpush.msrb.mxu0 %v5696_v49  ;;  %2552 = vmatpush.msrb.mxu2 %v2992_v50  ;;  %v3001_v49 = vld [vmem:[%s6363_s2 + $0x48] sm:$0xff] }
0x1b3f   :  { %2511 = vmatpush.msrb.mxu0 %v5703_v2  ;;  %2553 = vmatpush.msrb.mxu2 %v2993_v1  ;;  %v3002_v2 = vld [vmem:[%s6363_s2 + $0x40] sm:$0xff] }
0x1b41   :  { %2512 = vmatpush.msrb.mxu0 %v5710_v3  ;;  %2554 = vmatpush.msrb.mxu2 %v2994_v14  ;;  %v3003_v3 = vld [vmem:[%s6363_s2 + $0x38] sm:$0xff] }
0x1b43   :  { %2513 = vmatpush.msrb.mxu0 %v5717_v17  ;;  %2555 = vmatpush.msrb.mxu2 %v5723_v6 }
0x1b45   :  { %2514 = vmatpush.msrb.mxu0 %v6603_v5  ;;  %2556 = vmatpush.msrb.mxu2 %v6604_v7  ;;  %v2605_v5 = vld [vmem:[%s6367_s5 + $0x58] sm:$0xff]  ;;  %v2604_v7 = vld [vmem:[%s6367_s5 + $0x50] sm:$0xff] }
0x1b47   :  { %2515 = vmatpush.msrb.mxu0 %v6605_v9  ;;  %2557 = vmatpush.msrb.mxu2 %v6606_v27  ;;  %v2603_v9 = vld [vmem:[%s6367_s5 + $0x48] sm:$0xff]  ;;  %v2602_v27 = vld [vmem:[%s6367_s5 + $0x40] sm:$0xff] }
0x1b49   :  { %2516 = vmatpush.msrb.mxu0 %v6585_v29  ;;  %2558 = vmatpush.msrb.mxu2 %v6586_v18 }
0x1b4b   :  { %2517 = vmatpush.msrb.mxu0 %v5863_v53  ;;  %2559 = vmatpush.msrb.mxu2 %v6607_v28  ;;  %v2601_v28 = vld [vmem:[%s6367_s5 + $0x38] sm:$0xff] }
0x1b4d   :  { %2518 = vmatpush.msrb.mxu0 %v5870_v42  ;;  %2560 = vmatpush.msrb.mxu2 %v5763_v58 }
0x1bab   :  { %v2342_v17 = vpop.f32.mrf.mxu0 }
0x1bac   :  { %v2343_v6 = vadd.f32 %v5995_v38, %v2342_v17 }
0x1bb1   :  { %v2384_v60 = vpop.f32.mrf.mxu2 }
0x1bb2   :  { %v2385_v12 = vadd.f32 %v2384_v60, %v2364_v21 }
0x1bb4   :  { %v2387_v44 = vadd.f32 %v2671_v15, %v2385_v12 }
0x1bb6   :  { %2777 = vtanh.f32 %v2387_v44  ;;  %2404 = vmatmul.f32.vlgmr.msrb.gmra.mxu3 %v2387_v44 }
0x1bb7   :  { %2566 = vmatpush.msrb.mxu3 %v2995_v45 }
0x1bb9   :  { %2567 = vmatpush.msrb.mxu3 %v2996_v57 }
0x1bbb   :  { %2568 = vmatpush.msrb.mxu3 %v2997_v59 }
0x1bbc   :  { %v2778_v40 = vpop.eup %2777 }
0x1bbd   :  { %2452 = vmatmul.f32.vlgmr.msra.gmra.mxu1 %v2778_v40  ;;  %2569 = vmatpush.msrb.mxu3 %v2998_v4 }
0x1bbf   :  { %2570 = vmatpush.msrb.mxu3 %v2999_v22 }
0x1bc1   :  { %2571 = vmatpush.msrb.mxu3 %v3000_v26 }
0x1bc3   :  { %2572 = vmatpush.msrb.mxu3 %v3001_v49 }
0x1bc5   :  { %2573 = vmatpush.msrb.mxu3 %v3002_v2 }
0x1bc7   :  { %2574 = vmatpush.msrb.mxu3 %v3003_v3 }
0x1bc9   :  { %2575 = vmatpush.msrb.mxu3 %v5787_v30 }
0x1bcb   :  { %2576 = vmatpush.msrb.mxu3 %v5794_v52  ;;  %v2672_v52 = vld [vmem:[%s6366_s0 + $0xd0] sm:$0xff] }
0x1bcd   :  { %2577 = vmatpush.msrb.mxu3 %v5801_v63 }
0x1bcf   :  { %2578 = vmatpush.msrb.mxu3 %v5808_v54 }
0x1bd1   :  { %2579 = vmatpush.msrb.mxu3 %v6601_v62 }
0x1bd3   :  { %2580 = vmatpush.msrb.mxu3 %v6594_v55 }
0x1bd5   :  { %2581 = vmatpush.msrb.mxu3 %v6596_v0 }
0x1c39   :  { %v2405_v58 = vpop.f32.mrf.mxu3 }
0x1c3a   :  { %v2406_v53 = vadd.f32 %v2405_v58, %v2343_v6  ;;  %v2453_v30 = vpop.f32.mrf.mxu1 }
0x1c3c   :  { %2779 = vtanh.f32 %v2406_v53 }
0x1c42   :  { %v2780_v42 = vpop.eup %2779 }
0x1c43   :  { %2430 = vmatmul.f32.vlgmr.msra.gmra.mxu0 %v2780_v42  ;;  %2472 = vmatmul.f32.vlgmr.msra.gmra.mxu2 %v2780_v42 }
0x1c44   :  { %2614 = vmatpush.msra.mxu0 %v2609_v11 }
0x1c46   :  { %2615 = vmatpush.msra.mxu0 %v2608_v48 }
0x1c48   :  { %2616 = vmatpush.msra.mxu0 %v2607_v31 }
0x1c4a   :  { %2617 = vmatpush.msra.mxu0 %v2606_v19 }
0x1c4c   :  { %2618 = vmatpush.msra.mxu0 %v2605_v5 }
0x1c4e   :  { %2619 = vmatpush.msra.mxu0 %v2604_v7 }
0x1c50   :  { %2620 = vmatpush.msra.mxu0 %v2603_v9 }
0x1c52   :  { %2621 = vmatpush.msra.mxu0 %v2602_v27 }
0x1c54   :  { %2622 = vmatpush.msra.mxu0 %v2601_v28 }
0x1c56   :  { %2623 = vmatpush.msra.mxu0 %v2600_v61 }
0x1c58   :  { %2624 = vmatpush.msra.mxu0 %v2599_v56 }
0x1c5a   :  { %2625 = vmatpush.msra.mxu0 %v2598_v24 }
0x1c5c   :  { %2626 = vmatpush.msra.mxu0 %v2597_v33 }
0x1c5e   :  { %2627 = vmatpush.msra.mxu0 %v2596_v35 }
0x1c60   :  { %2628 = vmatpush.msra.mxu0 %v2595_v36 }
0x1c62   :  { %2629 = vmatpush.msra.mxu0 %v2594_v39 }
0x1cc0   :  { %v2431_v55 = vpop.f32.mrf.mxu0 }
0x1cc1   :  { %v2432_v46 = vadd.f32 %v5995_v38, %v2431_v55 }
0x1cc6   :  { %v2473_v63 = vpop.f32.mrf.mxu2 }
0x1cc7   :  { %v2474_v54 = vadd.f32 %v2473_v63, %v2453_v30 }
0x1cc9   :  { %v2476_v29 = vadd.f32 %v2672_v52, %v2474_v54 }
0x1ccb   :  { %2781 = vtanh.f32 %v2476_v29  ;;  %2493 = vmatmul.f32.vlgmr.msra.gmra.mxu3 %v2476_v29 }
0x1cd1   :  { %v2782_v18 = vpop.eup %2781 }
0x1cd2   :  { %2541 = vmatmul.f32.vlgmr.msrb.gmra.mxu1 %v2782_v18 }
0x1d4e   :  { %v2494_v0 = vpop.f32.mrf.mxu3 }
0x1d4f   :  { %v2495_v62 = vadd.f32 %v2494_v0, %v2432_v46  ;;  %v2542_v16 = vpop.f32.mrf.mxu1 }
0x1d51   :  { %2783 = vtanh.f32 %v2495_v62 }
0x1d57   :  { %v2784_v25 = vpop.eup %2783 }
0x1d58   :  { %2519 = vmatmul.f32.vlgmr.msrb.gmra.mxu0 %v2784_v25  ;;  %2561 = vmatmul.f32.vlgmr.msrb.gmra.mxu2 %v2784_v25 }
0x1dd5   :  { %v2520_v41 = vpop.f32.mrf.mxu0 }
0x1dd6   :  { %v2521_v43 = vadd.f32 %v5995_v38, %v2520_v41 }
0x1ddb   :  { %v2562_v32 = vpop.f32.mrf.mxu2 }
0x1ddc   :  { %v2563_v8 = vadd.f32 %v2562_v32, %v2542_v16 }
0x1dde   :  { %v2565_v13 = vadd.f32 %v2673_v37, %v2563_v8 }
0x1de0   :  { %2785 = vtanh.f32 %v2565_v13  ;;  %2582 = vmatmul.f32.vlgmr.msrb.gmra.mxu3 %v2565_v13 }
0x1de6   :  { %v2786_v23 = vpop.eup %2785 }
0x1de7   :  { %2592 = vst [vmem:[%s6368_s8] sm:$0xff] %v2786_v23 }
0x1e63   :  { %v2583_v47 = vpop.f32.mrf.mxu3 }
0x1e64   :  { %v2584_v51 = vadd.f32 %v2583_v47, %v2521_v43 }
0x1e66   :  { %2787 = vtanh.f32 %v2584_v51 }
0x1e6c   :  { %v2788_v34 = vpop.eup %2787 }
0x1e6d   :  { %2593 = vst [vmem:[%s6370_s9] sm:$0xff] %v2788_v34  ;;  %2630 = vmatmul.f32.vlgmr.msra.gmra.mxu0 %v2788_v34 }
0x1eea   :  { %v2631_v20 = vpop.f32.mrf.mxu0 }
0x1eeb   :  { %v2632_v50 = vadd.f32 %v2676_v10, %v2631_v20 }
0x1eed   :  { %2634 = vst [vmem:[%s6371_s7] sm:$0xff] %v2632_v50 }

</bundles_post_ra>
